<compile_context>
chip_gen: v7x
topology: tpu7x:2x2x1
jax: 0.10.0
libtpu: 0.0.40
codegen_flags: <defaults>
</compile_context>

<pallas_src>
import functools

import jax
import jax.numpy as jnp
from jax.experimental import pallas as pl
from jax.experimental.pallas import tpu as pltpu

# torchvision VGG19 "features" configuration ('E')
VGG19_CFG = [64, 64, 'M', 128, 128, 'M', 256, 256, 256, 256, 'M',
             512, 512, 512, 512, 'M', 512, 512, 512, 512, 'M']


@functools.lru_cache(maxsize=None)
def _vmem_limit_bytes():
    # Generation-aware cap: ~3/4 of physical VMEM, never more than 100 MiB.
    try:
        cap = pltpu.get_tpu_info().vmem_capacity_bytes
    except Exception:
        cap = 64 * 1024 * 1024
    return int(min(100 * 1024 * 1024, cap * 3 // 4))


def _pick_rows(H, W, Cout):
    """Output rows per grid step: maximize the MXU M-dim (rows*(W+2)) while keeping
    the f32 accumulator <= ~160 KiB, rows | H, and the flat row-block length a
    multiple of 16 (bf16 sublane packing) whenever more than one row block is used."""
    wp = W + 2
    budget = 160 * 1024
    best, r = 1, 1
    while r <= H:
        if H % r == 0:
            m = r * wp
            if (r == H or m % 16 == 0) and m * Cout * 4 <= budget:
                best = r
        r *= 2
    return best


def _conv3x3_relu_kernel(x_ref, w_ref, b_ref, o_ref, *, rows, W, Wp, im2col):
    # x_ref: (1, (H+3)*Wp, Cin) bf16  zero-padded image with H and W flattened together
    # w_ref: (9, Cin, Cout) bf16, or (9, Cout) bf16 when im2col (Cin == 1)
    # b_ref: (1, Cout) f32
    # o_ref: (1, rows, W, Cout) bf16  -- the `rows` output rows of this row block
    Cout = o_ref.shape[3]
    M = rows * Wp                 # matmul M (includes 2 discarded columns per row)
    L = M + 2 * Wp + 2            # slab covering all 9 tap windows

    base = pl.program_id(1) * M   # flat start of this row block (aligned by construction)
    if M % 16 == 0:
        base = pl.multiple_of(base, 16)
    big = x_ref[0, pl.ds(base, L), :]   # single aligned dynamic load; taps = static slices

    bias = b_ref[...]             # hoisted: read/broadcast bias once per block

    if im2col:
        # Cin == 1: fold the 9 taps into the contraction dim -> one K=9 matmul
        cols = [big[dy * Wp + dx: dy * Wp + dx + M, :]
                for dy in range(3) for dx in range(3)]          # 9 x (M, 1)
        patch = jnp.concatenate(cols, axis=-1)                  # (M, 9)
        acc = jnp.dot(patch, w_ref[...], preferred_element_type=jnp.float32)
    else:
        acc = jnp.zeros((M, Cout), jnp.float32)
        for k in range(9):                                      # unrolled 3x3 taps
            dy, dx = k // 3, k % 3
            slab = big[dy * Wp + dx: dy * Wp + dx + M, :]       # (M, Cin)
            acc = acc + jnp.dot(slab, w_ref[k],
                                preferred_element_type=jnp.float32)

    y = jnp.maximum(acc + bias, 0.0)                            # fused bias + ReLU (f32)
    for i in range(rows):                                       # drop the 2 junk cols/row
        o_ref[0, i] = y[i * Wp: i * Wp + W, :].astype(o_ref.dtype)


def conv3x3_relu(x, w_hwio, bias):
    # x: (N, H, W, Cin) bf16 ; w_hwio: (3, 3, Cin, Cout) bf16 ; bias: (Cout,) f32
    N, H, W, Cin = x.shape
    Cout = w_hwio.shape[-1]
    Wp = W + 2
    rows = _pick_rows(H, W, Cout)
    nrb = H // rows

    # zero pad: 1 row top, 2 rows bottom (1 halo + 1 guard so the flat slab never
    # reads out of bounds), 1 column each side; then flatten (H, W) -> H*Wp.
    x_pad = jnp.pad(x, ((0, 0), (1, 2), (1, 1), (0, 0)))
    x_flat = x_pad.reshape(N, (H + 3) * Wp, Cin)

    im2col = (Cin == 1)
    if im2col:
        w_k = w_hwio.reshape(9, Cout)
        w_spec = pl.BlockSpec((9, Cout), lambda n, r: (0, 0))
    else:
        w_k = w_hwio.reshape(9, Cin, Cout)
        w_spec = pl.BlockSpec((9, Cin, Cout), lambda n, r: (0, 0, 0))
    b2 = bias.reshape(1, Cout).astype(jnp.float32)

    kernel = functools.partial(_conv3x3_relu_kernel,
                               rows=rows, W=W, Wp=Wp, im2col=im2col)
    return pl.pallas_call(
        kernel,
        out_shape=jax.ShapeDtypeStruct((N, H, W, Cout), jnp.bfloat16),
        grid_spec=pltpu.PrefetchScalarGridSpec(
            num_scalar_prefetch=0,
            grid=(N, nrb),
            in_specs=[
                pl.BlockSpec((1, (H + 3) * Wp, Cin), lambda n, r: (n, 0, 0)),
                w_spec,
                pl.BlockSpec((1, Cout), lambda n, r: (0, 0)),
            ],
            out_specs=pl.BlockSpec((1, rows, W, Cout), lambda n, r: (n, r, 0, 0)),
        ),
        compiler_params=pltpu.CompilerParams(
            dimension_semantics=("parallel", "parallel"),
            vmem_limit_bytes=_vmem_limit_bytes()),
    )(x_flat, w_k, b2)


def _maxpool2x2_kernel(x_ref, o_ref, *, C):
    # x_ref: (1, H, Wo, 2*C) -- adjacent column pairs folded into the lane dim
    # o_ref: (1, Ho, Wo, C)
    Ho = o_ref.shape[1]
    for h in range(Ho):                                         # unrolled (Ho <= 16 here)
        m = jnp.maximum(x_ref[0, 2 * h], x_ref[0, 2 * h + 1])   # (Wo, 2C) row-pair max
        o_ref[0, h] = jnp.maximum(m[:, :C], m[:, C:])           # column-pair max


def maxpool2x2(x):
    N, H, W, C = x.shape
    Ho, Wo = H // 2, W // 2
    # memory-order-preserving (free) reshape: fold column pairs into the lane dim so
    # the kernel needs no strided sublane loads.
    x_r = x.reshape(N, H, Wo, 2 * C)
    return pl.pallas_call(
        functools.partial(_maxpool2x2_kernel, C=C),
        out_shape=jax.ShapeDtypeStruct((N, Ho, Wo, C), x.dtype),
        grid_spec=pltpu.PrefetchScalarGridSpec(
            num_scalar_prefetch=0,
            grid=(N,),
            in_specs=[pl.BlockSpec((1, H, Wo, 2 * C), lambda n: (n, 0, 0, 0))],
            out_specs=pl.BlockSpec((1, Ho, Wo, C), lambda n: (n, 0, 0, 0)),
        ),
        compiler_params=pltpu.CompilerParams(
            dimension_semantics=("parallel",),
            vmem_limit_bytes=_vmem_limit_bytes()),
    )(x_r)


def init_vgg19_params(key):
    """Deterministic He-normal init with the module's exact parameter shapes."""
    params = []
    cin = 1
    conv_idx = 0
    for v in VGG19_CFG:
        if v == 'M':
            params.append(('pool', None, None))
            continue
        kw, kb = jax.random.split(jax.random.fold_in(key, conv_idx))
        fan_in = 9 * cin
        std = (2.0 / fan_in) ** 0.5
        w = (std * jax.random.normal(kw, (3, 3, cin, v), jnp.float32)
             ).astype(jnp.bfloat16)                              # HWIO, bf16 for the MXU
        if conv_idx == 0:
            b = jnp.zeros((v,), jnp.float32)    # replaced first conv: bias=False
        else:
            b = 0.01 * jax.random.normal(kb, (v,), jnp.float32)
        params.append(('conv', w, b))
        cin = v
        conv_idx += 1
    return params


def feature_extractor(x_nchw, params):
    """Forward pass. Input NCHW (N,1,H,W) -> output NCHW (N,512,H/32,W/32)."""
    x = jnp.transpose(x_nchw, (0, 2, 3, 1)).astype(jnp.bfloat16)  # NCHW -> NHWC, bf16
    for kind, w, b in params:
        if kind == 'conv':
            x = conv3x3_relu(x, w, b)
        else:
            x = maxpool2x2(x)
    return jnp.transpose(x, (0, 3, 1, 2)).astype(jnp.float32)     # NHWC -> NCHW


if __name__ == "__main__":
    key = jax.random.PRNGKey(0)
    params = init_vgg19_params(jax.random.fold_in(key, 123))
    # grayscale input, small spatial size divisible by 32 (5 maxpools)
    x = jax.random.normal(jax.random.fold_in(key, 7), (2, 1, 32, 32), jnp.float32)
    out = feature_extractor(x, params)
    out = jax.block_until_ready(out)
    assert out.shape == (2, 512, 1, 1), out.shape
    assert bool(jnp.all(jnp.isfinite(out)))
    print("KERNEL_OK")
</pallas_src>

<mosaic_0001>
module attributes {stable_mosaic.version = 11 : i64} {
  func.func @_conv3x3_relu_kernel(%arg0: i32, %arg1: i32, %arg2: memref<1x1190x1xbf16, #tpu.memory_space<vmem>>, %arg3: memref<9x64xbf16, #tpu.memory_space<vmem>>, %arg4: memref<1x64xf32, #tpu.memory_space<vmem>>, %arg5: memref<1x16x32x64xbf16, #tpu.memory_space<vmem>>) attributes {dimension_semantics = [#tpu.dimension_semantics<parallel>, #tpu.dimension_semantics<parallel>], iteration_bounds = array<i64: 2, 2>, scalar_prefetch = 0 : i64, scratch_operands = 0 : i64, tpu.core_type = #tpu.core_type<tc>, window_params = [{transform_indices = @transform_0, window_bounds = array<i64: 1, 1190, 1>}, {pipeline_mode = #tpu.pipeline_mode<synchronous>, transform_indices = @transform_1, window_bounds = array<i64: 9, 64>}, {pipeline_mode = #tpu.pipeline_mode<synchronous>, transform_indices = @transform_2, window_bounds = array<i64: 1, 64>}, {transform_indices = @transform_3, window_bounds = array<i64: 1, 16, 32, 64>}]} {
    %c544_i32 = arith.constant 544 : i32
    %0 = arith.muli %arg1, %c544_i32 : i32
    %1 = tpu.assume_multiple %0, 16 : i32
    %c0 = arith.constant 0 : index
    %2 = arith.index_cast %1 : i32 to index
    %c0_0 = arith.constant 0 : index
    %3 = vector.load %arg2[%c0, %2, %c0_0] : memref<1x1190x1xbf16, #tpu.memory_space<vmem>>, vector<1x614x1xbf16>
    %4 = vector.shape_cast %3 : vector<1x614x1xbf16> to vector<614x1xbf16>
    %c0_1 = arith.constant 0 : index
    %c0_2 = arith.constant 0 : index
    %5 = vector.load %arg4[%c0_1, %c0_2] : memref<1x64xf32, #tpu.memory_space<vmem>>, vector<1x64xf32>
    %6 = vector.extract_strided_slice %4 {offsets = [0, 0], sizes = [544, 1], strides = [1, 1]} : vector<614x1xbf16> to vector<544x1xbf16>
    %7 = vector.extract_strided_slice %4 {offsets = [1, 0], sizes = [544, 1], strides = [1, 1]} : vector<614x1xbf16> to vector<544x1xbf16>
    %8 = vector.extract_strided_slice %4 {offsets = [2, 0], sizes = [544, 1], strides = [1, 1]} : vector<614x1xbf16> to vector<544x1xbf16>
    %9 = vector.extract_strided_slice %4 {offsets = [34, 0], sizes = [544, 1], strides = [1, 1]} : vector<614x1xbf16> to vector<544x1xbf16>
    %10 = vector.extract_strided_slice %4 {offsets = [35, 0], sizes = [544, 1], strides = [1, 1]} : vector<614x1xbf16> to vector<544x1xbf16>
    %11 = vector.extract_strided_slice %4 {offsets = [36, 0], sizes = [544, 1], strides = [1, 1]} : vector<614x1xbf16> to vector<544x1xbf16>
    %12 = vector.extract_strided_slice %4 {offsets = [68, 0], sizes = [544, 1], strides = [1, 1]} : vector<614x1xbf16> to vector<544x1xbf16>
    %13 = vector.extract_strided_slice %4 {offsets = [69, 0], sizes = [544, 1], strides = [1, 1]} : vector<614x1xbf16> to vector<544x1xbf16>
    %14 = vector.extract_strided_slice %4 {offsets = [70, 0], sizes = [544, 1], strides = [1, 1]} : vector<614x1xbf16> to vector<544x1xbf16>
    %15 = tpu.concatenate %6, %7, %8, %9, %10, %11, %12, %13, %14 in 1 : vector<544x1xbf16>, vector<544x1xbf16>, vector<544x1xbf16>, vector<544x1xbf16>, vector<544x1xbf16>, vector<544x1xbf16>, vector<544x1xbf16>, vector<544x1xbf16>, vector<544x1xbf16> -> vector<544x9xbf16>
    %c0_3 = arith.constant 0 : index
    %c0_4 = arith.constant 0 : index
    %16 = vector.load %arg3[%c0_3, %c0_4] : memref<9x64xbf16, #tpu.memory_space<vmem>>, vector<9x64xbf16>
    %cst = arith.constant dense<0.000000e+00> : vector<544x64xf32>
    %17 = tpu.matmul %15, %16, %cst {dimension_numbers = #tpu.dot_dimension_numbers<[1], [0], [0], [1], [0, 0, 1, 1], [], []>} : vector<544x9xbf16>, vector<9x64xbf16>, vector<544x64xf32> -> vector<544x64xf32>
    %18 = vector.broadcast %5 : vector<1x64xf32> to vector<544x64xf32>
    %19 = arith.addf %17, %18 : vector<544x64xf32>
    %cst_5 = arith.constant 0.000000e+00 : f32
    %20 = vector.broadcast %cst_5 : f32 to vector<544x64xf32>
    %21 = arith.maximumf %19, %20 : vector<544x64xf32>
    %22 = vector.extract_strided_slice %21 {offsets = [0, 0], sizes = [32, 64], strides = [1, 1]} : vector<544x64xf32> to vector<32x64xf32>
    %23 = arith.truncf %22 : vector<32x64xf32> to vector<32x64xbf16>
    %c0_6 = arith.constant 0 : index
    %c0_7 = arith.constant 0 : index
    %c0_8 = arith.constant 0 : index
    %c0_9 = arith.constant 0 : index
    %24 = vector.load %arg5[%c0_6, %c0_7, %c0_8, %c0_9] : memref<1x16x32x64xbf16, #tpu.memory_space<vmem>>, vector<1x1x32x64xbf16>
    %25 = vector.shape_cast %24 : vector<1x1x32x64xbf16> to vector<32x64xbf16>
    %26 = vector.shape_cast %23 : vector<32x64xbf16> to vector<1x1x32x64xbf16>
    tpu.vector_store %arg5[%c0_6, %c0_7, %c0_8, %c0_9], %26 {strides = array<i32>} : memref<1x16x32x64xbf16, #tpu.memory_space<vmem>>, vector<1x1x32x64xbf16>,
    %27 = vector.extract_strided_slice %21 {offsets = [34, 0], sizes = [32, 64], strides = [1, 1]} : vector<544x64xf32> to vector<32x64xf32>
    %28 = arith.truncf %27 : vector<32x64xf32> to vector<32x64xbf16>
    %c0_10 = arith.constant 0 : index
    %c1 = arith.constant 1 : index
    %c0_11 = arith.constant 0 : index
    %c0_12 = arith.constant 0 : index
    %29 = vector.load %arg5[%c0_10, %c1, %c0_11, %c0_12] : memref<1x16x32x64xbf16, #tpu.memory_space<vmem>>, vector<1x1x32x64xbf16>
    %30 = vector.shape_cast %29 : vector<1x1x32x64xbf16> to vector<32x64xbf16>
    %31 = vector.shape_cast %28 : vector<32x64xbf16> to vector<1x1x32x64xbf16>
    tpu.vector_store %arg5[%c0_10, %c1, %c0_11, %c0_12], %31 {strides = array<i32>} : memref<1x16x32x64xbf16, #tpu.memory_space<vmem>>, vector<1x1x32x64xbf16>,
    %32 = vector.extract_strided_slice %21 {offsets = [68, 0], sizes = [32, 64], strides = [1, 1]} : vector<544x64xf32> to vector<32x64xf32>
    %33 = arith.truncf %32 : vector<32x64xf32> to vector<32x64xbf16>
    %c0_13 = arith.constant 0 : index
    %c2 = arith.constant 2 : index
    %c0_14 = arith.constant 0 : index
    %c0_15 = arith.constant 0 : index
    %34 = vector.load %arg5[%c0_13, %c2, %c0_14, %c0_15] : memref<1x16x32x64xbf16, #tpu.memory_space<vmem>>, vector<1x1x32x64xbf16>
    %35 = vector.shape_cast %34 : vector<1x1x32x64xbf16> to vector<32x64xbf16>
    %36 = vector.shape_cast %33 : vector<32x64xbf16> to vector<1x1x32x64xbf16>
    tpu.vector_store %arg5[%c0_13, %c2, %c0_14, %c0_15], %36 {strides = array<i32>} : memref<1x16x32x64xbf16, #tpu.memory_space<vmem>>, vector<1x1x32x64xbf16>,
    %37 = vector.extract_strided_slice %21 {offsets = [102, 0], sizes = [32, 64], strides = [1, 1]} : vector<544x64xf32> to vector<32x64xf32>
    %38 = arith.truncf %37 : vector<32x64xf32> to vector<32x64xbf16>
    %c0_16 = arith.constant 0 : index
    %c3 = arith.constant 3 : index
    %c0_17 = arith.constant 0 : index
    %c0_18 = arith.constant 0 : index
    %39 = vector.load %arg5[%c0_16, %c3, %c0_17, %c0_18] : memref<1x16x32x64xbf16, #tpu.memory_space<vmem>>, vector<1x1x32x64xbf16>
    %40 = vector.shape_cast %39 : vector<1x1x32x64xbf16> to vector<32x64xbf16>
    %41 = vector.shape_cast %38 : vector<32x64xbf16> to vector<1x1x32x64xbf16>
    tpu.vector_store %arg5[%c0_16, %c3, %c0_17, %c0_18], %41 {strides = array<i32>} : memref<1x16x32x64xbf16, #tpu.memory_space<vmem>>, vector<1x1x32x64xbf16>,
    %42 = vector.extract_strided_slice %21 {offsets = [136, 0], sizes = [32, 64], strides = [1, 1]} : vector<544x64xf32> to vector<32x64xf32>
    %43 = arith.truncf %42 : vector<32x64xf32> to vector<32x64xbf16>
    %c0_19 = arith.constant 0 : index
    %c4 = arith.constant 4 : index
    %c0_20 = arith.constant 0 : index
    %c0_21 = arith.constant 0 : index
    %44 = vector.load %arg5[%c0_19, %c4, %c0_20, %c0_21] : memref<1x16x32x64xbf16, #tpu.memory_space<vmem>>, vector<1x1x32x64xbf16>
    %45 = vector.shape_cast %44 : vector<1x1x32x64xbf16> to vector<32x64xbf16>
    %46 = vector.shape_cast %43 : vector<32x64xbf16> to vector<1x1x32x64xbf16>
    tpu.vector_store %arg5[%c0_19, %c4, %c0_20, %c0_21], %46 {strides = array<i32>} : memref<1x16x32x64xbf16, #tpu.memory_space<vmem>>, vector<1x1x32x64xbf16>,
    %47 = vector.extract_strided_slice %21 {offsets = [170, 0], sizes = [32, 64], strides = [1, 1]} : vector<544x64xf32> to vector<32x64xf32>
    %48 = arith.truncf %47 : vector<32x64xf32> to vector<32x64xbf16>
    %c0_22 = arith.constant 0 : index
    %c5 = arith.constant 5 : index
    %c0_23 = arith.constant 0 : index
    %c0_24 = arith.constant 0 : index
    %49 = vector.load %arg5[%c0_22, %c5, %c0_23, %c0_24] : memref<1x16x32x64xbf16, #tpu.memory_space<vmem>>, vector<1x1x32x64xbf16>
    %50 = vector.shape_cast %49 : vector<1x1x32x64xbf16> to vector<32x64xbf16>
    %51 = vector.shape_cast %48 : vector<32x64xbf16> to vector<1x1x32x64xbf16>
    tpu.vector_store %arg5[%c0_22, %c5, %c0_23, %c0_24], %51 {strides = array<i32>} : memref<1x16x32x64xbf16, #tpu.memory_space<vmem>>, vector<1x1x32x64xbf16>,
    %52 = vector.extract_strided_slice %21 {offsets = [204, 0], sizes = [32, 64], strides = [1, 1]} : vector<544x64xf32> to vector<32x64xf32>
    %53 = arith.truncf %52 : vector<32x64xf32> to vector<32x64xbf16>
    %c0_25 = arith.constant 0 : index
    %c6 = arith.constant 6 : index
    %c0_26 = arith.constant 0 : index
    %c0_27 = arith.constant 0 : index
    %54 = vector.load %arg5[%c0_25, %c6, %c0_26, %c0_27] : memref<1x16x32x64xbf16, #tpu.memory_space<vmem>>, vector<1x1x32x64xbf16>
    %55 = vector.shape_cast %54 : vector<1x1x32x64xbf16> to vector<32x64xbf16>
    %56 = vector.shape_cast %53 : vector<32x64xbf16> to vector<1x1x32x64xbf16>
    tpu.vector_store %arg5[%c0_25, %c6, %c0_26, %c0_27], %56 {strides = array<i32>} : memref<1x16x32x64xbf16, #tpu.memory_space<vmem>>, vector<1x1x32x64xbf16>,
    %57 = vector.extract_strided_slice %21 {offsets = [238, 0], sizes = [32, 64], strides = [1, 1]} : vector<544x64xf32> to vector<32x64xf32>
    %58 = arith.truncf %57 : vector<32x64xf32> to vector<32x64xbf16>
    %c0_28 = arith.constant 0 : index
    %c7 = arith.constant 7 : index
    %c0_29 = arith.constant 0 : index
    %c0_30 = arith.constant 0 : index
    %59 = vector.load %arg5[%c0_28, %c7, %c0_29, %c0_30] : memref<1x16x32x64xbf16, #tpu.memory_space<vmem>>, vector<1x1x32x64xbf16>
    %60 = vector.shape_cast %59 : vector<1x1x32x64xbf16> to vector<32x64xbf16>
    %61 = vector.shape_cast %58 : vector<32x64xbf16> to vector<1x1x32x64xbf16>
    tpu.vector_store %arg5[%c0_28, %c7, %c0_29, %c0_30], %61 {strides = array<i32>} : memref<1x16x32x64xbf16, #tpu.memory_space<vmem>>, vector<1x1x32x64xbf16>,
    %62 = vector.extract_strided_slice %21 {offsets = [272, 0], sizes = [32, 64], strides = [1, 1]} : vector<544x64xf32> to vector<32x64xf32>
    %63 = arith.truncf %62 : vector<32x64xf32> to vector<32x64xbf16>
    %c0_31 = arith.constant 0 : index
    %c8 = arith.constant 8 : index
    %c0_32 = arith.constant 0 : index
    %c0_33 = arith.constant 0 : index
    %64 = vector.load %arg5[%c0_31, %c8, %c0_32, %c0_33] : memref<1x16x32x64xbf16, #tpu.memory_space<vmem>>, vector<1x1x32x64xbf16>
    %65 = vector.shape_cast %64 : vector<1x1x32x64xbf16> to vector<32x64xbf16>
    %66 = vector.shape_cast %63 : vector<32x64xbf16> to vector<1x1x32x64xbf16>
    tpu.vector_store %arg5[%c0_31, %c8, %c0_32, %c0_33], %66 {strides = array<i32>} : memref<1x16x32x64xbf16, #tpu.memory_space<vmem>>, vector<1x1x32x64xbf16>,
    %67 = vector.extract_strided_slice %21 {offsets = [306, 0], sizes = [32, 64], strides = [1, 1]} : vector<544x64xf32> to vector<32x64xf32>
    %68 = arith.truncf %67 : vector<32x64xf32> to vector<32x64xbf16>
    %c0_34 = arith.constant 0 : index
    %c9 = arith.constant 9 : index
    %c0_35 = arith.constant 0 : index
    %c0_36 = arith.constant 0 : index
    %69 = vector.load %arg5[%c0_34, %c9, %c0_35, %c0_36] : memref<1x16x32x64xbf16, #tpu.memory_space<vmem>>, vector<1x1x32x64xbf16>
    %70 = vector.shape_cast %69 : vector<1x1x32x64xbf16> to vector<32x64xbf16>
    %71 = vector.shape_cast %68 : vector<32x64xbf16> to vector<1x1x32x64xbf16>
    tpu.vector_store %arg5[%c0_34, %c9, %c0_35, %c0_36], %71 {strides = array<i32>} : memref<1x16x32x64xbf16, #tpu.memory_space<vmem>>, vector<1x1x32x64xbf16>,
    %72 = vector.extract_strided_slice %21 {offsets = [340, 0], sizes = [32, 64], strides = [1, 1]} : vector<544x64xf32> to vector<32x64xf32>
    %73 = arith.truncf %72 : vector<32x64xf32> to vector<32x64xbf16>
    %c0_37 = arith.constant 0 : index
    %c10 = arith.constant 10 : index
    %c0_38 = arith.constant 0 : index
    %c0_39 = arith.constant 0 : index
    %74 = vector.load %arg5[%c0_37, %c10, %c0_38, %c0_39] : memref<1x16x32x64xbf16, #tpu.memory_space<vmem>>, vector<1x1x32x64xbf16>
    %75 = vector.shape_cast %74 : vector<1x1x32x64xbf16> to vector<32x64xbf16>
    %76 = vector.shape_cast %73 : vector<32x64xbf16> to vector<1x1x32x64xbf16>
    tpu.vector_store %arg5[%c0_37, %c10, %c0_38, %c0_39], %76 {strides = array<i32>} : memref<1x16x32x64xbf16, #tpu.memory_space<vmem>>, vector<1x1x32x64xbf16>,
    %77 = vector.extract_strided_slice %21 {offsets = [374, 0], sizes = [32, 64], strides = [1, 1]} : vector<544x64xf32> to vector<32x64xf32>
    %78 = arith.truncf %77 : vector<32x64xf32> to vector<32x64xbf16>
    %c0_40 = arith.constant 0 : index
    %c11 = arith.constant 11 : index
    %c0_41 = arith.constant 0 : index
    %c0_42 = arith.constant 0 : index
    %79 = vector.load %arg5[%c0_40, %c11, %c0_41, %c0_42] : memref<1x16x32x64xbf16, #tpu.memory_space<vmem>>, vector<1x1x32x64xbf16>
    %80 = vector.shape_cast %79 : vector<1x1x32x64xbf16> to vector<32x64xbf16>
    %81 = vector.shape_cast %78 : vector<32x64xbf16> to vector<1x1x32x64xbf16>
    tpu.vector_store %arg5[%c0_40, %c11, %c0_41, %c0_42], %81 {strides = array<i32>} : memref<1x16x32x64xbf16, #tpu.memory_space<vmem>>, vector<1x1x32x64xbf16>,
    %82 = vector.extract_strided_slice %21 {offsets = [408, 0], sizes = [32, 64], strides = [1, 1]} : vector<544x64xf32> to vector<32x64xf32>
    %83 = arith.truncf %82 : vector<32x64xf32> to vector<32x64xbf16>
    %c0_43 = arith.constant 0 : index
    %c12 = arith.constant 12 : index
    %c0_44 = arith.constant 0 : index
    %c0_45 = arith.constant 0 : index
    %84 = vector.load %arg5[%c0_43, %c12, %c0_44, %c0_45] : memref<1x16x32x64xbf16, #tpu.memory_space<vmem>>, vector<1x1x32x64xbf16>
    %85 = vector.shape_cast %84 : vector<1x1x32x64xbf16> to vector<32x64xbf16>
    %86 = vector.shape_cast %83 : vector<32x64xbf16> to vector<1x1x32x64xbf16>
    tpu.vector_store %arg5[%c0_43, %c12, %c0_44, %c0_45], %86 {strides = array<i32>} : memref<1x16x32x64xbf16, #tpu.memory_space<vmem>>, vector<1x1x32x64xbf16>,
    %87 = vector.extract_strided_slice %21 {offsets = [442, 0], sizes = [32, 64], strides = [1, 1]} : vector<544x64xf32> to vector<32x64xf32>
    %88 = arith.truncf %87 : vector<32x64xf32> to vector<32x64xbf16>
    %c0_46 = arith.constant 0 : index
    %c13 = arith.constant 13 : index
    %c0_47 = arith.constant 0 : index
    %c0_48 = arith.constant 0 : index
    %89 = vector.load %arg5[%c0_46, %c13, %c0_47, %c0_48] : memref<1x16x32x64xbf16, #tpu.memory_space<vmem>>, vector<1x1x32x64xbf16>
    %90 = vector.shape_cast %89 : vector<1x1x32x64xbf16> to vector<32x64xbf16>
    %91 = vector.shape_cast %88 : vector<32x64xbf16> to vector<1x1x32x64xbf16>
    tpu.vector_store %arg5[%c0_46, %c13, %c0_47, %c0_48], %91 {strides = array<i32>} : memref<1x16x32x64xbf16, #tpu.memory_space<vmem>>, vector<1x1x32x64xbf16>,
    %92 = vector.extract_strided_slice %21 {offsets = [476, 0], sizes = [32, 64], strides = [1, 1]} : vector<544x64xf32> to vector<32x64xf32>
    %93 = arith.truncf %92 : vector<32x64xf32> to vector<32x64xbf16>
    %c0_49 = arith.constant 0 : index
    %c14 = arith.constant 14 : index
    %c0_50 = arith.constant 0 : index
    %c0_51 = arith.constant 0 : index
    %94 = vector.load %arg5[%c0_49, %c14, %c0_50, %c0_51] : memref<1x16x32x64xbf16, #tpu.memory_space<vmem>>, vector<1x1x32x64xbf16>
    %95 = vector.shape_cast %94 : vector<1x1x32x64xbf16> to vector<32x64xbf16>
    %96 = vector.shape_cast %93 : vector<32x64xbf16> to vector<1x1x32x64xbf16>
    tpu.vector_store %arg5[%c0_49, %c14, %c0_50, %c0_51], %96 {strides = array<i32>} : memref<1x16x32x64xbf16, #tpu.memory_space<vmem>>, vector<1x1x32x64xbf16>,
    %97 = vector.extract_strided_slice %21 {offsets = [510, 0], sizes = [32, 64], strides = [1, 1]} : vector<544x64xf32> to vector<32x64xf32>
    %98 = arith.truncf %97 : vector<32x64xf32> to vector<32x64xbf16>
    %c0_52 = arith.constant 0 : index
    %c15 = arith.constant 15 : index
    %c0_53 = arith.constant 0 : index
    %c0_54 = arith.constant 0 : index
    %99 = vector.load %arg5[%c0_52, %c15, %c0_53, %c0_54] : memref<1x16x32x64xbf16, #tpu.memory_space<vmem>>, vector<1x1x32x64xbf16>
    %100 = vector.shape_cast %99 : vector<1x1x32x64xbf16> to vector<32x64xbf16>
    %101 = vector.shape_cast %98 : vector<32x64xbf16> to vector<1x1x32x64xbf16>
    tpu.vector_store %arg5[%c0_52, %c15, %c0_53, %c0_54], %101 {strides = array<i32>} : memref<1x16x32x64xbf16, #tpu.memory_space<vmem>>, vector<1x1x32x64xbf16>,
    return
  }
  func.func @transform_0(%arg0: i32, %arg1: i32) -> (i32, i32, i32) {
    %c0_i32 = arith.constant 0 : i32
    %c0_i32_0 = arith.constant 0 : i32
    %c0_i32_1 = arith.constant 0 : i32
    return %arg0, %c0_i32, %c0_i32_0 : i32, i32, i32
  }
  func.func @transform_1(%arg0: i32, %arg1: i32) -> (i32, i32) {
    %c0_i32 = arith.constant 0 : i32
    %c0_i32_0 = arith.constant 0 : i32
    %c0_i32_1 = arith.constant 0 : i32
    return %c0_i32, %c0_i32_0 : i32, i32
  }
  func.func @transform_2(%arg0: i32, %arg1: i32) -> (i32, i32) {
    %c0_i32 = arith.constant 0 : i32
    %c0_i32_0 = arith.constant 0 : i32
    %c0_i32_1 = arith.constant 0 : i32
    return %c0_i32, %c0_i32_0 : i32, i32
  }
  func.func @transform_3(%arg0: i32, %arg1: i32) -> (i32, i32, i32, i32) {
    %c0_i32 = arith.constant 0 : i32
    %c0_i32_0 = arith.constant 0 : i32
    %c0_i32_1 = arith.constant 0 : i32
    return %arg0, %arg1, %c0_i32, %c0_i32_0 : i32, i32, i32, i32
  }
}

</mosaic_0001>

<bundles_post_ra>
// kernel: tpu_custom_call.1
= control target key start
LH: loop header
LB: loop body
LE: loop exit
PB: predicated region body
PF: predicated region fallthrough
CT: control target
= control target key end

     0   :  { %8 = vsyncpa [#allocation3], 0  ;;  %s7195_s0 = inlined_call_operand.vmem [shape: bf16[2,1190,1], index: 0, kind: input, shape index: {}]   ;;  %s7196_s1 = inlined_call_operand.vmem [shape: bf16[9,64], index: 1, kind: input, shape index: {}]   ;;  %s7197_s2 = inlined_call_operand.vmem [shape: f32[1,64], index: 2, kind: input, shape index: {}]   ;;  %s7198_s3 = inlined_call_operand.hbm [shape: bf16[2,32,32,64], index: 3, kind: output, shape index: {}]  }
   0x1   :  { %10 = vsyncpa [#allocation3 + $0x1], 0  ;;  %s4207_s12 = smov 0   ;;  %s4209_s13 = smov 0  }
   0x2   :  { %s4211_s14 = smov 0   ;;  %s4213_s15 = smov 0  }
   0x3   :  { %s4215_s16 = smov 0   ;;  %s4217_s17 = smov 0  }
   0x4   :  { %s4219_s18 = smov 0   ;;  %s4221_s19 = smov 0  }
   0x5 LB: > { %s3474_s20 = sadd.s32 4294967295, %s4174_s19   ;;  %s3475_s21 = sadd.s32 4294967294, %s4174_s19   ;;  %s4174_s19 = sphi %s4221_s19, %s16_s19   ;;  %s4170_s18 = sphi %s4219_s18, %s7635_s18   ;;  %s4166_s17 = sphi %s4217_s17, %s7634_s17   ;;  %s4162_s16 = sphi %s4215_s16, %s7633_s16   ;;  %s4158_s15 = sphi %s4213_s15, %s7632_s15   ;;  %s4154_s14 = sphi %s4211_s14, %s7631_s14   ;;  %s4150_s13 = sphi %s4209_s13, %s7630_s13   ;;  %s4146_s12 = sphi %s4207_s12, %s7629_s12  }
   0x6   : > { %s25_s22 = sadd.s32 1, %s4166_s17  ;;  %s28_s23 = sadd.s32 1, %s4170_s18 }
   0x7   : > { %p26_p0 = scmp.ge.s32.totalorder %s25_s22, 2  ;;  %p115_p1 = scmp.ne.s32.totalorder %s4154_s14, %s4150_s13 }
   0x8   : > { %p116_p2 = scmp.eq.s32.totalorder %s3474_s20, 3  ;;  %p121_p5 = scmp.ne.s32.totalorder %s4150_s13, %s4146_s12 }
   0x9   : > { %s7637_s22 = smov (%p26_p0, %s25_s22), 0  ;;  %s7639_s23 = smov (!%p26_p0, %s28_s23), %s4170_s18 }
   0xa   : > { %s101_s24 = ssub.s32 %s4166_s17, %s7637_s22  ;;  %p4258_p3 = por %p116_p2, %p115_p1 }
   0xb   : > { %p30_p4 = scmp.ge.s32.totalorder %s7639_s23, 2  ;;  %p122_p6 = scmp.eq.s32.totalorder %s3475_s21, 3 }
   0xc   : > { %p3478_p7 = scmp.ge.s32.totalorder %s4174_s19, 1  ;;  %p154_p9 = scmp.lt.s32.totalorder %s4174_s19, 5 }
   0xd   : > { %s7641_s23 = smov (%p30_p4, %s7639_s23), 0  ;;  %p4267_p8 = por %p122_p6, %p121_p5 }
   0xe   : > { %s100_s27 = ssub.s32 %s4170_s18, %s7641_s23  ;;  %s105_s28 = sadd.s32 1, %s4154_s14 }
   0xf   : > { %s102_s29 = sor.u32 %s101_s24, %s100_s27  ;;  %p155_p10 = pnand %p3478_p7, %p154_p9 }
  0x10   : > { %p103_p11 = scmp.eq.s32.totalorder %s102_s29, 0 }
  0x11   : > { %158 = sbr.rel (%p155_p10) target bundleno = 937 (0x3a9), region = 32 }
  0x12   : > { %s4276_s30 = scalar_select %p103_p11, %s4154_s14, %s105_s28  }
  0x18   : > { %p178_p12 = scmp.lt.s32.totalorder %s4162_s16, 1  ;;  %s185_s4 = smul.u32 544, %s4158_s15  ;;  %vm441_vm0 = vsmask.f32 7424  ;;  %vm786_vm1 = vcmask 1046528   ;;  %vm1232_vm3 = vcmask 1045504  }
  0x19   : > { %s4176_s21 = smov 1   ;;  %s4177_s24 = smov 2   ;;  %vm1009_vm2 = vsmask.f32 6400  ;;  %vm2450_vm4 = vcmask 1043456   ;;  %vm1678_vm5 = vcmask 1044480  }
  0x1a   : > { %s179_s5 = scalar_select %p178_p12, %s4162_s16, 1  ;;  %vm1455_vm6 = vsmask.f32 5376  ;;  %vm1816_vm7 = vcmask 7168   ;;  %vm1885_vm8 = vcmask 15360   ;;  %vm1954_vm9 = vcmask 23552  }
  0x1b   : > { %s186_s6 = sshra.s32 %s185_s4, 3  ;;  %s4178_s27 = smov 3   ;;  %vm2023_vm10 = vcmask 31744   ;;  %vm2092_vm11 = vcmask 39936   ;;  %vm2161_vm12 = vcmask 48128   ;;  %vm2230_vm13 = vcmask 56320  }
  0x1c   : > { %s3898_s7 = smul.u32 596, %s179_s5  ;;  %s3481_s8 = sshll.u32 %s186_s6, 2  ;;  %vm2299_vm14 = vcmask 64512   ;;  %vm2381_vm15 = vcmask 72704  }
  0x1d   : > { %s4180_s4 = smov 4   ;;  %s4181_s5 = smov 5  }
  0x1e   : > { %s182_s11 = scalar_lea.vmem %s7195_s0, %s3898_s7  ;;  %s4182_s6 = smov 6  }
  0x1f   : > { %s4284_s20 = scalar_lea.vmem %s182_s11, %s3481_s8  ;;  %s4183_s7 = smov 7  }
  0x20   : > { %v4287_v0 = vld [vmem:[%s4284_s20 + $0x10] sm:$0xff]   ;;  %v4290_v1 = vld [vmem:[%s4284_s20 + $0x18] sm:$0xff]   ;;  %v4296_v5 = vld [vmem:[%s4284_s20] sm:$0xff]   ;;  %s4184_s8 = smov 8   ;;  %s175_s9 = sand.u32 1, %s4150_s13  }
  0x21   : > { %v7199_v2 = vshll.u32 %v4287_v0, 16  ;;  %v7200_v3 = vshrl.u32 %v4287_v0, 16  ;;  %v7201_v4 = vshll.u32 %v4290_v1, 16  ;;  %v4299_v6 = vld [vmem:[%s4284_s20 + $0x8] sm:$0xff]   ;;  %v7202_v7 = vshrl.u32 %v4290_v1, 16  ;;  %v4309_v12 = vld [vmem:[%s4284_s20 + $0x20] sm:$0xff]  }
  0x22   : > { %v443_v10 = vshrl.u32 %v4296_v5, 16  ;;  %v445_v11 = vshll.u32 %v4296_v5, 16  ;;  %v4312_v13 = vld [vmem:[%s4284_s20 + $0x28] sm:$0xff]   ;;  %v450_v14 = vshll.u32 %v4299_v6, 16  ;;  %v454_v15 = vshrl.u32 %v4299_v6, 16  ;;  %v4324_v21 = vld [vmem:[%s4284_s20 + $0x30] sm:$0xff]  }
  0x23   : > { %v460_v8 = vrot.slane %v7199_v2, 1  ;;  %v468_v9 = vrot.slane %v7201_v4, 1  ;;  %v4321_v19 = vshll.u32 %v4309_v12, 16  ;;  %v4327_v22 = vshll.u32 %v4312_v13, 16  ;;  %v4336_v25 = vld [vmem:[%s4284_s20 + $0x38] sm:$0xff]   ;;  %v4341_v29 = vld [vmem:[%s4284_s20 + $0x40] sm:$0xff]  }
  0x24   : > { %v447_v17 = vrot.slane %v445_v11, 1  ;;  %v452_v20 = vrot.slane %v450_v14, 1  ;;  %v4330_v23 = vshrl.u32 %v4312_v13, 16  ;;  %v4333_v24 = vshrl.u32 %v4309_v12, 16  ;;  %v4354_v36 = vld [vmem:[%s4284_s20 + $0x48] sm:$0xff]   ;;  %v4372_v45 = vld [vmem:[%s4284_s20 + $0x50] sm:$0xff]  }
  0x25   : > { %v464_v16 = vor.u32 %v7200_v3, %v460_v8  ;;  %v472_v18 = vor.u32 %v7202_v7, %v468_v9  ;;  %v476_v28 = vrot.slane %v4321_v19, 1  ;;  %v484_v31 = vrot.slane %v4327_v22, 1  ;;  %v4382_v48 = vld [vmem:[%s4284_s20 + $0x58] sm:$0xff]   ;;  %v4397_v56 = vld [vmem:[%s4284_s20 + $0x60] sm:$0xff]   ;;  %v4403_v58 = vld [vmem:[%s4284_s20 + $0x68] sm:$0xff]   ;;  %s3790_s28 = sshll.u32 %s4158_s15, 6 }
  0x26   : > { %v448_v27 = vor.u32 %v447_v17, %v443_v10  ;;  %v456_v30 = vor.u32 %v454_v15, %v452_v20  ;;  %v4346_v32 = vshll.u32 %v4324_v21, 16  ;;  %v4351_v35 = vshll.u32 %v4336_v25, 16  ;;  %v4410_v61 = vld [vmem:[%s4284_s20 + $0x70] sm:$0xff]   ;;  %v4502_v3 = vld [vmem:[%s4284_s20 + $0xa8] sm:$0xff]   ;;  %s3710_s29 = sshll.u32 %s4162_s16, 7  ;;  %s7142_s10 = scalar_lea.sflag [#allocation3], %s175_s9 }
  0x27   : > { %v469_v26 = vsel %vm441_vm0, %v464_v16, %v468_v9  ;;  %v477_v34 = vsel %vm441_vm0, %v472_v18, %v476_v28  ;;  %v488_v37 = vor.u32 %v4330_v23, %v484_v31  ;;  %v480_v39 = vor.u32 %v4333_v24, %v476_v28  ;;  %v4442_v28 = vld [vmem:[%s4284_s20 + $0x80] sm:$0xff]   ;;  %s3393_s15 = sadd.s32 %s3790_s28, %s3710_s29 }
  0x28   : > { %722 = vrot.lane.b32.xlu1 %v469_v26, %s4176_s21  ;;  %v453_v33 = vsel %vm441_vm0, %v448_v27, %v452_v20  ;;  %7329 = vst [vmem:[#allocation5_spill] sm:$0xff] %v4351_v35  ;;  %v492_v38 = vrot.slane %v4346_v32, 1  ;;  %v4361_v40 = vshrl.u32 %v4336_v25, 16  ;;  %v461_v41 = vsel %vm441_vm0, %v456_v30, %v460_v8  ;;  %v4437_v26 = vld [vmem:[%s4284_s20 + $0x78] sm:$0xff]   ;;  %s3711_s16 = sshll.u32 %s3393_s15, 6 }
  0x29   : > { %718 = vrot.lane.b32.xlu0 %v453_v33, %s4176_s21  ;;  %v500_v42 = vrot.slane %v4351_v35, 1  ;;  %v4366_v43 = vshll.u32 %v4341_v29, 16  ;;  %v4369_v44 = vshrl.u32 %v4324_v21, 16  ;;  %v4376_v46 = vshll.u32 %v4354_v36, 16  ;;  %v4618_v35 = vld [vmem:[%s4284_s20 + $0xf0] sm:$0xff]  }
  0x2a   : > { %7330 = vst [vmem:[#allocation6_spill] sm:$0xff] %v4361_v40  ;;  %v4379_v47 = vshrl.u32 %v4354_v36, 16  ;;  %v493_v49 = vsel %vm441_vm0, %v488_v37, %v492_v38  ;;  %v4388_v52 = vshll.u32 %v4372_v45, 16  ;;  %v4394_v55 = vshrl.u32 %v4341_v29, 16 }
  0x2b   : > { %7331 = vst [vmem:[#allocation7_spill] sm:$0xff] %v4366_v43  ;;  %7332 = vst [vmem:[#allocation8_spill] sm:$0xff] %v4376_v46  ;;  %v504_v50 = vor.u32 %v4361_v40, %v500_v42  ;;  %v508_v51 = vrot.slane %v4366_v43, 1  ;;  %v496_v53 = vor.u32 %v4369_v44, %v492_v38  ;;  %v516_v54 = vrot.slane %v4376_v46, 1  ;;  %v4603_v46 = vld [vmem:[%s4284_s20 + $0xe0] sm:$0xff]  }
  0x2c   : > { %724 = vrot.lane.b32.xlu1 %v477_v34, %s4176_s21  ;;  %7333 = vst [vmem:[#allocation9_spill] sm:$0xff] %v4379_v47  ;;  %7334 = vst [vmem:[#allocation10_spill] sm:$0xff] %v4388_v52  ;;  %v4400_v57 = vshll.u32 %v4382_v48, 16  ;;  %v485_v59 = vsel %vm441_vm0, %v480_v39, %v484_v31  ;;  %v4407_v60 = vshrl.u32 %v4382_v48, 16  ;;  %v524_v62 = vrot.slane %v4388_v52, 1  ;;  %v4450_v34 = vld [vmem:[%s4284_s20 + $0x88] sm:$0xff]  }
  0x2d   : > { %720 = vrot.lane.b32.xlu0 %v461_v41, %s4176_s21  ;;  %7335 = vst [vmem:[#allocation11_spill] sm:$0xff] %v4394_v55  ;;  %v4415_v63 = vshll.u32 %v4397_v56, 16  ;;  %v509_v8 = vsel %vm441_vm0, %v504_v50, %v508_v51  ;;  %v520_v9 = vor.u32 %v4379_v47, %v516_v54  ;;  %v4421_v11 = vshll.u32 %v4403_v58, 16  ;;  %v4459_v41 = vld [vmem:[%s4284_s20 + $0x90] sm:$0xff]  }
  0x2e   : > { %7336 = vst [vmem:[#allocation12_spill] sm:$0xff] %v4400_v57  ;;  %7337 = vst [vmem:[#allocation13_spill] sm:$0xff] %v4407_v60  ;;  %v532_v10 = vrot.slane %v4400_v57, 1  ;;  %v501_v14 = vsel %vm441_vm0, %v496_v53, %v500_v42  ;;  %v4426_v15 = vshrl.u32 %v4372_v45, 16  ;;  %v512_v16 = vor.u32 %v4394_v55, %v508_v51  ;;  %v4470_v51 = vld [vmem:[%s4284_s20 + $0x98] sm:$0xff]  }
  0x2f   : > { %7338 = vst [vmem:[#allocation14_spill] sm:$0xff] %v4415_v63  ;;  %7339 = vst [vmem:[#allocation15_spill] sm:$0xff] %v4421_v11  ;;  %v540_v17 = vrot.slane %v4415_v63, 1  ;;  %v4431_v18 = vshrl.u32 %v4403_v58, 16  ;;  %v4434_v20 = vshll.u32 %v4410_v61, 16  ;;  %v548_v27 = vrot.slane %v4421_v11, 1 }
  0x30   : > { %728 = vrot.lane.b32.xlu1 %v493_v49, %s4176_s21  ;;  %7340 = vst [vmem:[#allocation16_spill] sm:$0xff] %v4426_v15  ;;  %v525_v30 = vsel %vm441_vm0, %v520_v9, %v524_v62  ;;  %v536_v31 = vor.u32 %v4407_v60, %v532_v10  ;;  %v4447_v33 = vshll.u32 %v4437_v26, 16  ;;  %v528_v37 = vor.u32 %v4426_v15, %v524_v62 }
  0x31   : > { %726 = vrot.lane.b32.xlu0 %v485_v59, %s4176_s21  ;;  %7341 = vst [vmem:[#allocation17_spill] sm:$0xff] %v4431_v18  ;;  %7342 = vst [vmem:[#allocation18_spill] sm:$0xff] %v4434_v20  ;;  %v517_v38 = vsel %vm441_vm0, %v512_v16, %v516_v54  ;;  %v4456_v39 = vshrl.u32 %v4397_v56, 16  ;;  %v556_v42 = vrot.slane %v4434_v20, 1  ;;  %v4464_v49 = vshrl.u32 %v4437_v26, 16 }
  0x32   : > { %7343 = vst [vmem:[#allocation19_spill] sm:$0xff] %v4447_v33  ;;  %v4467_v50 = vshll.u32 %v4442_v28, 16  ;;  %v541_v53 = vsel %vm441_vm0, %v536_v31, %v540_v17  ;;  %v552_v54 = vor.u32 %v4431_v18, %v548_v27  ;;  %v564_v59 = vrot.slane %v4447_v33, 1  ;;  %v4491_v31 = vld [vmem:[%s4284_s20 + $0xa0] sm:$0xff]   ;;  %v4525_v33 = vld [vmem:[%s4284_s20 + $0xb0] sm:$0xff]  }
  0x33   : > { %7344 = vst [vmem:[#allocation20_spill] sm:$0xff] %v4456_v39  ;;  %7345 = vst [vmem:[#allocation21_spill] sm:$0xff] %v4464_v49  ;;  %v4476_v62 = vshll.u32 %v4450_v34, 16  ;;  %v544_v9 = vor.u32 %v4456_v39, %v540_v17  ;;  %v4485_v16 = vshrl.u32 %v4450_v34, 16  ;;  %v4508_v7 = vshrl.u32 %v4442_v28, 16 }
  0x34   : > { %732 = vrot.lane.b32.xlu1 %v509_v8, %s4176_s21  ;;  %7346 = vst [vmem:[#allocation22_spill] sm:$0xff] %v4467_v50  ;;  %v533_v8 = vsel %vm441_vm0, %v528_v37, %v532_v10  ;;  %7351 = vst [vmem:[#allocation27_spill] sm:$0xff] %v4491_v31  ;;  %v4496_v10 = vshll.u32 %v4470_v51, 16  ;;  %v557_v17 = vsel %vm441_vm0, %v552_v54, %v556_v42  ;;  %v4587_v52 = vshrl.u32 %v4525_v33, 16 }
  0x35   : > { %730 = vrot.lane.b32.xlu0 %v501_v14, %s4176_s21  ;;  %7347 = vst [vmem:[#allocation23_spill] sm:$0xff] %v4476_v62  ;;  %v4482_v14 = vshrl.u32 %v4410_v61, 16  ;;  %7349 = vst [vmem:[#allocation25_spill] sm:$0xff] %v4485_v16  ;;  %v568_v37 = vor.u32 %v4464_v49, %v564_v59  ;;  %v580_v2 = vrot.slane %v4476_v62, 1  ;;  %v549_v4 = vsel %vm441_vm0, %v544_v9, %v548_v27  ;;  %v4520_v27 = vld [vmem:[%s4284_s20 + $0xb8] sm:$0xff]  }
  0x36   : > { %7352 = vst [vmem:[#allocation28_spill] sm:$0xff] %v4496_v10  ;;  %7353 = vst [vmem:[#allocation29_spill] sm:$0xff] %v4508_v7  ;;  %v596_v62 = vrot.slane %v4496_v10, 1  ;;  %v4528_v49 = vshll.u32 %v4502_v3, 16  ;;  %v4571_v39 = vshrl.u32 %v4520_v27, 16 }
  0x37   : > { %7348 = vst [vmem:[#allocation24_spill] sm:$0xff] %v4482_v14  ;;  %v584_v9 = vor.u32 %v4485_v16, %v580_v2  ;;  %7356 = vst [vmem:[#allocation32_spill] sm:$0xff] %v4525_v33  ;;  %v4541_v16 = vld [vmem:[%s4284_s20 + $0xc0] sm:$0xff]  }
  0x38   : > { %736 = vrot.lane.b32.xlu1 %v525_v30, %s4176_s21  ;;  %v4488_v30 = vshll.u32 %v4459_v41, 16  ;;  %7357 = vst [vmem:[#allocation33_spill] sm:$0xff] %v4528_v49  ;;  %v4563_v63 = vshll.u32 %v4541_v16, 16  ;;  %7364 = vst [vmem:[#allocation40_spill] sm:$0xff] %v4571_v39  ;;  %v4612_v55 = vshrl.u32 %v4541_v16, 16 }
  0x39   : > { %734 = vrot.lane.b32.xlu0 %v517_v38, %s4176_s21  ;;  %v572_v38 = vrot.slane %v4467_v50, 1  ;;  %v4511_v50 = vshll.u32 %v4491_v31, 16  ;;  %7366 = vst [vmem:[#allocation42_spill] sm:$0xff] %v4587_v52 }
  0x3a   : > { %7350 = vst [vmem:[#allocation26_spill] sm:$0xff] %v4488_v30  ;;  %v588_v54 = vrot.slane %v4488_v30, 1  ;;  %7363 = vst [vmem:[#allocation39_spill] sm:$0xff] %v4563_v63  ;;  %v636_v60 = vrot.slane %v4563_v63, 1 }
  0x3b   : > { %7354 = vst [vmem:[#allocation30_spill] sm:$0xff] %v4511_v50  ;;  %v576_v30 = vor.u32 %v4508_v7, %v572_v38  ;;  %v604_v20 = vrot.slane %v4511_v50, 1  ;;  %7370 = vst [vmem:[#allocation46_spill] sm:$0xff] %v4612_v55 }
  0x3c   : > { %740 = vrot.lane.b32.xlu1 %v541_v53, %s4176_s21  ;;  %v560_v53 = vor.u32 %v4482_v14, %v556_v42  ;;  %v573_v42 = vsel %vm441_vm0, %v568_v37, %v572_v38  ;;  %v4538_v37 = vshrl.u32 %v4502_v3, 16  ;;  %v4545_v14 = vshll.u32 %v4520_v27, 16 }
  0x3d   : > { %738 = vrot.lane.b32.xlu0 %v533_v8, %s4176_s21  ;;  %v4517_v8 = vshrl.u32 %v4470_v51, 16  ;;  %v589_v11 = vsel %vm441_vm0, %v584_v9, %v588_v54  ;;  %v612_v38 = vrot.slane %v4528_v49, 1  ;;  %v581_v18 = vsel %vm441_vm0, %v576_v30, %v580_v2  ;;  %v4566_v9 = vld [vmem:[%s4284_s20 + $0xd0] sm:$0xff]  }
  0x3e   : > { %v565_v10 = vsel %vm441_vm0, %v560_v53, %v564_v59  ;;  %7359 = vst [vmem:[#allocation35_spill] sm:$0xff] %v4538_v37  ;;  %7360 = vst [vmem:[#allocation36_spill] sm:$0xff] %v4545_v14  ;;  %v4554_v53 = vshll.u32 %v4525_v33, 16  ;;  %v4593_v15 = vshll.u32 %v4566_v9, 16 }
  0x3f   : > { %7355 = vst [vmem:[#allocation31_spill] sm:$0xff] %v4517_v8  ;;  %v600_v59 = vor.u32 %v4517_v8, %v596_v62  ;;  %v628_v8 = vrot.slane %v4545_v14, 1  ;;  %v616_v2 = vor.u32 %v4538_v37, %v612_v38  ;;  %v4646_v14 = vshll.u32 %v4618_v35, 16 }
  0x40   : > { %744 = vrot.lane.b32.xlu1 %v557_v17, %s4176_s21  ;;  %v4532_v17 = vshrl.u32 %v4459_v41, 16  ;;  %7361 = vst [vmem:[#allocation37_spill] sm:$0xff] %v4554_v53  ;;  %v620_v30 = vrot.slane %v4554_v53, 1  ;;  %7368 = vst [vmem:[#allocation44_spill] sm:$0xff] %v4593_v15 }
  0x41   : > { %742 = vrot.lane.b32.xlu0 %v549_v4, %s4176_s21  ;;  %v4548_v4 = vld [vmem:[%s4284_s20 + $0xc8] sm:$0xff]   ;;  %7376 = vst [vmem:[#allocation52_spill] sm:$0xff] %v4646_v14 }
  0x42   : > { %7358 = vst [vmem:[#allocation34_spill] sm:$0xff] %v4532_v17  ;;  %v592_v7 = vor.u32 %v4532_v17, %v588_v54  ;;  %v605_v54 = vsel %vm441_vm0, %v600_v59, %v604_v20  ;;  %v4580_v17 = vld [vmem:[%s4284_s20 + $0xd8] sm:$0xff]   ;;  %v4590_v59 = vshrl.u32 %v4548_v4, 16 }
  0x43   : > { %v4606_v47 = vshll.u32 %v4580_v17, 16 }
  0x44   : > { %748 = vrot.lane.b32.xlu1 %v573_v42, %s4176_s21  ;;  %v4559_v42 = vshrl.u32 %v4491_v31, 16  ;;  %7367 = vst [vmem:[#allocation43_spill] sm:$0xff] %v4590_v59 }
  0x45   : > { %746 = vrot.lane.b32.xlu0 %v565_v10, %s4176_s21  ;;  %v4574_v10 = vshll.u32 %v4548_v4, 16  ;;  %7369 = vst [vmem:[#allocation45_spill] sm:$0xff] %v4606_v47 }
  0x46   : > { %7362 = vst [vmem:[#allocation38_spill] sm:$0xff] %v4559_v42  ;;  %v608_v57 = vor.u32 %v4559_v42, %v604_v20  ;;  %v621_v20 = vsel %vm441_vm0, %v616_v2, %v620_v30  ;;  %v652_v2 = vrot.slane %v4593_v15, 1  ;;  %v640_v15 = vor.u32 %v4612_v55, %v636_v60 }
  0x47   : > { %7365 = vst [vmem:[#allocation41_spill] sm:$0xff] %v4574_v10  ;;  %v4665_v42 = vshrl.u32 %v4603_v46, 16 }
  0x48   : > { %752 = vrot.lane.b32.xlu1 %v589_v11, %s4176_s21  ;;  %v597_v11 = vsel %vm441_vm0, %v592_v7, %v596_v62  ;;  %v644_v7 = vrot.slane %v4574_v10, 1  ;;  %v4599_v62 = vld [vmem:[%s4284_s20 + $0xe8] sm:$0xff]   ;;  %v613_v43 = vsel %vm441_vm0, %v608_v57, %v612_v38  ;;  %v660_v57 = vrot.slane %v4606_v47, 1 }
  0x49   : > { %750 = vrot.lane.b32.xlu0 %v581_v18, %s4176_s21  ;;  %v632_v18 = vor.u32 %v4571_v39, %v628_v8  ;;  %v4621_v40 = vshll.u32 %v4599_v62, 16  ;;  %v4626_v38 = vshrl.u32 %v4580_v17, 16  ;;  %v4643_v63 = vshrl.u32 %v4599_v62, 16  ;;  %v4649_v39 = vld [vmem:[%s4284_s20 + $0x100] sm:$0xff]  }
  0x4a   : > { %v645_v55 = vsel %vm441_vm0, %v640_v15, %v644_v7  ;;  %v4674_v53 = vshll.u32 %v4649_v39, 16 }
  0x4b   : > { %v637_v10 = vsel %vm441_vm0, %v632_v18, %v636_v60  ;;  %7371 = vst [vmem:[#allocation47_spill] sm:$0xff] %v4621_v40  ;;  %7372 = vst [vmem:[#allocation48_spill] sm:$0xff] %v4626_v38  ;;  %v4632_v18 = vld [vmem:[%s4284_s20 + $0xf8] sm:$0xff]   ;;  %v676_v47 = vrot.slane %v4621_v40, 1  ;;  %v258_v40 = vld [vmem:[%s4284_s20 + $0x110] sm:$0xf] }
  0x4c   : > { %756 = vrot.lane.b32.xlu1 %v605_v54, %s4176_s21  ;;  %v624_v54 = vor.u32 %v4587_v52, %v620_v30  ;;  %v4629_v30 = vshll.u32 %v4603_v46, 16  ;;  %7375 = vst [vmem:[#allocation51_spill] sm:$0xff] %v4643_v63  ;;  %7379 = vst [vmem:[#allocation55_spill] sm:$0xff] %v4674_v53 }
  0x4d   : > { %754 = vrot.lane.b32.xlu0 %v597_v11, %s4176_s21  ;;  %v648_v11 = vor.u32 %v4590_v59, %v644_v7  ;;  %v4638_v59 = vshrl.u32 %v4566_v9, 16  ;;  %v4678_v7 = vcombine.low %v258_v40, %v258_v40 }
  0x4e   : > { %7373 = vst [vmem:[#allocation49_spill] sm:$0xff] %v4629_v30  ;;  %v668_v60 = vrot.slane %v4629_v30, 1  ;;  %v684_v30 = vrot.slane %v4646_v14, 1 }
  0x4f   : > { %7374 = vst [vmem:[#allocation50_spill] sm:$0xff] %v4638_v59  ;;  %v656_v50 = vor.u32 %v4638_v59, %v652_v2 }
  0x50   : > { %760 = vrot.lane.b32.xlu1 %v621_v20, %s4176_s21  ;;  %v629_v20 = vsel %vm441_vm0, %v624_v54, %v628_v8  ;;  %v664_v8 = vor.u32 %v4626_v38, %v660_v57  ;;  %v4655_v54 = vshll.u32 %v4632_v18, 16  ;;  %v4671_v38 = vshrl.u32 %v4632_v18, 16 }
  0x51   : > { %758 = vrot.lane.b32.xlu0 %v613_v43, %s4176_s21  ;;  %v653_v43 = vsel %vm441_vm0, %v648_v11, %v652_v2  ;;  %v680_v11 = vor.u32 %v4643_v63, %v676_v47  ;;  %v672_v14 = vor.u32 %v4665_v42, %v668_v60  ;;  %v4687_v63 = vshrl.u32 %v4618_v35, 16 }
  0x52   : > { %7377 = vst [vmem:[#allocation53_spill] sm:$0xff] %v4655_v54  ;;  %7378 = vst [vmem:[#allocation54_spill] sm:$0xff] %v4671_v38  ;;  %v692_v15 = vrot.slane %v4655_v54, 1  ;;  %v700_v54 = vrot.slane %v4674_v53, 1 }
  0x54   : > { %764 = vrot.lane.b32.xlu1 %v637_v10, %s4176_s21  ;;  %v4658_v10 = vld [vmem:[%s4284_s20 + $0x108] sm:$0xff]   ;;  %v696_v40 = vor.u32 %v4671_v38, %v692_v15 }
  0x55   : > { %762 = vrot.lane.b32.xlu0 %v629_v20, %s4176_s21  ;;  %v669_v20 = vsel %vm441_vm0, %v664_v8, %v668_v60  ;;  %v4681_v2 = vshll.u32 %v4658_v10, 16  ;;  %v685_v8 = vsel %vm441_vm0, %v680_v11, %v684_v30  ;;  %v4695_v52 = vshrl.u32 %v4658_v10, 16 }
  0x56   : > { %v4702_v60 = vshrl.u32 %v4649_v39, 16  ;;  %v701_v11 = vsel %vm441_vm0, %v696_v40, %v700_v54  ;;  %v787_v40 = vrot.slane %v4296_v5, 1  ;;  %v796_v5 = vrot.slane %v4312_v13, 1 }
  0x57   : > { %7380 = vst [vmem:[#allocation56_spill] sm:$0xff] %v4681_v2  ;;  %v708_v59 = vrot.slane %v4681_v2, 1  ;;  %7381 = vst [vmem:[#allocation57_spill] sm:$0xff] %v4695_v52 }
  0x58   : > { %768 = vrot.lane.b32.xlu1 %v653_v43, %s4176_s21  ;;  %v661_v43 = vsel %vm441_vm0, %v656_v50, %v660_v57  ;;  %v677_v50 = vsel %vm441_vm0, %v672_v14, %v676_v47  ;;  %v688_v57 = vor.u32 %v4687_v63, %v684_v30  ;;  %7382 = vst [vmem:[#allocation58_spill] sm:$0xff] %v4702_v60  ;;  %v788_v14 = vrot.slane %v4299_v6, 1 }
  0x59   : > { %766 = vrot.lane.b32.xlu0 %v645_v55, %s4176_s21  ;;  %v714_v55 = vshll.u32 %v4678_v7, 16  ;;  %v790_v30 = vrot.slane %v4287_v0, 1 }
  0x5a   : > { %v693_v53 = vsel %vm441_vm0, %v688_v57, %v692_v15  ;;  %v789_v6 = vsel %vm786_vm1, %v787_v40, %v788_v14  ;;  %v800_v57 = vrot.slane %v4336_v25, 1  ;;  %v812_v40 = vrot.slane %v4403_v58, 1 }
  0x5b   : > { %v716_v2 = vrot.slane %v714_v55, 1  ;;  %v791_v15 = vsel %vm786_vm1, %v788_v14, %v790_v30  ;;  %v794_v55 = vrot.slane %v4309_v12, 1  ;;  %v806_v14 = vrot.slane %v4372_v45, 1 }
  0x5c   : > { %772 = vrot.lane.b32.xlu1 %v669_v20, %s4176_s21  ;;  %v712_v20 = vor.u32 %v4695_v52, %v708_v59 }
  0x5d   : > { %770 = vrot.lane.b32.xlu0 %v661_v43, %s4176_s21  ;;  %v704_v43 = vor.u32 %v4702_v60, %v700_v54  ;;  %v792_v54 = vrot.slane %v4290_v1, 1 }
  0x5e   : > { %v717_v47 = vsel %vm441_vm0, %v712_v20, %v716_v2  ;;  %v4743_v20 = vsel %vm786_vm1, %v794_v55, %v796_v5 }
  0x5f   : > { %v4731_v2 = vsel %vm786_vm1, %v790_v30, %v792_v54  ;;  %v808_v30 = vrot.slane %v4382_v48, 1 }
  0x60   : > { %776 = vrot.lane.b32.xlu1 %v685_v8, %s4176_s21  ;;  %v709_v8 = vsel %vm441_vm0, %v704_v43, %v708_v59  ;;  %v798_v59 = vrot.slane %v4324_v21, 1  ;;  %vm2846_vm0 = vcmask 519168  }
  0x61   : > { %774 = vrot.lane.b32.xlu0 %v677_v50, %s4176_s21  ;;  %v4779_v48 = vsel %vm786_vm1, %v806_v14, %v808_v30 }
  0x62   : > { %v4736_v50 = vsel %vm786_vm1, %v796_v5, %v798_v59  ;;  %v4755_v25 = vsel %vm786_vm1, %v798_v59, %v800_v57  ;;  %v822_v5 = vrot.slane %v4459_v41, 1  ;;  %v824_v59 = vrot.slane %v4470_v51, 1 }
  0x64   : > { %780 = vrot.lane.b32.xlu1 %v701_v11, %s4176_s21  ;;  %v802_v11 = vrot.slane %v4341_v29, 1  ;;  %v4827_v51 = vsel %vm786_vm1, %v822_v5, %v824_v59 }
  0x65   : > { %778 = vrot.lane.b32.xlu0 %v693_v53, %s4176_s21  ;;  %v4725_v53 = vsel %vm786_vm1, %v792_v54, %v794_v55  ;;  %v816_v54 = vrot.slane %v4437_v26, 1  ;;  %v818_v55 = vrot.slane %v4442_v28, 1 }
  0x66   : > { %v4748_v43 = vsel %vm786_vm1, %v800_v57, %v802_v11  ;;  %v826_v57 = vrot.slane %v4491_v31, 1 }
  0x68   : > { %784 = vrot.lane.b32.xlu1 %v717_v47, %s4176_s21  ;;  %v804_v47 = vrot.slane %v4354_v36, 1  ;;  %v4820_v41 = vsel %vm786_vm1, %v824_v59, %v826_v57  ;;  %v840_v59 = vrot.slane %v4580_v17, 1  ;;  %v844_v17 = vrot.slane %v4599_v62, 1 }
  0x69   : > { %782 = vrot.lane.b32.xlu0 %v709_v8, %s4176_s21  ;;  %v810_v8 = vrot.slane %v4397_v56, 1  ;;  %v848_v62 = vrot.slane %v4632_v18, 1  ;;  %v4907_v18 = vrot.slane %v4658_v10, 1  ;;  %s3479_s21 = sshll.u32 %s175_s9, 8 }
  0x6a   : > { %v4760_v29 = vsel %vm786_vm1, %v804_v47, %v806_v14  ;;  %v4767_v36 = vsel %vm786_vm1, %v802_v11, %v804_v47  ;;  %v828_v11 = vrot.slane %v4502_v3, 1  ;;  %v830_v47 = vrot.slane %v4525_v33, 1 }
  0x6b   : > { %v4772_v45 = vsel %vm786_vm1, %v808_v30, %v810_v8  ;;  %v4791_v58 = vsel %vm786_vm1, %v810_v8, %v812_v40  ;;  %v832_v30 = vrot.slane %v4520_v27, 1  ;;  %v834_v8 = vrot.slane %v4541_v16, 1  ;;  %7388 = vst [vmem:[#allocation64_spill] sm:$0xff] %v4907_v18 }
  0x6c   : > { %858 = vrot.lane.b32.xlu1 %v791_v15, %s4177_s24  ;;  %v814_v15 = vrot.slane %v4410_v61, 1  ;;  %v4796_v61 = vsel %vm786_vm1, %v816_v54, %v818_v55  ;;  %v4832_v14 = vsel %vm786_vm1, %v828_v11, %v830_v47 }
  0x6d   : > { %856 = vrot.lane.b32.xlu0 %v789_v6, %s4177_s24  ;;  %v820_v6 = vrot.slane %v4450_v34, 1 }
  0x6e   : > { %v4784_v56 = vsel %vm786_vm1, %v812_v40, %v814_v15  ;;  %v4803_v26 = vsel %vm786_vm1, %v814_v15, %v816_v54  ;;  %v4839_v40 = vsel %vm786_vm1, %v826_v57, %v828_v11  ;;  %v4844_v15 = vsel %vm786_vm1, %v832_v30, %v834_v8 }
  0x6f   : > { %v4808_v28 = vsel %vm786_vm1, %v820_v6, %v822_v5  ;;  %v4815_v34 = vsel %vm786_vm1, %v818_v55, %v820_v6  ;;  %v836_v54 = vrot.slane %v4548_v4, 1  ;;  %v838_v55 = vrot.slane %v4566_v9, 1 }
  0x70   : > { %862 = vrot.lane.b32.xlu1 %v4725_v53, %s4177_s24  ;;  %v4851_v6 = vsel %vm786_vm1, %v830_v47, %v832_v30  ;;  %v842_v57 = vrot.slane %v4603_v46, 1  ;;  %v846_v46 = vrot.slane %v4618_v35, 1  ;;  %v850_v35 = vrot.slane %v4649_v39, 1 }
  0x71   : > { %860 = vrot.lane.b32.xlu0 %v4731_v2, %s4177_s24  ;;  %v4856_v5 = vsel %vm786_vm1, %v836_v54, %v838_v55  ;;  %v4865_v52 = vsel %vm786_vm1, %v834_v8, %v836_v54  ;;  %v4881_v8 = vsel %vm786_vm1, %v838_v55, %v840_v59  ;;  %v854_v39 = vrot.slane %v4678_v7, 1 }
  0x72   : > { %v4872_v30 = vsel %vm786_vm1, %v840_v59, %v842_v57  ;;  %v4888_v38 = vsel %vm786_vm1, %v844_v17, %v846_v46  ;;  %v4897_v55 = vsel %vm786_vm1, %v842_v57, %v844_v17  ;;  %v4915_v57 = vsel %vm786_vm1, %v846_v46, %v848_v62 }
  0x73   : > { %7390 = vst [vmem:[#allocation66_spill] sm:$0xff] %v4915_v57  ;;  %v4929_v7 = vsel %vm786_vm1, %v850_v35, %v4907_v18 }
  0x74   : > { %866 = vrot.lane.b32.xlu1 %v4736_v50, %s4177_s24  ;;  %7393 = vst [vmem:[#allocation69_spill] sm:$0xff] %v4929_v7 }
  0x75   : > { %864 = vrot.lane.b32.xlu0 %v4743_v20, %s4177_s24 }
  0x78   : > { %870 = vrot.lane.b32.xlu1 %v4748_v43, %s4177_s24 }
  0x79   : > { %868 = vrot.lane.b32.xlu0 %v4755_v25, %s4177_s24 }
  0x7c   : > { %874 = vrot.lane.b32.xlu1 %v4760_v29, %s4177_s24 }
  0x7d   : > { %872 = vrot.lane.b32.xlu0 %v4767_v36, %s4177_s24 }
  0x80   : > { %878 = vrot.lane.b32.xlu1 %v4772_v45, %s4177_s24 }
  0x81   : > { %876 = vrot.lane.b32.xlu0 %v4779_v48, %s4177_s24 }
  0x84   : > { %882 = vrot.lane.b32.xlu1 %v4784_v56, %s4177_s24 }
  0x85   : > { %880 = vrot.lane.b32.xlu0 %v4791_v58, %s4177_s24 }
  0x88   : > { %886 = vrot.lane.b32.xlu1 %v4796_v61, %s4177_s24 }
  0x89   : > { %884 = vrot.lane.b32.xlu0 %v4803_v26, %s4177_s24 }
  0x8c   : > { %890 = vrot.lane.b32.xlu1 %v4808_v28, %s4177_s24 }
  0x8d   : > { %888 = vrot.lane.b32.xlu0 %v4815_v34, %s4177_s24 }
  0x90   : > { %894 = vrot.lane.b32.xlu1 %v4820_v41, %s4177_s24 }
  0x91   : > { %892 = vrot.lane.b32.xlu0 %v4827_v51, %s4177_s24 }
  0x94   : > { %898 = vrot.lane.b32.xlu1 %v4832_v14, %s4177_s24 }
  0x95   : > { %896 = vrot.lane.b32.xlu0 %v4839_v40, %s4177_s24 }
  0x98   : > { %902 = vrot.lane.b32.xlu1 %v4844_v15, %s4177_s24 }
  0x99   : > { %900 = vrot.lane.b32.xlu0 %v4851_v6, %s4177_s24 }
  0x9a   : > { %v4862_v11 = vpop.permute.xlu1 %722 }
  0x9b   : > { %7383 = vst [vmem:[#allocation59_spill] sm:$0xff] %v4862_v11  ;;  %v4867_v47 = vpop.permute.xlu0 %718 }
  0x9c   : > { %906 = vrot.lane.b32.xlu1 %v4856_v5, %s4177_s24 }
  0x9d   : > { %904 = vrot.lane.b32.xlu0 %v4865_v52, %s4177_s24 }
  0x9e   : > { %v4878_v60 = vpop.permute.xlu1 %724 }
  0x9f   : > { %7384 = vst [vmem:[#allocation60_spill] sm:$0xff] %v4878_v60  ;;  %v4883_v54 = vpop.permute.xlu0 %720  ;;  %v4904_v60 = vsel %vm786_vm1, %v848_v62, %v850_v35 }
  0xa0   : > { %910 = vrot.lane.b32.xlu1 %v4872_v30, %s4177_s24  ;;  %7387 = vst [vmem:[#allocation63_spill] sm:$0xff] %v4904_v60 }
  0xa1   : > { %908 = vrot.lane.b32.xlu0 %v4881_v8, %s4177_s24 }
  0xa2   : > { %v4894_v11 = vpop.permute.xlu1 %728 }
  0xa3   : > { %7385 = vst [vmem:[#allocation61_spill] sm:$0xff] %v4894_v11  ;;  %v4899_v59 = vpop.permute.xlu0 %726 }
  0xa4   : > { %7386 = vst [vmem:[#allocation62_spill] sm:$0xff] %v4899_v59  ;;  %914 = vrot.lane.b32.xlu1 %v4888_v38, %s4177_s24  ;;  %v855_v59 = vsel %vm786_vm1, %v4907_v18, %v854_v39 }
  0xa5   : > { %912 = vrot.lane.b32.xlu0 %v4897_v55, %s4177_s24 }
  0xa6   : > { %v4912_v11 = vpop.permute.xlu1 %732 }
  0xa7   : > { %7389 = vst [vmem:[#allocation65_spill] sm:$0xff] %v4912_v11  ;;  %v4917_v17 = vpop.permute.xlu0 %730 }
  0xa8   : > { %7391 = vst [vmem:[#allocation67_spill] sm:$0xff] %v4917_v17  ;;  %918 = vrot.lane.b32.xlu1 %v4904_v60, %s4177_s24 }
  0xa9   : > { %916 = vrot.lane.b32.xlu0 %v4915_v57, %s4177_s24 }
  0xaa   : > { %v4925_v10 = vpop.permute.xlu1 %736 }
  0xab   : > { %7392 = vst [vmem:[#allocation68_spill] sm:$0xff] %v4925_v10  ;;  %v4931_v11 = vpop.permute.xlu0 %734 }
  0xac   : > { %7394 = vst [vmem:[#allocation70_spill] sm:$0xff] %v4931_v11  ;;  %922 = vrot.lane.b32.xlu1 %v855_v59, %s4177_s24 }
  0xad   : > { %920 = vrot.lane.b32.xlu0 %v4929_v7, %s4177_s24  ;;  %s6599_s24 = scalar_lea.vmem [#allocation2], %s3479_s21  ;;  %s4185_s21 = smov [#allocation2]  }
  0xae   : > { %v4936_v46 = vpop.permute.xlu1 %740 }
  0xaf   : > { %7395 = vst [vmem:[#allocation71_spill] sm:$0xff] %v4936_v46  ;;  %v4938_v62 = vpop.permute.xlu0 %738 }
  0xb0   : > { %7396 = vst [vmem:[#allocation72_spill] sm:$0xff] %v4938_v62  ;;  %943 = vrot.lane.b32.xlu1 %v4725_v53, %s4178_s27  ;;  %v1457_v62 = vrot.slane %v4321_v19, 3 }
  0xb1   : > { %941 = vrot.lane.b32.xlu0 %v4731_v2, %s4178_s27 }
  0xb2   : > { %v4944_v35 = vpop.permute.xlu1 %744 }
  0xb3   : > { %7397 = vst [vmem:[#allocation73_spill] sm:$0xff] %v4944_v35  ;;  %v4946_v39 = vpop.permute.xlu0 %742 }
  0xb4   : > { %7398 = vst [vmem:[#allocation74_spill] sm:$0xff] %v4946_v39  ;;  %947 = vrot.lane.b32.xlu1 %v4736_v50, %s4178_s27  ;;  %v7303_v39 = vrot.slane %v4324_v21, 2 }
  0xb5   : > { %945 = vrot.lane.b32.xlu0 %v4743_v20, %s4178_s27 }
  0xb6   : > { %v4952_v59 = vpop.permute.xlu1 %748 }
  0xb7   : > { %7399 = vst [vmem:[#allocation75_spill] sm:$0xff] %v4952_v59  ;;  %v4954_v46 = vpop.permute.xlu0 %746  ;;  %v1017_v59 = vrot.slane %v4333_v24, 1 }
  0xb8   : > { %7400 = vst [vmem:[#allocation76_spill] sm:$0xff] %v4954_v46  ;;  %951 = vrot.lane.b32.xlu1 %v4748_v43, %s4178_s27 }
  0xb9   : > { %949 = vrot.lane.b32.xlu0 %v4755_v25, %s4178_s27 }
  0xba   : > { %v4960_v53 = vpop.permute.xlu1 %752 }
  0xbb   : > { %7401 = vst [vmem:[#allocation77_spill] sm:$0xff] %v4960_v53  ;;  %v4962_v2 = vpop.permute.xlu0 %750 }
  0xbc   : > { %7402 = vst [vmem:[#allocation78_spill] sm:$0xff] %v4962_v2  ;;  %955 = vrot.lane.b32.xlu1 %v4760_v29, %s4178_s27  ;;  %v7416_v2 = vshll.u32 %v4290_v1, 16 }
  0xbd   : > { %953 = vrot.lane.b32.xlu0 %v4767_v36, %s4178_s27 }
  0xbe   : > { %v4968_v50 = vpop.permute.xlu1 %756  ;;  %v1014_v53 = vrot.slane %v7416_v2, 2 }
  0xbf   : > { %v4970_v20 = vpop.permute.xlu0 %754 }
  0xc0   : > { %959 = vrot.lane.b32.xlu1 %v4772_v45, %s4178_s27 }
  0xc1   : > { %957 = vrot.lane.b32.xlu0 %v4779_v48, %s4178_s27 }
  0xc2   : > { %v4976_v43 = vpop.permute.xlu1 %760 }
  0xc3   : > { %v4978_v25 = vpop.permute.xlu0 %758 }
  0xc4   : > { %963 = vrot.lane.b32.xlu1 %v4784_v56, %s4178_s27 }
  0xc5   : > { %961 = vrot.lane.b32.xlu0 %v4791_v58, %s4178_s27 }
  0xc6   : > { %v4984_v29 = vpop.permute.xlu1 %764 }
  0xc7   : > { %7403 = vst [vmem:[#allocation79_spill] sm:$0xff] %v4984_v29  ;;  %v4986_v36 = vpop.permute.xlu0 %762 }
  0xc8   : > { %7404 = vst [vmem:[#allocation80_spill] sm:$0xff] %v4986_v36  ;;  %967 = vrot.lane.b32.xlu1 %v4796_v61, %s4178_s27 }
  0xc9   : > { %965 = vrot.lane.b32.xlu0 %v4803_v26, %s4178_s27 }
  0xca   : > { %v4992_v45 = vpop.permute.xlu1 %768 }
  0xcb   : > { %7405 = vst [vmem:[#allocation81_spill] sm:$0xff] %v4992_v45  ;;  %v4994_v48 = vpop.permute.xlu0 %766  ;;  %v7454_v45 = vrot.slane %v4525_v33, 3 }
  0xcc   : > { %7406 = vst [vmem:[#allocation82_spill] sm:$0xff] %v4994_v48  ;;  %971 = vrot.lane.b32.xlu1 %v4808_v28, %s4178_s27 }
  0xcd   : > { %969 = vrot.lane.b32.xlu0 %v4815_v34, %s4178_s27 }
  0xce   : > { %v5000_v56 = vpop.permute.xlu1 %772 }
  0xcf   : > { %7407 = vst [vmem:[#allocation83_spill] sm:$0xff] %v5000_v56  ;;  %v5002_v58 = vpop.permute.xlu0 %770 }
  0xd0   : > { %7408 = vst [vmem:[#allocation84_spill] sm:$0xff] %v5002_v58  ;;  %975 = vrot.lane.b32.xlu1 %v4820_v41, %s4178_s27 }
  0xd1   : > { %973 = vrot.lane.b32.xlu0 %v4827_v51, %s4178_s27 }
  0xd2   : > { %v5008_v61 = vpop.permute.xlu1 %776 }
  0xd3   : > { %7409 = vst [vmem:[#allocation85_spill] sm:$0xff] %v5008_v61  ;;  %v5010_v26 = vpop.permute.xlu0 %774 }
  0xd4   : > { %7410 = vst [vmem:[#allocation86_spill] sm:$0xff] %v5010_v26  ;;  %979 = vrot.lane.b32.xlu1 %v4832_v14, %s4178_s27  ;;  %v7415_v14 = vshrl.u32 %v4290_v1, 16  ;;  %v1456_v26 = vrot.slane %v4333_v24, 2 }
  0xd5   : > { %977 = vrot.lane.b32.xlu0 %v4839_v40, %s4178_s27 }
  0xd6   : > { %v5016_v28 = vpop.permute.xlu1 %780  ;;  %v1013_v40 = vrot.slane %v7415_v14, 1 }
  0xd7   : > { %7411 = vst [vmem:[#allocation87_spill] sm:$0xff] %v5016_v28  ;;  %v5018_v34 = vpop.permute.xlu0 %778 }
  0xd8   : > { %7412 = vst [vmem:[#allocation88_spill] sm:$0xff] %v5018_v34  ;;  %983 = vrot.lane.b32.xlu1 %v4844_v15, %s4178_s27  ;;  %v1018_v15 = vrot.slane %v4321_v19, 2  ;;  %v1015_v2 = vor.u32 %v1014_v53, %v1013_v40 }
  0xd9   : > { %981 = vrot.lane.b32.xlu0 %v4851_v6, %s4178_s27 }
  0xda   : > { %v5024_v41 = vpop.permute.xlu1 %784  ;;  %v5048_v14 = vor.u32 %v1018_v15, %v1017_v59  ;;  %v1236_v59 = vrot.slane %v4309_v12, 2 }
  0xdb   : > { %7413 = vst [vmem:[#allocation89_spill] sm:$0xff] %v5024_v41  ;;  %v5026_v51 = vpop.permute.xlu0 %782  ;;  %v7417_v41 = vshrl.u32 %v4287_v0, 16 }
  0xdc   : > { %7414 = vst [vmem:[#allocation90_spill] sm:$0xff] %v5026_v51  ;;  %987 = vrot.lane.b32.xlu1 %v4856_v5, %s4178_s27  ;;  %v7418_v5 = vshll.u32 %v4287_v0, 16 }
  0xdd   : > { %985 = vrot.lane.b32.xlu0 %v4865_v52, %s4178_s27  ;;  %v1010_v51 = vrot.slane %v7417_v41, 1  ;;  %v1020_v41 = vsel %vm1009_vm2, %v1015_v2, %v5048_v14 }
  0xde   : > { %v5038_v6 = vpop.permute.xlu1 %858  ;;  %v1011_v46 = vrot.slane %v7418_v5, 2 }
  0xdf   : > { %v5044_v28 = vpop.permute.xlu0 %856 }
  0xe0   : > { %991 = vrot.lane.b32.xlu1 %v4872_v30, %s4178_s27  ;;  %v1012_v34 = vor.u32 %v1011_v46, %v1010_v51  ;;  %v1234_v30 = vrot.slane %v4290_v1, 2  ;;  %v1233_v46 = vrot.slane %v4287_v0, 2  ;;  %v4016_v1 = vld [vmem:[%s7196_s1] sm:$0x1f]   ;;  %v4179_v51 = vmov 65535  }
  0xe1   : > { %989 = vrot.lane.b32.xlu0 %v4881_v8, %s4178_s27  ;;  %v2452_v12 = vsel %vm2450_vm4, 4294967295, %v4179_v51  ;;  %v1464_v0 = vrot.slane %v4346_v32, 3  ;;  %vm2908_vm4 = vcmask 1041408  }
  0xe2   : > { %v5052_v52 = vpop.permute.xlu1 %862  ;;  %v1016_v53 = vsel %vm1009_vm2, %v1012_v34, %v1015_v2  ;;  %v1463_v34 = vrot.slane %v4369_v44, 2  ;;  %v2453_v15 = vsel %vm1678_vm5, %v2452_v12, 0  ;;  %v1237_v5 = vsel %vm1232_vm3, %v1234_v30, %v1236_v59 }
  0xe3   : > { %v5054_v35 = vpop.permute.xlu0 %860  ;;  %v1238_v2 = vrot.slane %v4312_v13, 2  ;;  %v2455_v51 = vand.u32 %v4016_v1, %v2453_v15  ;;  %v1085_v15 = vrot.slane %v4538_v37, 1 }
  0xe4   : > { %995 = vrot.lane.b32.xlu1 %v4888_v38, %s4178_s27  ;;  %v1459_v38 = vrot.slane %v4330_v23, 2  ;;  %v5091_v1 = vor.u32 %v1464_v0, %v1463_v34  ;;  %v7428_v0 = vld [vmem:[#allocation30_spill] sm:$0xff] }
  0xe5   : > { %993 = vrot.lane.b32.xlu0 %v4897_v55, %s4178_s27  ;;  %v1460_v55 = vrot.slane %v4327_v22, 3  ;;  %3826 = vmatprep.subr.bf16.mxu0 %v2455_v51  ;;  %v5102_v24 = vsel %vm1232_vm3, %v1236_v59, %v1238_v2  ;;  %v1086_v59 = vrot.slane %v4528_v49, 2  ;;  %v7430_v49 = vrot.slane %v4324_v21, 3 }
  0xe6   : > { %v5064_v8 = vpop.permute.xlu1 %866  ;;  %3896 = vmatprep.subr.bf16.mxu1 %v2455_v51  ;;  %3827 = vmatpush3.bf16.msra.mxu0 %v2455_v51 }
  0xe7   : > { %v5072_v40 = vpop.permute.xlu0 %864  ;;  %v1461_v13 = vor.u32 %v1460_v55, %v1459_v38  ;;  %3897 = vmatpush3.bf16.msra.mxu1 %v2455_v51  ;;  %v4022_v55 = vld [vmem:[%s4284_s20 + $0x28] sm:$0xff]   ;;  %v1087_v11 = vor.u32 %v1086_v59, %v1085_v15 }
  0xe8   : > { %7419 = vst [vmem:[#allocation91_spill] sm:$0xff] %v5072_v40  ;;  %1166 = vrot.lane.b32.xlu1 %v1020_v41, %s4180_s4  ;;  %v1235_v41 = vsel %vm1232_vm3, %v1233_v46, %v1234_v30  ;;  %v5096_v30 = vsel %vm1232_vm3, %v1238_v2, %v7303_v39  ;;  %v1680_v34 = vrot.slane %v4022_v55, 3  ;;  %v4023_v39 = vld [vmem:[%s4284_s20 + $0x20] sm:$0xff]   ;;  %v7427_v55 = vld [vmem:[#allocation38_spill] sm:$0xff] }
  0xe9   : > { %1164 = vrot.lane.b32.xlu0 %v1016_v53, %s4180_s4  ;;  %v1458_v53 = vor.u32 %v1457_v62, %v1456_v26  ;;  %v1466_v38 = vsel %vm1455_vm6, %v1461_v13, %v5091_v1  ;;  %v7425_v62 = vld [vmem:[#allocation37_spill] sm:$0xff]  ;;  %v1679_v56 = vrot.slane %v4023_v39, 3  ;;  %v1081_v58 = vrot.slane %v7427_v55, 1  ;;  %v7453_v55 = vld [vmem:[#allocation7_spill] sm:$0xff] }
  0xea   : > { %v5083_v61 = vpop.permute.xlu1 %870  ;;  %v1090_v26 = vrot.slane %v7425_v62, 2  ;;  %v1022_v39 = vrot.slane %v4327_v22, 2 }
  0xeb   : > { %7420 = vst [vmem:[#allocation92_spill] sm:$0xff] %v5083_v61  ;;  %v5088_v12 = vpop.permute.xlu0 %868 }
  0xec   : > { %7421 = vst [vmem:[#allocation93_spill] sm:$0xff] %v5088_v12  ;;  %1304 = vrot.lane.b32.xlu1 %v1237_v5, %s4181_s5  ;;  %v7424_v5 = vld [vmem:[#allocation42_spill] sm:$0xff]  ;;  %v7482_v12 = vrot.slane %v4541_v16, 3 }
  0xed   : > { %1302 = vrot.lane.b32.xlu0 %v1235_v41, %s4181_s5  ;;  %v1089_v2 = vrot.slane %v7424_v5, 1  ;;  %v1462_v41 = vsel %vm1455_vm6, %v1458_v53, %v1461_v13  ;;  %v1021_v13 = vrot.slane %v4330_v23, 1 }
  0xee   : > { %v5099_v19 = vpop.permute.xlu1 %874 }
  0xef   : > { %7422 = vst [vmem:[#allocation94_spill] sm:$0xff] %v5099_v19  ;;  %v5104_v46 = vpop.permute.xlu0 %872  ;;  %v1683_v19 = vsel %vm1678_vm5, %v1680_v34, %v7430_v49  ;;  %v5130_v10 = vor.u32 %v1090_v26, %v1089_v2  ;;  %v1023_v15 = vor.u32 %v1022_v39, %v1021_v13  ;;  %v1026_v26 = vrot.slane %v4346_v32, 2  ;;  %v7439_v39 = vld [vmem:[#allocation40_spill] sm:$0xff] }
  0xf0   : > { %7423 = vst [vmem:[#allocation95_spill] sm:$0xff] %v5104_v46  ;;  %1389 = vrot.lane.b32.xlu1 %v5096_v30, %s4182_s6  ;;  %v1082_v46 = vrot.slane %v7428_v0, 2  ;;  %v1528_v13 = vrot.slane %v7425_v62, 3 }
  0xf1   : > { %1387 = vrot.lane.b32.xlu0 %v5102_v24, %s4182_s6  ;;  %v1092_v49 = vsel %vm1009_vm2, %v1087_v11, %v5130_v10  ;;  %v1024_v59 = vsel %vm1009_vm2, %v5048_v14, %v1023_v15  ;;  %v1527_v14 = vrot.slane %v7424_v5, 2 }
  0xf2   : > { %v5118_v51 = vpop.permute.xlu1 %878 }
  0xf3   : > { %7426 = vst [vmem:[#allocation42_spill] sm:$0xff] %v5118_v51  ;;  %v5124_v37 = vpop.permute.xlu0 %876  ;;  %v1681_v51 = vsel %vm1678_vm5, %v1679_v56, %v1680_v34  ;;  %v7306_v56 = vrot.slane %v4491_v31, 2  ;;  %v1274_v34 = vrot.slane %v4520_v27, 2  ;;  %v5192_v5 = vor.u32 %v1528_v13, %v1527_v14  ;;  %v7444_v13 = vld [vmem:[#allocation46_spill] sm:$0xff] }
  0xf4   : > { %7429 = vst [vmem:[#allocation37_spill] sm:$0xff] %v5124_v37  ;;  %1612 = vrot.lane.b32.xlu1 %v1466_v38, %s4183_s7  ;;  %v5138_v37 = vor.u32 %v1082_v46, %v1081_v58  ;;  %v1270_v58 = vrot.slane %v4502_v3, 2  ;;  %v1025_v3 = vrot.slane %v4369_v44, 1 }
  0xf5   : > { %1610 = vrot.lane.b32.xlu0 %v1462_v41, %s4183_s7 }
  0xf6   : > { %v5135_v53 = vpop.permute.xlu1 %882  ;;  %7432 = vst [vmem:[#allocation97_spill] sm:$0xff] %v5138_v37  ;;  %v1088_v23 = vsel %vm1009_vm2, %v5138_v37, %v1087_v11  ;;  %v5165_v11 = vsel %vm1232_vm3, %v7306_v56, %v1270_v58 }
  0xf7   : > { %7431 = vst [vmem:[#allocation96_spill] sm:$0xff] %v5135_v53  ;;  %v5140_v38 = vpop.permute.xlu0 %880  ;;  %7437 = vst [vmem:[#allocation102_spill] sm:$0xff] %v5165_v11 }
  0xf8   : > { %7433 = vst [vmem:[#allocation98_spill] sm:$0xff] %v5140_v38  ;;  %1750 = vrot.lane.b32.xlu1 %v1683_v19, %s4184_s8  ;;  %v1272_v19 = vrot.slane %v4525_v33, 2 }
  0xf9   : > { %1748 = vrot.lane.b32.xlu0 %v1681_v51, %s4184_s8 }
  0xfa   : > { %v5146_v22 = vpop.permute.xlu1 %886  ;;  %v5173_v41 = vsel %vm1232_vm3, %v1272_v19, %v1274_v34  ;;  %v5184_v44 = vsel %vm1232_vm3, %v1270_v58, %v1272_v19  ;;  %v7309_v58 = vrot.slane %v4541_v16, 2 }
  0xfb   : > { %7434 = vst [vmem:[#allocation99_spill] sm:$0xff] %v5146_v22  ;;  %v5152_v46 = vpop.permute.xlu0 %884  ;;  %7441 = vst [vmem:[#allocation40_spill] sm:$0xff] %v5184_v44 }
  0xfc   : > { %7435 = vst [vmem:[#allocation100_spill] sm:$0xff] %v5152_v46  ;;  %1202 = vrot.lane.b32.xlu1 %v1092_v49, %s4180_s4  ;;  %v1531_v49 = vrot.slane %v7439_v39, 2  ;;  %v7445_v46 = vld [vmem:[#allocation39_spill] sm:$0xff] }
  0xfd   : > { %1200 = vrot.lane.b32.xlu0 %v1088_v23, %s4180_s4  ;;  %v7440_v23 = vld [vmem:[#allocation36_spill] sm:$0xff]  ;;  %v1536_v53 = vrot.slane %v7445_v46, 3 }
  0xfe   : > { %v5160_v2 = vpop.permute.xlu1 %890  ;;  %v1532_v56 = vrot.slane %v7440_v23, 3  ;;  %7442 = vst [vmem:[#allocation36_spill] sm:$0xff] %v5192_v5 }
  0xff   : > { %7436 = vst [vmem:[#allocation101_spill] sm:$0xff] %v5160_v2  ;;  %v5169_v51 = vpop.permute.xlu0 %888 }
 0x100   : > { %7438 = vst [vmem:[#allocation103_spill] sm:$0xff] %v5169_v51  ;;  %1168 = vrot.lane.b32.xlu1 %v1024_v59, %s4180_s4  ;;  %v5186_v59 = vor.u32 %v1026_v26, %v1025_v3  ;;  %v1533_v62 = vor.u32 %v1532_v56, %v1531_v49  ;;  %v4024_v3 = vld [vmem:[%s4284_s20 + $0x38] sm:$0xff]   ;;  %v1535_v49 = vrot.slane %v7444_v13, 2 }
 0x101   : > { %1338 = vrot.lane.b32.xlu0 %v5165_v11, %s4181_s5  ;;  %v1242_v26 = vrot.slane %v4024_v3, 2  ;;  %v7449_v11 = vld [vmem:[#allocation5_spill] sm:$0xff] }
 0x102   : > { %v5181_v32 = vpop.permute.xlu1 %894  ;;  %v1028_v22 = vsel %vm1009_vm2, %v1023_v15, %v5186_v59  ;;  %v1534_v56 = vsel %vm1455_vm6, %v5192_v5, %v1533_v62  ;;  %v5214_v15 = vsel %vm1232_vm3, %v1274_v34, %v7309_v58  ;;  %v1716_v5 = vrot.slane %v4520_v27, 3  ;;  %v7448_v34 = vld [vmem:[#allocation6_spill] sm:$0xff] }
 0x103   : > { %v5188_v51 = vpop.permute.xlu0 %892  ;;  %v1467_v58 = vrot.slane %v7448_v34, 2  ;;  %v1468_v37 = vrot.slane %v7449_v11, 3  ;;  %v1472_v27 = vrot.slane %v7453_v55, 3 }
 0x104   : > { %1423 = vrot.lane.b32.xlu1 %v5173_v41, %s4182_s6  ;;  %v1717_v48 = vsel %vm1678_vm5, %v7454_v45, %v1716_v5 }
 0x105   : > { %1340 = vrot.lane.b32.xlu0 %v5184_v44, %s4181_s5  ;;  %v1469_v18 = vor.u32 %v1468_v37, %v1467_v58 }
 0x106   : > { %v5196_v2 = vpop.permute.xlu1 %898 }
 0x107   : > { %v5201_v19 = vpop.permute.xlu0 %896  ;;  %v1470_v37 = vsel %vm1455_vm6, %v5091_v1, %v1469_v18 }
 0x108   : > { %1306 = vrot.lane.b32.xlu1 %v5102_v24, %s4181_s5  ;;  %v7447_v24 = vrot.slane %v4324_v21, 2 }
 0x109   : > { %1170 = vrot.lane.b32.xlu0 %v1028_v22, %s4180_s4 }
 0x10a   : > { %v5209_v14 = vpop.permute.xlu1 %902  ;;  %v5224_v44 = vsel %vm1232_vm3, %v7447_v24, %v1242_v26  ;;  %v7452_v24 = vld [vmem:[#allocation11_spill] sm:$0xff] }
 0x10b   : > { %7443 = vst [vmem:[#allocation104_spill] sm:$0xff] %v5209_v14  ;;  %v5218_v38 = vpop.permute.xlu0 %900  ;;  %v1471_v22 = vrot.slane %v7452_v24, 2 }
 0x10c   : > { %7446 = vst [vmem:[#allocation46_spill] sm:$0xff] %v5218_v38  ;;  %1646 = vrot.lane.b32.xlu1 %v1534_v56, %s4183_s7  ;;  %v5234_v56 = vor.u32 %v1536_v53, %v1535_v49  ;;  %v5252_v49 = vld [vmem:[%s4284_s20 + $0x40] sm:$0xff]  }
 0x10d   : > { %1425 = vrot.lane.b32.xlu0 %v5214_v15, %s4182_s6  ;;  %v5258_v33 = vor.u32 %v1472_v27, %v1471_v22  ;;  %v1684_v22 = vrot.slane %v4024_v3, 3  ;;  %v7318_v1 = vrot.slane %v5252_v49, 3  ;;  %v1093_v27 = vrot.slane %v7439_v39, 1 }
 0x10e   : > { %v5232_v31 = vpop.permute.xlu1 %906  ;;  %v1538_v53 = vsel %vm1455_vm6, %v1533_v62, %v5234_v56  ;;  %v7317_v62 = vrot.slane %v4541_v16, 3 }
 0x10f   : > { %7450 = vst [vmem:[#allocation39_spill] sm:$0xff] %v5232_v31  ;;  %v5236_v0 = vpop.permute.xlu0 %904  ;;  %v1687_v39 = vsel %vm1678_vm5, %v1684_v22, %v7318_v1 }
 0x110   : > { %7451 = vst [vmem:[#allocation6_spill] sm:$0xff] %v5236_v0  ;;  %1391 = vrot.lane.b32.xlu1 %v5224_v44, %s4182_s6  ;;  %v7316_v0 = vrot.slane %v5252_v49, 2 }
 0x111   : > { %1308 = vrot.lane.b32.xlu0 %v5096_v30, %s4181_s5 }
 0x112   : > { %v5247_v31 = vpop.permute.xlu1 %910  ;;  %v5268_v30 = vsel %vm1232_vm3, %v1242_v26, %v7316_v0  ;;  %v1098_v26 = vrot.slane %v7445_v46, 2  ;;  %v1029_v46 = vrot.slane %v7448_v34, 1 }
 0x113   : > { %7455 = vst [vmem:[#allocation5_spill] sm:$0xff] %v5247_v31  ;;  %v5255_v7 = vpop.permute.xlu0 %908  ;;  %v7476_v31 = vld [vmem:[#allocation9_spill] sm:$0xff] }
 0x114   : > { %7456 = vst [vmem:[#allocation11_spill] sm:$0xff] %v5255_v7  ;;  %1784 = vrot.lane.b32.xlu1 %v1717_v48, %s4184_s8  ;;  %v1474_v48 = vsel %vm1455_vm6, %v1469_v18, %v5258_v33  ;;  %v1719_v18 = vsel %vm1678_vm5, %v1716_v5, %v7317_v62  ;;  %v7462_v5 = vrot.slane %v4324_v21, 3  ;;  %v1475_v7 = vrot.slane %v7476_v31, 2 }
 0x115   : > { %1648 = vrot.lane.b32.xlu0 %v1538_v53, %s4183_s7  ;;  %v1094_v53 = vrot.slane %v7440_v23, 2 }
 0x116   : > { %v5263_v45 = vpop.permute.xlu1 %914  ;;  %v1685_v62 = vsel %vm1678_vm5, %v7462_v5, %v1684_v22  ;;  %v1278_v22 = vrot.slane %v4548_v4, 2 }
 0x117   : > { %7457 = vst [vmem:[#allocation7_spill] sm:$0xff] %v5263_v45  ;;  %v5271_v58 = vpop.permute.xlu0 %912  ;;  %v1097_v45 = vrot.slane %v7444_v13, 1  ;;  %v1095_v23 = vor.u32 %v1094_v53, %v1093_v27 }
 0x118   : > { %7458 = vst [vmem:[#allocation105_spill] sm:$0xff] %v5271_v58  ;;  %1614 = vrot.lane.b32.xlu1 %v1470_v37, %s4183_s7  ;;  %v1030_v37 = vrot.slane %v7449_v11, 2 }
 0x119   : > { %1393 = vrot.lane.b32.xlu0 %v5268_v30, %s4182_s6  ;;  %v5294_v13 = vor.u32 %v1098_v26, %v1097_v45  ;;  %v1096_v11 = vsel %vm1009_vm2, %v5130_v10, %v1095_v23  ;;  %v7464_v10 = vrot.slane %v4541_v16, 2 }
 0x11a   : > { %v5283_v0 = vpop.permute.xlu1 %918  ;;  %v1031_v27 = vor.u32 %v1030_v37, %v1029_v46  ;;  %v7466_v46 = vld [vmem:[#allocation41_spill] sm:$0xff] }
 0x11b   : > { %7459 = vst [vmem:[#allocation106_spill] sm:$0xff] %v5283_v0  ;;  %v5288_v3 = vpop.permute.xlu0 %916  ;;  %v1100_v45 = vsel %vm1009_vm2, %v1095_v23, %v5294_v13  ;;  %v5331_v23 = vsel %vm1232_vm3, %v7464_v10, %v1278_v22  ;;  %v1540_v37 = vrot.slane %v7466_v46, 3 }
 0x11c   : > { %7460 = vst [vmem:[#allocation107_spill] sm:$0xff] %v5288_v3  ;;  %1616 = vrot.lane.b32.xlu1 %v1474_v48, %s4183_s7  ;;  %v1032_v21 = vsel %vm1009_vm2, %v5186_v59, %v1031_v27  ;;  %v7465_v59 = vld [vmem:[#allocation43_spill] sm:$0xff] }
 0x11d   : > { %1786 = vrot.lane.b32.xlu0 %v1719_v18, %s4184_s8  ;;  %v1034_v18 = vrot.slane %v7453_v55, 2  ;;  %v1539_v4 = vrot.slane %v7465_v59, 2 }
 0x11e   : > { %v5299_v0 = vpop.permute.xlu1 %922 }
 0x11f   : > { %7461 = vst [vmem:[#allocation108_spill] sm:$0xff] %v5299_v0  ;;  %v5304_v48 = vpop.permute.xlu0 %920  ;;  %v7473_v0 = vld [vmem:[#allocation44_spill] sm:$0xff] }
 0x120   : > { %7463 = vst [vmem:[#allocation109_spill] sm:$0xff] %v5304_v48  ;;  %1754 = vrot.lane.b32.xlu1 %v1687_v39, %s4184_s8  ;;  %v1544_v48 = vrot.slane %v7473_v0, 3 }
 0x121   : > { %1752 = vrot.lane.b32.xlu0 %v1685_v62, %s4184_s8  ;;  %v1033_v62 = vrot.slane %v7452_v24, 1 }
 0x122   : > { %v5310_v34 = vpop.permute.xlu1 %943 }
 0x123   : > { %v5314_v53 = vpop.permute.xlu0 %941  ;;  %v5339_v55 = vor.u32 %v1034_v18, %v1033_v62  ;;  %v4026_v18 = vld [vmem:[%s4284_s20 + $0x48] sm:$0xff]  }
 0x124   : > { %1206 = vrot.lane.b32.xlu1 %v1100_v45, %s4180_s4  ;;  %v1541_v45 = vor.u32 %v1540_v37, %v1539_v4  ;;  %v1246_v4 = vrot.slane %v4026_v18, 2  ;;  %v7472_v37 = vld [vmem:[#allocation50_spill] sm:$0xff] }
 0x125   : > { %1204 = vrot.lane.b32.xlu0 %v1096_v11, %s4180_s4  ;;  %v1543_v1 = vrot.slane %v7472_v37, 2 }
 0x126   : > { %v5321_v26 = vpop.permute.xlu1 %947  ;;  %v1542_v62 = vsel %vm1455_vm6, %v5234_v56, %v1541_v45 }
 0x127   : > { %v5325_v39 = vpop.permute.xlu0 %945 }
 0x128   : > { %1172 = vrot.lane.b32.xlu1 %v1032_v21, %s4180_s4  ;;  %v1036_v21 = vsel %vm1009_vm2, %v1031_v27, %v5339_v55 }
 0x129   : > { %1342 = vrot.lane.b32.xlu0 %v5173_v41, %s4181_s5  ;;  %v7319_v41 = vrot.slane %v4566_v9, 2 }
 0x12a   : > { %v5337_v24 = vpop.permute.xlu1 %951 }
 0x12b   : > { %7467 = vst [vmem:[#allocation43_spill] sm:$0xff] %v5337_v24  ;;  %v5341_v5 = vpop.permute.xlu0 %949  ;;  %v5365_v27 = vsel %vm1232_vm3, %v1278_v22, %v7319_v41  ;;  %v7477_v22 = vld [vmem:[#allocation8_spill] sm:$0xff] }
 0x12c   : > { %7468 = vst [vmem:[#allocation41_spill] sm:$0xff] %v5341_v5  ;;  %1427 = vrot.lane.b32.xlu1 %v5331_v23, %s4182_s6  ;;  %v1476_v41 = vrot.slane %v7477_v22, 3  ;;  %v4034_v5 = vld [vmem:[%s4284_s20] sm:$0xff]  }
 0x12d   : > { %1344 = vrot.lane.b32.xlu0 %v5214_v15, %s4181_s5  ;;  %v1818_v24 = vsel %vm1816_vm7, %v4034_v5, %v4867_v47 }
 0x12e   : > { %v5347_v11 = vpop.permute.xlu1 %955  ;;  %v1477_v17 = vor.u32 %v1476_v41, %v1475_v7  ;;  %v1887_v47 = vsel %vm1885_vm8, %v1818_v24, %v5044_v28 }
 0x12f   : > { %7469 = vst [vmem:[#allocation110_spill] sm:$0xff] %v5347_v11  ;;  %v5352_v10 = vpop.permute.xlu0 %953  ;;  %v7481_v11 = vld [vmem:[#allocation10_spill] sm:$0xff] }
 0x130   : > { %7470 = vst [vmem:[#allocation111_spill] sm:$0xff] %v5352_v10  ;;  %1310 = vrot.lane.b32.xlu1 %v5224_v44, %s4181_s5  ;;  %v7475_v44 = vrot.slane %v5252_v49, 2  ;;  %v1478_v7 = vsel %vm1455_vm6, %v5258_v33, %v1477_v17 }
 0x131   : > { %1174 = vrot.lane.b32.xlu0 %v1036_v21, %s4180_s4  ;;  %v4027_v21 = vld [vmem:[%s4284_s20 + $0xc8] sm:$0xff]  }
 0x132   : > { %v5360_v15 = vpop.permute.xlu1 %959  ;;  %v5375_v56 = vsel %vm1232_vm3, %v7475_v44, %v1246_v4  ;;  %v1720_v58 = vrot.slane %v4027_v21, 3  ;;  %v7480_v44 = vld [vmem:[#allocation16_spill] sm:$0xff]  ;;  %v1480_v21 = vrot.slane %v7481_v11, 3 }
 0x133   : > { %7471 = vst [vmem:[#allocation112_spill] sm:$0xff] %v5360_v15  ;;  %v5369_v3 = vpop.permute.xlu0 %957  ;;  %v1479_v10 = vrot.slane %v7480_v44, 2 }
 0x134   : > { %7474 = vst [vmem:[#allocation50_spill] sm:$0xff] %v5369_v3  ;;  %1650 = vrot.lane.b32.xlu1 %v1542_v62, %s4183_s7  ;;  %v5384_v3 = vor.u32 %v1544_v48, %v1543_v1  ;;  %v1721_v61 = vsel %vm1678_vm5, %v7482_v12, %v1720_v58 }
 0x135   : > { %1429 = vrot.lane.b32.xlu0 %v5365_v27, %s4182_s6  ;;  %v5408_v16 = vor.u32 %v1480_v21, %v1479_v10  ;;  %v1101_v21 = vrot.slane %v7465_v59, 1 }
 0x136   : > { %v5382_v15 = vpop.permute.xlu1 %963  ;;  %v1546_v48 = vsel %vm1455_vm6, %v1541_v45, %v5384_v3  ;;  %v5421_v45 = vld [vmem:[%s4284_s20 + $0xd0] sm:$0xff]  }
 0x137   : > { %7478 = vst [vmem:[#allocation44_spill] sm:$0xff] %v5382_v15  ;;  %v5386_v62 = vpop.permute.xlu0 %961  ;;  %v5402_v15 = vld [vmem:[%s4284_s20 + $0x50] sm:$0xff]   ;;  %v1482_v33 = vsel %vm1455_vm6, %v1477_v17, %v5408_v16 }
 0x138   : > { %7479 = vst [vmem:[#allocation9_spill] sm:$0xff] %v5386_v62  ;;  %1395 = vrot.lane.b32.xlu1 %v5375_v56, %s4182_s6  ;;  %v7320_v62 = vrot.slane %v5402_v15, 2  ;;  %v7321_v10 = vrot.slane %v5402_v15, 3 }
 0x139   : > { %1312 = vrot.lane.b32.xlu0 %v5268_v30, %s4181_s5 }
 0x13a   : > { %v5397_v1 = vpop.permute.xlu1 %967  ;;  %v5418_v30 = vsel %vm1232_vm3, %v1246_v4, %v7320_v62  ;;  %v1105_v4 = vrot.slane %v7472_v37, 1  ;;  %v1106_v62 = vrot.slane %v7473_v0, 2  ;;  %v1037_v0 = vrot.slane %v7476_v31, 1 }
 0x13b   : > { %7483 = vst [vmem:[#allocation8_spill] sm:$0xff] %v5397_v1  ;;  %v5405_v14 = vpop.permute.xlu0 %965 }
 0x13c   : > { %7484 = vst [vmem:[#allocation16_spill] sm:$0xff] %v5405_v14  ;;  %1788 = vrot.lane.b32.xlu1 %v1721_v61, %s4184_s8  ;;  %v1688_v61 = vrot.slane %v4026_v18, 3  ;;  %v5447_v37 = vor.u32 %v1106_v62, %v1105_v4 }
 0x13d   : > { %1652 = vrot.lane.b32.xlu0 %v1546_v48, %s4183_s7  ;;  %v1102_v48 = vrot.slane %v7466_v46, 2 }
 0x13e   : > { %v5413_v12 = vpop.permute.xlu1 %971  ;;  %v1691_v59 = vsel %vm1678_vm5, %v1688_v61, %v7321_v10  ;;  %v5508_v10 = vld [vmem:[%s4284_s20 + $0xe0] sm:$0xff]  }
 0x13f   : > { %7485 = vst [vmem:[#allocation10_spill] sm:$0xff] %v5413_v12  ;;  %v5424_v1 = vpop.permute.xlu0 %969  ;;  %v1103_v46 = vor.u32 %v1102_v48, %v1101_v21 }
 0x140   : > { %7486 = vst [vmem:[#allocation113_spill] sm:$0xff] %v5424_v1  ;;  %1618 = vrot.lane.b32.xlu1 %v1478_v7, %s4183_s7  ;;  %v7488_v7 = vrot.slane %v5421_v45, 3  ;;  %v7500_v1 = vld [vmem:[#allocation49_spill] sm:$0xff] }
 0x141   : > { %1397 = vrot.lane.b32.xlu0 %v5418_v30, %s4182_s6  ;;  %v1108_v62 = vsel %vm1009_vm2, %v1103_v46, %v5447_v37  ;;  %v1552_v14 = vrot.slane %v7500_v1, 3 }
 0x142   : > { %v5436_v41 = vpop.permute.xlu1 %975  ;;  %v1723_v17 = vsel %vm1678_vm5, %v1720_v58, %v7488_v7  ;;  %v7490_v58 = vrot.slane %v5252_v49, 3 }
 0x143   : > { %7487 = vst [vmem:[#allocation114_spill] sm:$0xff] %v5436_v41  ;;  %v5441_v18 = vpop.permute.xlu0 %973  ;;  %v1038_v41 = vrot.slane %v7477_v22, 2  ;;  %v1104_v22 = vsel %vm1009_vm2, %v5294_v13, %v1103_v46  ;;  %v1042_v13 = vrot.slane %v7481_v11, 2  ;;  %v7493_v46 = vrot.slane %v4566_v9, 2 }
 0x144   : > { %7489 = vst [vmem:[#allocation115_spill] sm:$0xff] %v5441_v18  ;;  %1620 = vrot.lane.b32.xlu1 %v1482_v33, %s4183_s7  ;;  %v1689_v33 = vsel %vm1678_vm5, %v7490_v58, %v1688_v61  ;;  %v5473_v61 = vld [vmem:[%s4284_s20 + $0xd8] sm:$0xff]   ;;  %v1551_v18 = vrot.slane %v4665_v42, 2 }
 0x145   : > { %1790 = vrot.lane.b32.xlu0 %v1723_v17, %s4184_s8  ;;  %v1039_v21 = vor.u32 %v1038_v41, %v1037_v0  ;;  %v1282_v4 = vrot.slane %v5473_v61, 2  ;;  %v1041_v17 = vrot.slane %v7480_v44, 1  ;;  %v7494_v0 = vld [vmem:[#allocation48_spill] sm:$0xff] }
 0x146   : > { %v5452_v12 = vpop.permute.xlu1 %979  ;;  %v1547_v58 = vrot.slane %v7494_v0, 2 }
 0x147   : > { %v5457_v7 = vpop.permute.xlu0 %977  ;;  %v1040_v49 = vsel %vm1009_vm2, %v5339_v55, %v1039_v21  ;;  %v5487_v55 = vsel %vm1232_vm3, %v7493_v46, %v1282_v4  ;;  %v5495_v11 = vor.u32 %v1042_v13, %v1041_v17 }
 0x148   : > { %1758 = vrot.lane.b32.xlu1 %v1691_v59, %s4184_s8 }
 0x149   : > { %1756 = vrot.lane.b32.xlu0 %v1689_v33, %s4184_s8  ;;  %v7495_v33 = vld [vmem:[#allocation45_spill] sm:$0xff]  ;;  %v1044_v46 = vsel %vm1009_vm2, %v1039_v21, %v5495_v11 }
 0x14a   : > { %v5463_v31 = vpop.permute.xlu1 %983 }
 0x14b   : > { %v5467_v48 = vpop.permute.xlu0 %981 }
 0x14c   : > { %1210 = vrot.lane.b32.xlu1 %v1108_v62, %s4180_s4  ;;  %v1548_v62 = vrot.slane %v7495_v33, 3 }
 0x14d   : > { %1208 = vrot.lane.b32.xlu0 %v1104_v22, %s4180_s4 }
 0x14e   : > { %v5477_v41 = vpop.permute.xlu1 %987  ;;  %v1549_v9 = vor.u32 %v1548_v62, %v1547_v58  ;;  %v5518_v58 = vld [vmem:[%s4284_s20 + $0x58] sm:$0xff]  }
 0x14f   : > { %7491 = vst [vmem:[#allocation116_spill] sm:$0xff] %v5477_v41  ;;  %v5481_v59 = vpop.permute.xlu0 %985  ;;  %v5540_v41 = vor.u32 %v1552_v14, %v1551_v18  ;;  %v5552_v18 = vld [vmem:[%s4284_s20 + $0x60] sm:$0xff]   ;;  %v1692_v24 = vrot.slane %v5518_v58, 3 }
 0x150   : > { %7492 = vst [vmem:[#allocation117_spill] sm:$0xff] %v5481_v59  ;;  %1176 = vrot.lane.b32.xlu1 %v1040_v49, %s4180_s4  ;;  %v1550_v13 = vsel %vm1455_vm6, %v5384_v3, %v1549_v9  ;;  %v7501_v3 = vrot.slane %v5402_v15, 2  ;;  %v7505_v59 = vld [vmem:[#allocation14_spill] sm:$0xff]  ;;  %v1252_v57 = vrot.slane %v5552_v18, 2 }
 0x151   : > { %1346 = vrot.lane.b32.xlu0 %v5331_v23, %s4181_s5  ;;  %v7322_v23 = vrot.slane %v5508_v10, 2  ;;  %v1554_v40 = vsel %vm1455_vm6, %v1549_v9, %v5540_v41 }
 0x152   : > { %v5493_v44 = vpop.permute.xlu1 %991 }
 0x153   : > { %7496 = vst [vmem:[#allocation48_spill] sm:$0xff] %v5493_v44  ;;  %v5497_v22 = vpop.permute.xlu0 %989  ;;  %v5525_v21 = vsel %vm1232_vm3, %v1282_v4, %v7322_v23 }
 0x154   : > { %7497 = vst [vmem:[#allocation45_spill] sm:$0xff] %v5497_v22  ;;  %1431 = vrot.lane.b32.xlu1 %v5487_v55, %s4182_s6  ;;  %v7503_v22 = vld [vmem:[#allocation12_spill] sm:$0xff] }
 0x155   : > { %1348 = vrot.lane.b32.xlu0 %v5365_v27, %s4181_s5  ;;  %v1250_v27 = vrot.slane %v5518_v58, 2  ;;  %v1484_v4 = vrot.slane %v7503_v22, 3  ;;  %v1113_v58 = vrot.slane %v4665_v42, 1 }
 0x156   : > { %v5503_v49 = vpop.permute.xlu1 %995 }
 0x157   : > { %7498 = vst [vmem:[#allocation118_spill] sm:$0xff] %v5503_v49  ;;  %v5511_v17 = vpop.permute.xlu0 %993  ;;  %v5533_v49 = vsel %vm1232_vm3, %v7501_v3, %v1250_v27  ;;  %v1488_v3 = vrot.slane %v7505_v59, 3  ;;  %v5576_v5 = vsel %vm1232_vm3, %v1250_v27, %v1252_v57 }
 0x158   : > { %7499 = vst [vmem:[#allocation119_spill] sm:$0xff] %v5511_v17  ;;  %1314 = vrot.lane.b32.xlu1 %v5375_v56, %s4181_s5  ;;  %v7502_v17 = vld [vmem:[#allocation13_spill] sm:$0xff] }
 0x159   : > { %1178 = vrot.lane.b32.xlu0 %v1044_v46, %s4180_s4  ;;  %v1724_v46 = vrot.slane %v5473_v61, 3  ;;  %v1483_v44 = vrot.slane %v7502_v17, 2  ;;  %v7506_v61 = vrot.slane %v5421_v45, 3 }
 0x15a   : > { %v1167_v62 = vpop.permute.xlu1 %1166 }
 0x15b   : > { %v1165_v56 = vpop.permute.xlu0 %1164  ;;  %v1725_v36 = vsel %vm1678_vm5, %v7506_v61, %v1724_v46  ;;  %v1485_v60 = vor.u32 %v1484_v4, %v1483_v44  ;;  %v4035_v61 = vld [vmem:[%s4284_s20 + $0x8] sm:$0xff]  }
 0x15c   : > { %1654 = vrot.lane.b32.xlu1 %v1550_v13, %s4183_s7  ;;  %v7504_v13 = vld [vmem:[#allocation20_spill] sm:$0xff]  ;;  %v1820_v44 = vsel %vm1816_vm7, %v4035_v61, %v4883_v54  ;;  %v1110_v61 = vrot.slane %v7495_v33, 2 }
 0x15d   : > { %1433 = vrot.lane.b32.xlu0 %v5525_v21, %s4182_s6  ;;  %v1487_v29 = vrot.slane %v7504_v13, 2  ;;  %v1889_v4 = vsel %vm1885_vm8, %v1820_v44, %v5038_v6  ;;  %v1114_v44 = vrot.slane %v7500_v1, 2 }
 0x15e   : > { %v1305_v23 = vpop.permute.xlu1 %1304  ;;  %v1958_v6 = vsel %vm1954_vm9, %v1889_v4, %v5310_v34 }
 0x15f   : > { %v1303_v38 = vpop.permute.xlu0 %1302  ;;  %v5560_v45 = vor.u32 %v1488_v3, %v1487_v29  ;;  %v1486_v29 = vsel %vm1455_vm6, %v5408_v16, %v1485_v60  ;;  %v1956_v16 = vsel %vm1954_vm9, %v1887_v47, %v5314_v53  ;;  %v2027_v9 = vsel %vm2023_vm10, %v1958_v6, %v1167_v62 }
 0x160   : > { %1399 = vrot.lane.b32.xlu1 %v5533_v49, %s4182_s6  ;;  %v1109_v3 = vrot.slane %v7494_v0, 1  ;;  %v2025_v34 = vsel %vm2023_vm10, %v1956_v16, %v1165_v56  ;;  %v5611_v47 = vor.u32 %v1114_v44, %v1113_v58  ;;  %v7507_v6 = vrot.slane %v5402_v15, 3 }
 0x161   : > { %1316 = vrot.lane.b32.xlu0 %v5418_v30, %s4181_s5  ;;  %v1490_v28 = vsel %vm1455_vm6, %v1485_v60, %v5560_v45  ;;  %v2096_v60 = vsel %vm2092_vm11, %v2027_v9, %v1305_v23  ;;  %v2094_v4 = vsel %vm2092_vm11, %v2025_v34, %v1303_v38  ;;  %v1050_v58 = vrot.slane %v7505_v59, 2 }
 0x162   : > { %v1390_v14 = vpop.permute.xlu1 %1389 }
 0x163   : > { %v1388_v30 = vpop.permute.xlu0 %1387  ;;  %v2165_v53 = vsel %vm2161_vm12, %v2096_v60, %v1390_v14  ;;  %v1111_v14 = vor.u32 %v1110_v61, %v1109_v3  ;;  %v1049_v60 = vrot.slane %v7504_v13, 1 }
 0x164   : > { %1792 = vrot.lane.b32.xlu1 %v1725_v36, %s4184_s8  ;;  %v1726_v36 = vrot.slane %v5508_v10, 3  ;;  %v2163_v0 = vsel %vm2161_vm12, %v2094_v4, %v1388_v30  ;;  %v7509_v4 = vld [vmem:[#allocation51_spill] sm:$0xff] }
 0x165   : > { %1656 = vrot.lane.b32.xlu0 %v1554_v40, %s4183_s7  ;;  %v7326_v40 = vrot.slane %v5552_v18, 3  ;;  %v5655_v59 = vor.u32 %v1050_v58, %v1049_v60  ;;  %v7512_v60 = vld [vmem:[#allocation17_spill] sm:$0xff] }
 0x166   : > { %v1613_v54 = vpop.permute.xlu1 %1612  ;;  %v1727_v23 = vsel %vm1678_vm5, %v1724_v46, %v1726_v36  ;;  %v1046_v46 = vrot.slane %v7503_v22, 2  ;;  %v1491_v58 = vrot.slane %v7512_v60, 2 }
 0x167   : > { %v1611_v27 = vpop.permute.xlu0 %1610  ;;  %v2234_v33 = vsel %vm2230_vm13, %v2165_v53, %v1613_v54  ;;  %v1695_v56 = vsel %vm1678_vm5, %v1692_v24, %v7326_v40  ;;  %v1555_v53 = vrot.slane %v7509_v4, 2 }
 0x168   : > { %1622 = vrot.lane.b32.xlu1 %v1486_v29, %s4183_s7  ;;  %v2232_v42 = vsel %vm2230_vm13, %v2163_v0, %v1611_v27  ;;  %v1045_v29 = vrot.slane %v7502_v17, 1  ;;  %v1116_v17 = vsel %vm1009_vm2, %v1111_v14, %v5611_v47  ;;  %v1112_v27 = vsel %vm1009_vm2, %v5447_v37, %v1111_v14 }
 0x169   : > { %1401 = vrot.lane.b32.xlu0 %v5576_v5, %s4182_s6  ;;  %v7508_v37 = vrot.slane %v5508_v10, 2  ;;  %v4042_v10 = vld [vmem:[%s4284_s20 + $0x10] sm:$0xff]  }
 0x16a   : > { %v1751_v62 = vpop.permute.xlu1 %1750  ;;  %v1047_v22 = vor.u32 %v1046_v46, %v1045_v29 }
 0x16b   : > { %v2303_v1 = vsel %vm2299_vm14, %v2234_v33, %v1751_v62  ;;  %v1749_v38 = vpop.permute.xlu0 %1748  ;;  %v7510_v62 = vld [vmem:[#allocation47_spill] sm:$0xff] }
 0x16c   : > { %1624 = vrot.lane.b32.xlu1 %v1490_v28, %s4183_s7  ;;  %v2301_v30 = vsel %vm2299_vm14, %v2232_v42, %v1749_v38  ;;  %v1693_v28 = vsel %vm1678_vm5, %v7507_v6, %v1692_v24  ;;  %v1048_v15 = vsel %vm1009_vm2, %v5495_v11, %v1047_v22  ;;  %v5635_v24 = vld [vmem:[%s4284_s20 + $0xe8] sm:$0xff]   ;;  %v1556_v0 = vrot.slane %v7510_v62, 3  ;;  %v5666_v38 = vld [vmem:[%s4284_s20 + $0xf0] sm:$0xff]  }
 0x16d   : > { %1794 = vrot.lane.b32.xlu0 %v1727_v23, %s4184_s8  ;;  %3828 = vmatprep.mubr.msk.bf16.mxu0 %vm2381_vm15, %v2301_v30  ;;  %v1286_v61 = vrot.slane %v5635_v24, 2 }
 0x16e   : > { %v5617_v54 = vpop.permute.xlu1 %1202  ;;  %3829 = vmatmul.mubr.msk.bf16.vlgmr.msra.gmra.mrb[0].mxu0 %vm2381_vm15, %v2303_v1  ;;  %v1557_v23 = vor.u32 %v1556_v0, %v1555_v53  ;;  %v1052_v1 = vsel %vm1009_vm2, %v1047_v22, %v5655_v59  ;;  %v1559_v22 = vrot.slane %v4687_v63, 2 }
 0x16f   : > { %v1201_v16 = vpop.permute.xlu0 %1200  ;;  %v5647_v11 = vsel %vm1232_vm3, %v7508_v37, %v1286_v61  ;;  %v7513_v37 = vld [vmem:[#allocation15_spill] sm:$0xff] }
 0x170   : > { %1762 = vrot.lane.b32.xlu1 %v1695_v56, %s4184_s8  ;;  %v5670_v56 = vld [vmem:[%s4284_s20 + $0x90] sm:$0xff]   ;;  %v1558_v6 = vsel %vm1455_vm6, %v5540_v41, %v1557_v23  ;;  %v1492_v53 = vrot.slane %v7513_v37, 3 }
 0x171   : > { %1760 = vrot.lane.b32.xlu0 %v1693_v28, %s4184_s8  ;;  %v1854_v14 = vsel %vm1816_vm7, %v5670_v56, %v4970_v20 }
 0x172   : > { %v5627_v9 = vpop.permute.xlu1 %1168  ;;  %v1923_v46 = vsel %vm1885_vm8, %v1854_v14, %v5188_v51  ;;  %v7511_v51 = vld [vmem:[#allocation52_spill] sm:$0xff] }
 0x173   : > { %v1339_v3 = vpop.permute.xlu0 %1338  ;;  %v1992_v28 = vsel %vm1954_vm9, %v1923_v46, %v5457_v7 }
 0x174   : > { %1214 = vrot.lane.b32.xlu1 %v1116_v17, %s4180_s4  ;;  %v2061_v17 = vsel %vm2023_vm10, %v1992_v28, %v1201_v16 }
 0x175   : > { %1212 = vrot.lane.b32.xlu0 %v1112_v27, %s4180_s4  ;;  %v1560_v27 = vrot.slane %v7511_v51, 3  ;;  %v2130_v41 = vsel %vm2092_vm11, %v2061_v17, %v1339_v3  ;;  %v1493_v17 = vor.u32 %v1492_v53, %v1491_v58  ;;  %v4043_v58 = vld [vmem:[%s4284_s20 + $0x18] sm:$0xff]   ;;  %v7517_v53 = vld [vmem:[#allocation60_spill] sm:$0xff] }
 0x176   : > { %v1424_v34 = vpop.permute.xlu1 %1423 }
 0x177   : > { %v5641_v44 = vpop.permute.xlu0 %1340  ;;  %v2199_v16 = vsel %vm2161_vm12, %v2130_v41, %v1424_v34  ;;  %v5728_v41 = vld [vmem:[%s4284_s20 + $0x70] sm:$0xff]  }
 0x178   : > { %1180 = vrot.lane.b32.xlu1 %v1048_v15, %s4180_s4 }
 0x179   : > { %1350 = vrot.lane.b32.xlu0 %v5487_v55, %s4181_s5  ;;  %v7325_v55 = vrot.slane %v5666_v38, 2 }
 0x17a   : > { %v5653_v13 = vpop.permute.xlu1 %1306 }
 0x17b   : > { %v5657_v33 = vpop.permute.xlu0 %1170 }
 0x17c   : > { %1435 = vrot.lane.b32.xlu1 %v5647_v11, %s4182_s6 }
 0x17d   : > { %1352 = vrot.lane.b32.xlu0 %v5525_v21, %s4181_s5  ;;  %v5680_v21 = vld [vmem:[%s4284_s20 + $0x68] sm:$0xff]  }
 0x17e   : > { %v1647_v42 = vpop.permute.xlu1 %1646  ;;  %v1254_v29 = vrot.slane %v5680_v21, 2 }
 0x17f   : > { %v5675_v30 = vpop.permute.xlu0 %1425  ;;  %v2268_v3 = vsel %vm2230_vm13, %v2199_v16, %v1647_v42  ;;  %v1256_v16 = vrot.slane %v5728_v41, 2 }
 0x180   : > { %1318 = vrot.lane.b32.xlu1 %v5533_v49, %s4181_s5  ;;  %v5696_v49 = vsel %vm1232_vm3, %v1286_v61, %v7325_v55  ;;  %v5705_v7 = vsel %vm1232_vm3, %v1252_v57, %v1254_v29  ;;  %v1728_v61 = vrot.slane %v5635_v24, 3  ;;  %v7515_v57 = vld [vmem:[#allocation18_spill] sm:$0xff]  ;;  %v1824_v55 = vsel %vm1816_vm7, %v4043_v58, %v7517_v53 }
 0x181   : > { %1182 = vrot.lane.b32.xlu0 %v1052_v1, %s4180_s4  ;;  %v7514_v1 = vld [vmem:[#allocation24_spill] sm:$0xff]  ;;  %v1496_v46 = vrot.slane %v7515_v57, 3  ;;  %v1122_v58 = vrot.slane %v7511_v51, 2  ;;  %v1053_v24 = vrot.slane %v7512_v60, 1 }
 0x182   : > { %v5690_v20 = vpop.permute.xlu1 %1391  ;;  %v1495_v14 = vrot.slane %v7514_v1, 2  ;;  %v1729_v42 = vsel %vm1678_vm5, %v1726_v36, %v1728_v61 }
 0x183   : > { %v1309_v15 = vpop.permute.xlu0 %1308 }
 0x184   : > { %1658 = vrot.lane.b32.xlu1 %v1558_v6, %s4183_s7  ;;  %v5717_v6 = vor.u32 %v1560_v27, %v1559_v22 }
 0x185   : > { %1437 = vrot.lane.b32.xlu0 %v5696_v49, %s4182_s6 }
 0x186   : > { %v1785_v0 = vpop.permute.xlu1 %1784 }
 0x187   : > { %v2337_v34 = vsel %vm2299_vm14, %v2268_v3, %v1785_v0  ;;  %v1649_v28 = vpop.permute.xlu0 %1648  ;;  %v5732_v3 = vld [vmem:[%s4284_s20 + $0x98] sm:$0xff]   ;;  %v5739_v0 = vor.u32 %v1496_v46, %v1495_v14 }
 0x188   : > { %1403 = vrot.lane.b32.xlu1 %v5705_v7, %s4182_s6  ;;  %3864 = vmatprep.mubr.msk.bf16.mxu1 %vm2381_vm15, %v2337_v34  ;;  %v1856_v22 = vsel %vm1816_vm7, %v5732_v3, %v4968_v50  ;;  %v7516_v34 = vld [vmem:[#allocation59_spill] sm:$0xff]  ;;  %v1562_v50 = vsel %vm1455_vm6, %v1557_v23, %v5717_v6  ;;  %v5765_v23 = vsel %vm1232_vm3, %v1254_v29, %v1256_v16 }
 0x189   : > { %1320 = vrot.lane.b32.xlu0 %v5576_v5, %s4181_s5  ;;  %v1822_v36 = vsel %vm1816_vm7, %v4042_v10, %v7516_v34  ;;  %v1925_v40 = vsel %vm1885_vm8, %v1856_v22, %v5181_v32  ;;  %v1893_v5 = vsel %vm1885_vm8, %v1824_v55, %v5052_v52  ;;  %v1494_v32 = vsel %vm1455_vm6, %v5560_v45, %v1493_v17 }
 0x18a   : > { %v1615_v27 = vpop.permute.xlu1 %1614  ;;  %v1891_v14 = vsel %vm1885_vm8, %v1822_v36, %v5054_v35  ;;  %v1994_v46 = vsel %vm1954_vm9, %v1925_v40, %v5452_v12  ;;  %v1730_v52 = vrot.slane %v5666_v38, 3  ;;  %v1498_v40 = vsel %vm1455_vm6, %v1493_v17, %v5739_v0 }
 0x18b   : > { %v1394_v10 = vpop.permute.xlu0 %1393  ;;  %v2063_v34 = vsel %vm2023_vm10, %v1994_v46, %v5617_v54  ;;  %v1696_v54 = vrot.slane %v5680_v21, 3  ;;  %v1698_v45 = vrot.slane %v5728_v41, 3  ;;  %v1962_v55 = vsel %vm1954_vm9, %v1893_v5, %v5321_v26 }
 0x18c   : > { %1796 = vrot.lane.b32.xlu1 %v1729_v42, %s4184_s8  ;;  %v2132_v35 = vsel %vm2092_vm11, %v2063_v34, %v5641_v44  ;;  %v1117_v42 = vrot.slane %v7509_v4, 1  ;;  %v1118_v44 = vrot.slane %v7510_v62, 2  ;;  %v1960_v22 = vsel %vm1954_vm9, %v1891_v14, %v5325_v39 }
 0x18d   : > { %1660 = vrot.lane.b32.xlu0 %v1562_v50, %s4183_s7  ;;  %v2201_v29 = vsel %vm2161_vm12, %v2132_v35, %v5675_v30  ;;  %v2031_v17 = vsel %vm2023_vm10, %v1962_v55, %v5657_v33  ;;  %v1121_v26 = vrot.slane %v4687_v63, 1  ;;  %v2029_v30 = vsel %vm2023_vm10, %v1960_v22, %v5627_v9  ;;  %v7520_v22 = vld [vmem:[#allocation54_spill] sm:$0xff] }
 0x18e   : > { %v1617_v12 = vpop.permute.xlu1 %1616  ;;  %v2270_v21 = vsel %vm2230_vm13, %v2201_v29, %v1649_v28  ;;  %v2100_v4 = vsel %vm2092_vm11, %v2031_v17, %v1309_v15  ;;  %v2098_v39 = vsel %vm2092_vm11, %v2029_v30, %v5653_v13  ;;  %v1731_v51 = vsel %vm1678_vm5, %v1728_v61, %v1730_v52 }
 0x18f   : > { %v1787_v36 = vpop.permute.xlu0 %1786  ;;  %v2169_v33 = vsel %vm2161_vm12, %v2100_v4, %v1394_v10  ;;  %v2167_v9 = vsel %vm2161_vm12, %v2098_v39, %v5690_v20  ;;  %v1699_v50 = vsel %vm1678_vm5, %v1696_v54, %v1698_v45  ;;  %v1119_v20 = vor.u32 %v1118_v44, %v1117_v42  ;;  %v5873_v39 = vld [vmem:[%s4284_s20 + $0xa0] sm:$0xff]  }
 0x190   : > { %1626 = vrot.lane.b32.xlu1 %v1494_v32, %s4183_s7  ;;  %v2339_v62 = vsel %vm2299_vm14, %v2270_v21, %v1787_v36  ;;  %v2238_v15 = vsel %vm2230_vm13, %v2169_v33, %v1617_v12  ;;  %v2236_v13 = vsel %vm2230_vm13, %v2167_v9, %v1615_v27  ;;  %v5814_v14 = vor.u32 %v1122_v58, %v1121_v26  ;;  %v7521_v21 = vld [vmem:[#allocation53_spill] sm:$0xff]  ;;  %v5869_v58 = vld [vmem:[%s4284_s20 + $0x100] sm:$0xff]   ;;  %v5881_v9 = vld [vmem:[%s4284_s20 + $0x78] sm:$0xff]  }
 0x191   : > { %1405 = vrot.lane.b32.xlu0 %v5765_v23, %s4182_s6  ;;  %3865 = vmatmul.mubr.msk.bf16.vlgmr.msra.gmra.mrb[0].mxu1 %vm2381_vm15, %v2339_v62  ;;  %v1054_v61 = vrot.slane %v7513_v37, 2  ;;  %v7518_v46 = vrot.slane %v5552_v18, 3  ;;  %v1120_v35 = vsel %vm1009_vm2, %v5611_v47, %v1119_v20  ;;  %v1057_v29 = vrot.slane %v7514_v1, 1 }
 0x192   : > { %v1755_v63 = vpop.permute.xlu1 %1754  ;;  %v1124_v60 = vsel %vm1009_vm2, %v1119_v20, %v5814_v14  ;;  %v1058_v42 = vrot.slane %v7515_v57, 2  ;;  %v7519_v47 = vrot.slane %v5666_v38, 2  ;;  %v1563_v17 = vrot.slane %v7520_v22, 2 }
 0x193   : > { %v2307_v28 = vsel %vm2299_vm14, %v2238_v15, %v1755_v63  ;;  %v1753_v53 = vpop.permute.xlu0 %1752  ;;  %v1697_v10 = vsel %vm1678_vm5, %v7518_v46, %v1696_v54  ;;  %v1055_v37 = vor.u32 %v1054_v61, %v1053_v24  ;;  %v1564_v36 = vrot.slane %v7521_v21, 3  ;;  %v7524_v46 = vld [vmem:[#allocation21_spill] sm:$0xff] }
 0x194   : > { %1628 = vrot.lane.b32.xlu1 %v1498_v40, %s4183_s7  ;;  %v2305_v5 = vsel %vm2299_vm14, %v2236_v13, %v1753_v53  ;;  %v5838_v40 = vld [vmem:[%s4284_s20 + $0xf8] sm:$0xff]   ;;  %v5858_v57 = vor.u32 %v1058_v42, %v1057_v29  ;;  %v1858_v33 = vsel %vm1816_vm7, %v5873_v39, %v4978_v25  ;;  %v7522_v53 = vld [vmem:[#allocation58_spill] sm:$0xff] }
 0x195   : > { %1798 = vrot.lane.b32.xlu0 %v1731_v51, %s4184_s8  ;;  %3832 = vmatprep.mubr.msk.bf16.mxu0 %vm2381_vm15, %v2305_v5  ;;  %v1056_v18 = vsel %vm1009_vm2, %v5655_v59, %v1055_v37  ;;  %v1290_v54 = vrot.slane %v5838_v40, 2  ;;  %v1565_v30 = vor.u32 %v1564_v36, %v1563_v17  ;;  %v1927_v15 = vsel %vm1885_vm8, %v1858_v33, %v5201_v19  ;;  %v7523_v19 = vld [vmem:[#allocation55_spill] sm:$0xff]  ;;  %v7527_v42 = vld [vmem:[#allocation22_spill] sm:$0xff]  ;;  %v5927_v17 = vld [vmem:[%s4284_s20 + $0xa8] sm:$0xff]  }
 0x196   : > { %v5820_v27 = vpop.permute.xlu1 %1206  ;;  %3833 = vmatmul.mubr.msk.bf16.gmra.mrb[4].mxu0 %vm2381_vm15, %v2307_v28  ;;  %v1060_v62 = vsel %vm1009_vm2, %v1055_v37, %v5858_v57  ;;  %v1996_v13 = vsel %vm1954_vm9, %v1927_v15, %v5467_v48  ;;  %v1568_v20 = vrot.slane %v7523_v19, 3  ;;  %v1732_v61 = vrot.slane %v5838_v40, 3  ;;  %v4050_v15 = vld [vmem:[%s4284_s20 + $0x28] sm:$0xff]  }
 0x197   : > { %v1205_v34 = vpop.permute.xlu0 %1204  ;;  %v5850_v59 = vsel %vm1232_vm3, %v7519_v47, %v1290_v54  ;;  %v1566_v51 = vsel %vm1455_vm6, %v5717_v6, %v1565_v30  ;;  %v1504_v47 = vrot.slane %v7527_v42, 3  ;;  %v1860_v36 = vsel %vm1816_vm7, %v5927_v17, %v4976_v43 }
 0x198   : > { %1766 = vrot.lane.b32.xlu1 %v1699_v50, %s4184_s8  ;;  %v2065_v28 = vsel %vm2023_vm10, %v1996_v13, %v1205_v34  ;;  %v1567_v50 = vrot.slane %v7522_v53, 2  ;;  %v7525_v34 = vld [vmem:[#allocation19_spill] sm:$0xff]  ;;  %v1733_v40 = vsel %vm1678_vm5, %v1730_v52, %v1732_v61  ;;  %v1929_v38 = vsel %vm1885_vm8, %v1860_v36, %v5196_v2 }
 0x199   : > { %1764 = vrot.lane.b32.xlu0 %v1697_v10, %s4184_s8  ;;  %v1499_v10 = vrot.slane %v7524_v46, 2  ;;  %v1998_v43 = vsel %vm1954_vm9, %v1929_v38, %v5463_v31 }
 0x19a   : > { %v5830_v32 = vpop.permute.xlu1 %1172 }
 0x19b   : > { %v1343_v12 = vpop.permute.xlu0 %1342 }
 0x19c   : > { %1218 = vrot.lane.b32.xlu1 %v1124_v60, %s4180_s4  ;;  %v2134_v6 = vsel %vm2092_vm11, %v2065_v28, %v1343_v12  ;;  %v1500_v60 = vrot.slane %v7525_v34, 3 }
 0x19d   : > { %1216 = vrot.lane.b32.xlu0 %v1120_v35, %s4180_s4 }
 0x19e   : > { %v1428_v55 = vpop.permute.xlu1 %1427 }
 0x19f   : > { %v5844_v44 = vpop.permute.xlu0 %1344  ;;  %v2203_v24 = vsel %vm2161_vm12, %v2134_v6, %v1428_v55  ;;  %v7526_v55 = vld [vmem:[#allocation29_spill] sm:$0xff] }
 0x1a0   : > { %1184 = vrot.lane.b32.xlu1 %v1056_v18, %s4180_s4  ;;  %v1503_v29 = vrot.slane %v7526_v55, 2 }
 0x1a1   : > { %1354 = vrot.lane.b32.xlu0 %v5647_v11, %s4181_s5  ;;  %v1292_v11 = vrot.slane %v5869_v58, 2 }
 0x1a2   : > { %v5856_v1 = vpop.permute.xlu1 %1310  ;;  %v5955_v6 = vor.u32 %v1504_v47, %v1503_v29 }
 0x1a3   : > { %v5860_v26 = vpop.permute.xlu0 %1174 }
 0x1a4   : > { %1439 = vrot.lane.b32.xlu1 %v5850_v59, %s4182_s6 }
 0x1a5   : > { %1356 = vrot.lane.b32.xlu0 %v5696_v49, %s4181_s5  ;;  %v1258_v49 = vrot.slane %v5881_v9, 2 }
 0x1a6   : > { %v1651_v4 = vpop.permute.xlu1 %1650 }
 0x1a7   : > { %v1430_v63 = vpop.permute.xlu0 %1429  ;;  %v5906_v48 = vsel %vm1232_vm3, %v1256_v16, %v1258_v49  ;;  %v2272_v37 = vsel %vm2230_vm13, %v2203_v24, %v1651_v4  ;;  %v5916_v16 = vor.u32 %v1568_v20, %v1567_v50  ;;  %v7529_v50 = vld [vmem:[#allocation62_spill] sm:$0xff] }
 0x1a8   : > { %1322 = vrot.lane.b32.xlu1 %v5705_v7, %s4181_s5  ;;  %v5897_v7 = vsel %vm1232_vm3, %v1290_v54, %v1292_v11  ;;  %v1501_v54 = vor.u32 %v1500_v60, %v1499_v10  ;;  %v7530_v10 = vld [vmem:[#allocation91_spill] sm:$0xff] }
 0x1a9   : > { %1186 = vrot.lane.b32.xlu0 %v1060_v62, %s4180_s4  ;;  %v1570_v52 = vsel %vm1455_vm6, %v1565_v30, %v5916_v16  ;;  %v5939_v62 = vld [vmem:[%s4284_s20 + $0x80] sm:$0xff]   ;;  %v2067_v30 = vsel %vm2023_vm10, %v1998_v43, %v5820_v27 }
 0x1aa   : > { %v5891_v25 = vpop.permute.xlu1 %1395  ;;  %v1260_v33 = vrot.slane %v5939_v62, 2  ;;  %v1502_v20 = vsel %vm1455_vm6, %v5739_v0, %v1501_v54  ;;  %v2136_v60 = vsel %vm2092_vm11, %v2067_v30, %v5844_v44  ;;  %v1061_v30 = vrot.slane %v7524_v46, 1 }
 0x1ab   : > { %v1313_v5 = vpop.permute.xlu0 %1312 }
 0x1ac   : > { %1662 = vrot.lane.b32.xlu1 %v1566_v51, %s4183_s7  ;;  %v7528_v51 = vld [vmem:[#allocation61_spill] sm:$0xff]  ;;  %v5970_v0 = vsel %vm1232_vm3, %v1258_v49, %v1260_v33 }
 0x1ad   : > { %1441 = vrot.lane.b32.xlu0 %v5897_v7, %s4182_s6  ;;  %v1828_v13 = vsel %vm1816_vm7, %v4050_v15, %v7528_v51  ;;  %v1700_v51 = vrot.slane %v5881_v9, 3 }
 0x1ae   : > { %v1789_v35 = vpop.permute.xlu1 %1788  ;;  %v1897_v24 = vsel %vm1885_vm8, %v1828_v13, %v5064_v8  ;;  %v1734_v8 = vrot.slane %v5869_v58, 3  ;;  %v7551_v58 = vld [vmem:[#allocation110_spill] sm:$0xff] }
 0x1af   : > { %v2341_v12 = vsel %vm2299_vm14, %v2272_v37, %v1789_v35  ;;  %v1653_v18 = vpop.permute.xlu0 %1652  ;;  %v7531_v35 = vld [vmem:[#allocation43_spill] sm:$0xff] }
 0x1b0   : > { %1407 = vrot.lane.b32.xlu1 %v5906_v48, %s4182_s6  ;;  %3868 = vmatprep.mubr.msk.bf16.mxu1 %vm2381_vm15, %v2341_v12  ;;  %v1966_v27 = vsel %vm1954_vm9, %v1897_v24, %v7531_v35  ;;  %v2205_v12 = vsel %vm2161_vm12, %v2136_v60, %v1430_v63 }
 0x1b1   : > { %1324 = vrot.lane.b32.xlu0 %v5765_v23, %s4181_s5  ;;  %v4051_v23 = vld [vmem:[%s4284_s20 + $0x20] sm:$0xff]   ;;  %v2035_v44 = vsel %vm2023_vm10, %v1966_v27, %v5860_v26  ;;  %v2274_v47 = vsel %vm2230_vm13, %v2205_v12, %v1653_v18  ;;  %v6040_v27 = vld [vmem:[%s4284_s20 + $0x108] sm:$0xff]  }
 0x1b2   : > { %v1619_v4 = vpop.permute.xlu1 %1618  ;;  %v1826_v2 = vsel %vm1816_vm7, %v4051_v23, %v7529_v50  ;;  %v2104_v38 = vsel %vm2092_vm11, %v2035_v44, %v1313_v5  ;;  %v1129_v50 = vrot.slane %v7522_v53, 1  ;;  %v1294_v12 = vrot.slane %v6040_v27, 2  ;;  %v259_v44 = vld [vmem:[%s4284_s20 + $0x114] sm:$0xf] }
 0x1b3   : > { %v1398_v28 = vpop.permute.xlu0 %1397  ;;  %v1895_v31 = vsel %vm1885_vm8, %v1826_v2, %v7530_v10  ;;  %v1130_v2 = vrot.slane %v7523_v19, 2  ;;  %v7534_v10 = vld [vmem:[#allocation63_spill] sm:$0xff] }
 0x1b4   : > { %1800 = vrot.lane.b32.xlu1 %v1733_v40, %s4184_s8  ;;  %v7532_v40 = vld [vmem:[#allocation41_spill] sm:$0xff]  ;;  %v2173_v26 = vsel %vm2161_vm12, %v2104_v38, %v1398_v28  ;;  %v1125_v28 = vrot.slane %v7520_v22, 1  ;;  %v1701_v22 = vsel %vm1678_vm5, %v1698_v45, %v1700_v51  ;;  %v7536_v38 = vld [vmem:[#allocation56_spill] sm:$0xff] }
 0x1b5   : > { %1664 = vrot.lane.b32.xlu0 %v1570_v52, %s4183_s7  ;;  %v1964_v29 = vsel %vm1954_vm9, %v1895_v31, %v7532_v40  ;;  %v1506_v52 = vsel %vm1455_vm6, %v1501_v54, %v5955_v6  ;;  %v1735_v54 = vsel %vm1678_vm5, %v1732_v61, %v1734_v8  ;;  %v1702_v61 = vrot.slane %v5939_v62, 3 }
 0x1b6   : > { %v1621_v37 = vpop.permute.xlu1 %1620  ;;  %v2033_v63 = vsel %vm2023_vm10, %v1964_v29, %v5830_v32  ;;  %v6017_v19 = vor.u32 %v1130_v2, %v1129_v50  ;;  %v1065_v29 = vrot.slane %v7526_v55, 1 }
 0x1b7   : > { %v1791_v36 = vpop.permute.xlu0 %1790  ;;  %v2102_v15 = vsel %vm2092_vm11, %v2033_v63, %v5856_v1  ;;  %v2242_v5 = vsel %vm2230_vm13, %v2173_v26, %v1621_v37  ;;  %v1703_v41 = vsel %vm1678_vm5, %v1700_v51, %v1702_v61  ;;  %v4054_v26 = vld [vmem:[%s4284_s20 + $0xb0] sm:$0xff]  }
 0x1b8   : > { %1630 = vrot.lane.b32.xlu1 %v1502_v20, %s4183_s7  ;;  %v2343_v49 = vsel %vm2299_vm14, %v2274_v47, %v1791_v36  ;;  %v2171_v32 = vsel %vm2161_vm12, %v2102_v15, %v5891_v25  ;;  %v1126_v25 = vrot.slane %v7521_v21, 2  ;;  %v7533_v21 = vld [vmem:[#allocation66_spill] sm:$0xff]  ;;  %v1062_v20 = vrot.slane %v7525_v34, 2  ;;  %v7535_v36 = vld [vmem:[#allocation57_spill] sm:$0xff] }
 0x1b9   : > { %1409 = vrot.lane.b32.xlu0 %v5970_v0, %s4182_s6  ;;  %3869 = vmatmul.mubr.msk.bf16.gmra.mrb[4].mxu1 %vm2381_vm15, %v2343_v49  ;;  %v2240_v1 = vsel %vm2230_vm13, %v2171_v32, %v1619_v4  ;;  %v1571_v63 = vrot.slane %v7535_v36, 2  ;;  %v1572_v49 = vrot.slane %v7536_v38, 3 }
 0x1ba   : > { %v1759_v18 = vpop.permute.xlu1 %1758  ;;  %v1127_v53 = vor.u32 %v1126_v25, %v1125_v28  ;;  %v1063_v60 = vor.u32 %v1062_v20, %v1061_v30 }
 0x1bb   : > { %v2311_v13 = vsel %vm2299_vm14, %v2242_v5, %v1759_v18  ;;  %v1757_v43 = vpop.permute.xlu0 %1756  ;;  %v7537_v18 = vld [vmem:[#allocation80_spill] sm:$0xff]  ;;  %v1573_v51 = vor.u32 %v1572_v49, %v1571_v63 }
 0x1bc   : > { %1632 = vrot.lane.b32.xlu1 %v1506_v52, %s4183_s7  ;;  %v2309_v23 = vsel %vm2299_vm14, %v2240_v1, %v1757_v43  ;;  %v1132_v31 = vsel %vm1009_vm2, %v1127_v53, %v6017_v19  ;;  %v1128_v34 = vsel %vm1009_vm2, %v5814_v14, %v1127_v53  ;;  %v1064_v35 = vsel %vm1009_vm2, %v5858_v57, %v1063_v60  ;;  %v6092_v53 = vld [vmem:[%s4284_s20 + $0x88] sm:$0xff]   ;;  %v7543_v49 = vld [vmem:[#allocation104_spill] sm:$0xff] }
 0x1bd   : > { %1802 = vrot.lane.b32.xlu0 %v1735_v54, %s4184_s8  ;;  %3836 = vmatprep.mubr.msk.bf16.mxu0 %vm2381_vm15, %v2309_v23  ;;  %v1066_v14 = vrot.slane %v7527_v42, 2  ;;  %v6055_v57 = vsel %vm1232_vm3, %v1292_v11, %v1294_v12  ;;  %v4053_v42 = vld [vmem:[%s4284_s20 + $0x110] sm:$0xf]  ;;  %v1862_v32 = vsel %vm1816_vm7, %v4054_v26, %v7537_v18  ;;  %v4057_v26 = vld [vmem:[%s4284_s20 + $0x38] sm:$0xff]   ;;  %v7544_v18 = vld [vmem:[#allocation65_spill] sm:$0xff] }
 0x1be   : > { %v6008_v9 = vpop.permute.xlu1 %1210  ;;  %3837 = vmatmul.mubr.msk.bf16.gmra.mrb[8].mxu0 %vm2381_vm15, %v2311_v13  ;;  %v6064_v15 = vcombine.low %v4053_v42, %v259_v44  ;;  %v7538_v11 = vld [vmem:[#allocation46_spill] sm:$0xff] }
 0x1bf   : > { %v1209_v4 = vpop.permute.xlu0 %1208  ;;  %v6061_v52 = vor.u32 %v1066_v14, %v1065_v29  ;;  %v1931_v54 = vsel %vm1885_vm8, %v1862_v32, %v7538_v11  ;;  %v4056_v29 = vld [vmem:[%s4284_s20 + $0xb8] sm:$0xff]   ;;  %v4058_v32 = vld [vmem:[%s4284_s20 + $0x30] sm:$0xff]  }
 0x1c0   : > { %997 = vrot.lane.b32.xlu1 %v7533_v21, %s4178_s27  ;;  %v1296_v23 = vrot.slane %v6064_v15, 2  ;;  %v1138_v25 = vshrl.u32 %v6064_v15, 16  ;;  %v1141_v50 = vshll.u32 %v6064_v15, 16  ;;  %v1574_v21 = vsel %vm1455_vm6, %v5916_v16, %v1573_v51  ;;  %v7542_v14 = vld [vmem:[#allocation79_spill] sm:$0xff] }
 0x1c1   : > { %1768 = vrot.lane.b32.xlu0 %v1701_v22, %s4184_s8  ;;  %v1068_v43 = vsel %vm1009_vm2, %v1063_v60, %v6061_v52  ;;  %v1864_v44 = vsel %vm1816_vm7, %v4056_v29, %v7542_v14  ;;  %v7545_v11 = vld [vmem:[#allocation67_spill] sm:$0xff] }
 0x1c2   : > { %v6022_v24 = vpop.permute.xlu1 %1176  ;;  %v1575_v16 = vrot.slane %v1138_v25, 2 }
 0x1c3   : > { %v1347_v45 = vpop.permute.xlu0 %1346 }
 0x1c4   : > { %999 = vrot.lane.b32.xlu1 %v7534_v10, %s4178_s27 }
 0x1c5   : > { %1770 = vrot.lane.b32.xlu0 %v1703_v41, %s4184_s8 }
 0x1c6   : > { %v1432_v46 = vpop.permute.xlu1 %1431 }
 0x1c7   : > { %v6034_v37 = vpop.permute.xlu0 %1348 }
 0x1c8   : > { %1222 = vrot.lane.b32.xlu1 %v1132_v31, %s4180_s4  ;;  %v7540_v31 = vld [vmem:[#allocation25_spill] sm:$0xff] }
 0x1c9   : > { %1220 = vrot.lane.b32.xlu0 %v1128_v34, %s4180_s4  ;;  %v1507_v60 = vrot.slane %v7540_v31, 2 }
 0x1ca   : > { %v6044_v40 = vpop.permute.xlu1 %1314 }
 0x1cb   : > { %v6049_v47 = vpop.permute.xlu0 %1178 }
 0x1cc   : > { %1188 = vrot.lane.b32.xlu1 %v1064_v35, %s4180_s4 }
 0x1cd   : > { %1358 = vrot.lane.b32.xlu0 %v5850_v59, %s4181_s5  ;;  %v7539_v59 = vld [vmem:[#allocation117_spill] sm:$0xff] }
 0x1ce   : > { %v1655_v55 = vpop.permute.xlu1 %1654  ;;  %v2000_v1 = vsel %vm1954_vm9, %v1931_v54, %v7539_v59  ;;  %v7546_v54 = vld [vmem:[#allocation116_spill] sm:$0xff] }
 0x1cf   : > { %v1434_v5 = vpop.permute.xlu0 %1433  ;;  %v2069_v28 = vsel %vm2023_vm10, %v2000_v1, %v1209_v4  ;;  %v1262_v4 = vrot.slane %v6092_v53, 2 }
 0x1d0   : > { %1443 = vrot.lane.b32.xlu1 %v6055_v57, %s4182_s6  ;;  %v2138_v2 = vsel %vm2092_vm11, %v2069_v28, %v1347_v45  ;;  %v1576_v45 = vrot.slane %v1141_v50, 3 }
 0x1d1   : > { %1360 = vrot.lane.b32.xlu0 %v5897_v7, %s4181_s5  ;;  %v2207_v7 = vsel %vm2161_vm12, %v2138_v2, %v1432_v46  ;;  %v7541_v46 = vld [vmem:[#allocation23_spill] sm:$0xff]  ;;  %v6114_v35 = vsel %vm1232_vm3, %v1260_v33, %v1262_v4  ;;  %v1832_v33 = vsel %vm1816_vm7, %v4057_v26, %v7544_v18 }
 0x1d2   : > { %v6077_v13 = vpop.permute.xlu1 %1399  ;;  %v2276_v30 = vsel %vm2230_vm13, %v2207_v7, %v1655_v55  ;;  %v1508_v34 = vrot.slane %v7541_v46, 3  ;;  %v1933_v55 = vsel %vm1885_vm8, %v1864_v44, %v7543_v49  ;;  %v6124_v42 = vor.u32 %v1576_v45, %v1575_v16  ;;  %v7547_v7 = vld [vmem:[#allocation34_spill] sm:$0xff]  ;;  %v7550_v45 = vld [vmem:[#allocation93_spill] sm:$0xff]  ;;  %v7552_v49 = vld [vmem:[#allocation111_spill] sm:$0xff] }
 0x1d3   : > { %v1317_v22 = vpop.permute.xlu0 %1316  ;;  %v2002_v59 = vsel %vm1954_vm9, %v1933_v55, %v7546_v54  ;;  %v1264_v44 = vrot.slane %v5670_v56, 2  ;;  %v1070_v62 = vrot.slane %v7541_v46, 2 }
 0x1d4   : > { %1326 = vrot.lane.b32.xlu1 %v5906_v48, %s4181_s5  ;;  %v6101_v48 = vsel %vm1232_vm3, %v1294_v12, %v1296_v23  ;;  %v1736_v12 = vrot.slane %v6040_v27, 3  ;;  %v1830_v27 = vsel %vm1816_vm7, %v4058_v32, %v7545_v11  ;;  %v2071_v28 = vsel %vm2023_vm10, %v2002_v59, %v6008_v9 }
 0x1d5   : > { %1190 = vrot.lane.b32.xlu0 %v1068_v43, %s4180_s4  ;;  %v1509_v43 = vor.u32 %v1508_v34, %v1507_v60  ;;  %v1899_v29 = vsel %vm1885_vm8, %v1830_v27, %v7550_v45  ;;  %v2140_v60 = vsel %vm2092_vm11, %v2071_v28, %v6034_v37  ;;  %v1578_v14 = vsel %vm1455_vm6, %v1573_v51, %v6124_v42 }
 0x1d6   : > { %v1793_v20 = vpop.permute.xlu1 %1792  ;;  %v1737_v2 = vsel %vm1678_vm5, %v1734_v8, %v1736_v12  ;;  %v2209_v34 = vsel %vm2161_vm12, %v2140_v60, %v1434_v5  ;;  %v1968_v55 = vsel %vm1954_vm9, %v1899_v29, %v7552_v49  ;;  %v1738_v27 = vrot.slane %v6064_v15, 3  ;;  %v6236_v49 = vld [vmem:[%s4284_s20 + $0x118] sm:$0xff]  }
 0x1d7   : > { %v2345_v41 = vsel %vm2299_vm14, %v2276_v30, %v1793_v20  ;;  %v1657_v10 = vpop.permute.xlu0 %1656  ;;  %v7548_v30 = vld [vmem:[#allocation26_spill] sm:$0xff]  ;;  %v1510_v18 = vsel %vm1455_vm6, %v5955_v6, %v1509_v43  ;;  %v2037_v5 = vsel %vm2023_vm10, %v1968_v55, %v6022_v24  ;;  %v1704_v28 = vrot.slane %v6092_v53, 3 }
 0x1d8   : > { %1666 = vrot.lane.b32.xlu1 %v1574_v21, %s4183_s7  ;;  %3872 = vmatprep.mubr.msk.bf16.mxu1 %vm2381_vm15, %v2345_v41  ;;  %v1511_v21 = vrot.slane %v7547_v7, 2  ;;  %v1512_v20 = vrot.slane %v7548_v30, 3  ;;  %v7549_v41 = vld [vmem:[#allocation92_spill] sm:$0xff]  ;;  %v2278_v26 = vsel %vm2230_vm13, %v2209_v34, %v1657_v10  ;;  %v1706_v45 = vrot.slane %v5670_v56, 3 }
 0x1d9   : > { %1445 = vrot.lane.b32.xlu0 %v6101_v48, %s4182_s6  ;;  %v1901_v16 = vsel %vm1885_vm8, %v1832_v33, %v7549_v41  ;;  %v1140_v41 = vrot.slane %v1138_v25, 1  ;;  %v1705_v53 = vsel %vm1678_vm5, %v1702_v61, %v1704_v28  ;;  %v7554_v25 = vld [vmem:[#allocation64_spill] sm:$0xff] }
 0x1da   : > { %v1623_v63 = vpop.permute.xlu1 %1622  ;;  %v1970_v8 = vsel %vm1954_vm9, %v1901_v16, %v7551_v58  ;;  %v6169_v32 = vor.u32 %v1512_v20, %v1511_v21  ;;  %v1133_v21 = vrot.slane %v7535_v36, 1  ;;  %v1134_v20 = vrot.slane %v7536_v38, 2  ;;  %v7553_v38 = vld [vmem:[#allocation69_spill] sm:$0xff] }
 0x1db   : > { %v1402_v1 = vpop.permute.xlu0 %1401  ;;  %v2039_v37 = vsel %vm2023_vm10, %v1970_v8, %v6049_v47  ;;  %v2106_v47 = vsel %vm2092_vm11, %v2037_v5, %v6044_v40  ;;  %v1143_v16 = vrot.slane %v1141_v50, 2  ;;  %v1707_v58 = vsel %vm1678_vm5, %v1704_v28, %v1706_v45 }
 0x1dc   : > { %1411 = vrot.lane.b32.xlu1 %v6114_v35, %s4182_s6  ;;  %v2108_v51 = vsel %vm2092_vm11, %v2039_v37, %v1317_v22  ;;  %v2175_v6 = vsel %vm2161_vm12, %v2106_v47, %v6077_v13  ;;  %v6182_v22 = vsel %vm1232_vm3, %v1262_v4, %v1264_v44  ;;  %v1514_v13 = vsel %vm1455_vm6, %v1509_v43, %v6169_v32  ;;  %v7555_v47 = vld [vmem:[#allocation82_spill] sm:$0xff] }
 0x1dd   : > { %1328 = vrot.lane.b32.xlu0 %v5970_v0, %s4181_s5  ;;  %v2177_v10 = vsel %vm2161_vm12, %v2108_v51, %v1402_v1  ;;  %v2244_v40 = vsel %vm2230_vm13, %v2175_v6, %v1623_v63  ;;  %v1739_v63 = vsel %vm1678_vm5, %v1736_v12, %v1738_v27  ;;  %v935_v43 = vrot.slane %v6064_v15, 1  ;;  %v263_v6 = vld [vmem:[%s4284_s20 + $0x124] sm:$0xf] }
 0x1de   : > { %v1625_v9 = vpop.permute.xlu1 %1624  ;;  %v1135_v29 = vor.u32 %v1134_v20, %v1133_v21  ;;  %v6222_v60 = vor.u32 %v1143_v16, %v1140_v41  ;;  %v1074_v51 = vrot.slane %v7548_v30, 2  ;;  %v1710_v15 = vrot.slane %v5873_v39, 3 }
 0x1df   : > { %v1795_v0 = vpop.permute.xlu0 %1794  ;;  %v2246_v24 = vsel %vm2230_vm13, %v2177_v10, %v1625_v9  ;;  %v936_v50 = vsel %vm786_vm1, %v7554_v25, %v935_v43  ;;  %v1069_v9 = vrot.slane %v7540_v31, 1 }
 0x1e0   : > { %1804 = vrot.lane.b32.xlu1 %v1737_v2, %s4184_s8  ;;  %v2347_v33 = vsel %vm2299_vm14, %v2278_v26, %v1795_v0  ;;  %v1145_v34 = vsel %vm1009_vm2, %v1135_v29, %v6222_v60  ;;  %v1136_v46 = vsel %vm1009_vm2, %v6017_v19, %v1135_v29  ;;  %v6249_v26 = vrot.slane %v6236_v49, 2 }
 0x1e1   : > { %1668 = vrot.lane.b32.xlu0 %v1578_v14, %s4183_s7  ;;  %3873 = vmatmul.mubr.msk.bf16.gmra.mrb[8].mxu1 %vm2381_vm15, %v2347_v33  ;;  %v1071_v14 = vor.u32 %v1070_v62, %v1069_v9  ;;  %v1147_v0 = vshrl.u32 %v6236_v49, 16  ;;  %v1073_v19 = vrot.slane %v7547_v7, 1  ;;  %v4059_v33 = vld [vmem:[%s4284_s20 + $0xc0] sm:$0xff]   ;;  %v7558_v9 = vld [vmem:[#allocation81_spill] sm:$0xff] }
 0x1e2   : > { %v1763_v11 = vpop.permute.xlu1 %1762  ;;  %v1866_v10 = vsel %vm1816_vm7, %v4059_v33, %v7555_v47  ;;  %v6270_v7 = vsel %vm1232_vm3, %v1296_v23, %v6249_v26  ;;  %v7561_v47 = vld [vmem:[#allocation48_spill] sm:$0xff] }
 0x1e3   : > { %v2315_v54 = vsel %vm2299_vm14, %v2246_v24, %v1763_v11  ;;  %v1761_v59 = vpop.permute.xlu0 %1760  ;;  %v1072_v37 = vsel %vm1009_vm2, %v6061_v52, %v1071_v14  ;;  %v6261_v52 = vld [vmem:[%s4284_s20 + $0x120] sm:$0xf]  ;;  %v7556_v24 = vld [vmem:[#allocation6_spill] sm:$0xff]  ;;  %v1579_v30 = vrot.slane %v1147_v0, 2 }
 0x1e4   : > { %1634 = vrot.lane.b32.xlu1 %v1510_v18, %s4183_s7  ;;  %v2313_v1 = vsel %vm2299_vm14, %v2244_v40, %v1761_v59  ;;  %v1150_v18 = vshll.u32 %v6236_v49, 16  ;;  %v1935_v40 = vsel %vm1885_vm8, %v1866_v10, %v7556_v24  ;;  %v7557_v59 = vld [vmem:[#allocation45_spill] sm:$0xff]  ;;  %v6286_v23 = vcombine.low %v6261_v52, %v263_v6  ;;  %v7562_v24 = vld [vmem:[#allocation31_spill] sm:$0xff] }
 0x1e5   : > { %1413 = vrot.lane.b32.xlu0 %v6182_v22, %s4182_s6  ;;  %3840 = vmatprep.mubr.msk.bf16.mxu0 %vm2381_vm15, %v2313_v1  ;;  %v2004_v1 = vsel %vm1954_vm9, %v1935_v40, %v7557_v59  ;;  %v1515_v40 = vrot.slane %v7562_v24, 2  ;;  %v4062_v59 = vld [vmem:[%s4284_s20 + $0x40] sm:$0xff]  }
 0x1e6   : > { %v6194_v4 = vpop.permute.xlu1 %1214  ;;  %3841 = vmatmul.mubr.msk.bf16.gmra.mrb[12].mxu0 %vm2381_vm15, %v2315_v54  ;;  %v1580_v54 = vrot.slane %v1150_v18, 3  ;;  %v1584_v25 = vshrl.u32 %v6286_v23, 16 }
 0x1e7   : > { %v1213_v2 = vpop.permute.xlu0 %1212 }
 0x1e8   : > { %1636 = vrot.lane.b32.xlu1 %v1514_v13, %s4183_s7  ;;  %v2073_v28 = vsel %vm2023_vm10, %v2004_v1, %v1213_v2  ;;  %v1581_v16 = vor.u32 %v1580_v54, %v1579_v30  ;;  %v7563_v30 = vld [vmem:[#allocation28_spill] sm:$0xff]  ;;  %v7564_v1 = vld [vmem:[#allocation70_spill] sm:$0xff] }
 0x1e9   : > { %1806 = vrot.lane.b32.xlu0 %v1739_v63, %s4184_s8  ;;  %v6282_v63 = vor.u32 %v1074_v51, %v1073_v19  ;;  %v4061_v51 = vld [vmem:[%s4284_s20 + $0x48] sm:$0xff]   ;;  %v1516_v54 = vrot.slane %v7563_v30, 3 }
 0x1ea   : > { %v6210_v12 = vpop.permute.xlu1 %1180 }
 0x1eb   : > { %v1351_v36 = vpop.permute.xlu0 %1350  ;;  %v1076_v2 = vsel %vm1009_vm2, %v1071_v14, %v6282_v63 }
 0x1ec   : > { %1001 = vrot.lane.b32.xlu1 %v7553_v38, %s4178_s27  ;;  %v2142_v21 = vsel %vm2092_vm11, %v2073_v28, %v1351_v36  ;;  %v1381_v36 = vrot.slane %v6286_v23, 2  ;;  %v1834_v28 = vsel %vm1816_vm7, %v4062_v59, %v7564_v1 }
 0x1ed   : > { %1772 = vrot.lane.b32.xlu0 %v1705_v53, %s4184_s8 }
 0x1ee   : > { %v1436_v61 = vpop.permute.xlu1 %1435 }
 0x1ef   : > { %v6230_v8 = vpop.permute.xlu0 %1352  ;;  %v2211_v41 = vsel %vm2161_vm12, %v2142_v21, %v1436_v61  ;;  %v1582_v61 = vsel %vm1455_vm6, %v6124_v42, %v1581_v16  ;;  %v7560_v42 = vld [vmem:[#allocation68_spill] sm:$0xff]  ;;  %v7565_v21 = vld [vmem:[#allocation94_spill] sm:$0xff] }
 0x1f0   : > { %1003 = vrot.lane.b32.xlu1 %v936_v50, %s4178_s27  ;;  %v1587_v50 = vshll.u32 %v6286_v23, 16  ;;  %v1836_v33 = vsel %vm1816_vm7, %v4061_v51, %v7560_v42  ;;  %v1517_v51 = vor.u32 %v1516_v54, %v1515_v40  ;;  %v7569_v42 = vld [vmem:[#allocation38_spill] sm:$0xff] }
 0x1f1   : > { %1774 = vrot.lane.b32.xlu0 %v1707_v58, %s4184_s8  ;;  %v1266_v58 = vrot.slane %v5732_v3, 2 }
 0x1f2   : > { %v6239_v31 = vpop.permute.xlu1 %1318  ;;  %v1589_v19 = vrot.slane %v1587_v50, 3 }
 0x1f3   : > { %v6243_v55 = vpop.permute.xlu0 %1182 }
 0x1f4   : > { %1226 = vrot.lane.b32.xlu1 %v1145_v34, %s4180_s4  ;;  %v7559_v34 = vld [vmem:[#allocation39_spill] sm:$0xff] }
 0x1f5   : > { %1224 = vrot.lane.b32.xlu0 %v1136_v46, %s4180_s4 }
 0x1f6   : > { %v1659_v5 = vpop.permute.xlu1 %1658 }
 0x1f7   : > { %v1438_v11 = vpop.permute.xlu0 %1437 }
 0x1f8   : > { %1192 = vrot.lane.b32.xlu1 %v1072_v37, %s4180_s4  ;;  %v1740_v37 = vrot.slane %v6236_v49, 3 }
 0x1f9   : > { %1362 = vrot.lane.b32.xlu0 %v6055_v57, %s4181_s5  ;;  %v2280_v57 = vsel %vm2230_vm13, %v2211_v41, %v1659_v5  ;;  %v1586_v5 = vrot.slane %v1584_v25, 2  ;;  %v1905_v41 = vsel %vm1885_vm8, %v1836_v33, %v7565_v21  ;;  %v7567_v25 = vld [vmem:[#allocation112_spill] sm:$0xff] }
 0x1fa   : > { %v6280_v13 = vpop.permute.xlu1 %1403  ;;  %v1974_v50 = vsel %vm1954_vm9, %v1905_v41, %v7567_v25 }
 0x1fb   : > { %v1321_v20 = vpop.permute.xlu0 %1320 }
 0x1fc   : > { %1447 = vrot.lane.b32.xlu1 %v6270_v7, %s4182_s6 }
 0x1fd   : > { %1364 = vrot.lane.b32.xlu0 %v6101_v48, %s4181_s5  ;;  %v4060_v48 = vld [vmem:[%s4284_s20 + $0xc8] sm:$0xff]  }
 0x1fe   : > { %v1797_v53 = vpop.permute.xlu1 %1796  ;;  %v1868_v62 = vsel %vm1816_vm7, %v4060_v48, %v7558_v9 }
 0x1ff   : > { %v2349_v38 = vsel %vm2299_vm14, %v2280_v57, %v1797_v53  ;;  %v1661_v29 = vpop.permute.xlu0 %1660  ;;  %v1937_v14 = vsel %vm1885_vm8, %v1868_v62, %v7559_v34  ;;  %v6336_v53 = vsel %vm1232_vm3, %v1264_v44, %v1266_v58  ;;  %v7568_v62 = vld [vmem:[#allocation50_spill] sm:$0xff]  ;;  %v1741_v44 = vsel %vm1678_vm5, %v1738_v27, %v1740_v37 }
 0x200   : > { %1330 = vrot.lane.b32.xlu1 %v6114_v35, %s4181_s5  ;;  %3876 = vmatprep.mubr.msk.bf16.mxu1 %vm2381_vm15, %v2349_v38  ;;  %v1382_v35 = vsel %vm1232_vm3, %v6249_v26, %v1381_v36  ;;  %v2006_v10 = vsel %vm1954_vm9, %v1937_v14, %v7561_v47  ;;  %v6353_v34 = vor.u32 %v1589_v19, %v1586_v5  ;;  %v7570_v5 = vld [vmem:[#allocation30_spill] sm:$0xff] }
 0x201   : > { %1194 = vrot.lane.b32.xlu0 %v1076_v2, %s4180_s4  ;;  %v2075_v57 = vsel %vm2023_vm10, %v2006_v10, %v6194_v4  ;;  %v7566_v2 = vld [vmem:[#allocation95_spill] sm:$0xff]  ;;  %v2043_v14 = vsel %vm2023_vm10, %v1974_v50, %v6243_v55  ;;  %v1520_v19 = vrot.slane %v7570_v5, 3  ;;  %v1708_v50 = vrot.slane %v5732_v3, 3 }
 0x202   : > { %v1627_v46 = vpop.permute.xlu1 %1626  ;;  %v1903_v38 = vsel %vm1885_vm8, %v1834_v28, %v7566_v2  ;;  %v2144_v48 = vsel %vm2092_vm11, %v2075_v57, %v6230_v8  ;;  %v2112_v47 = vsel %vm2092_vm11, %v2043_v14, %v1321_v20  ;;  %v1591_v40 = vsel %vm1455_vm6, %v1581_v16, %v6353_v34 }
 0x203   : > { %v1406_v6 = vpop.permute.xlu0 %1405  ;;  %v1972_v4 = vsel %vm1954_vm9, %v1903_v38, %v7568_v62 }
 0x204   : > { %1670 = vrot.lane.b32.xlu1 %v1582_v61, %s4183_s7  ;;  %v2213_v61 = vsel %vm2161_vm12, %v2144_v48, %v1438_v11  ;;  %v1519_v11 = vrot.slane %v7569_v42, 2  ;;  %v2041_v33 = vsel %vm2023_vm10, %v1972_v4, %v6210_v12  ;;  %v1149_v4 = vrot.slane %v1147_v0, 1 }
 0x205   : > { %1449 = vrot.lane.b32.xlu0 %v1382_v35, %s4182_s6  ;;  %v2282_v8 = vsel %vm2230_vm13, %v2213_v61, %v1661_v29  ;;  %v2110_v55 = vsel %vm2092_vm11, %v2041_v33, %v6239_v31  ;;  %v2181_v29 = vsel %vm2161_vm12, %v2112_v47, %v1406_v6  ;;  %v1518_v6 = vsel %vm1455_vm6, %v6169_v32, %v1517_v51  ;;  %v6447_v33 = vld [vmem:[%s4284_s20 + $0x128] sm:$0xff]   ;;  %v7573_v47 = vld [vmem:[#allocation84_spill] sm:$0xff] }
 0x206   : > { %v1629_v9 = vpop.permute.xlu1 %1628  ;;  %v2179_v12 = vsel %vm2161_vm12, %v2110_v55, %v6280_v13  ;;  %v6383_v1 = vor.u32 %v1520_v19, %v1519_v11  ;;  %v6387_v13 = vcombine.low %v6261_v52, %v6261_v52  ;;  %v1742_v32 = vrot.slane %v6286_v23, 3  ;;  %v7574_v19 = vld [vmem:[#allocation11_spill] sm:$0xff] }
 0x207   : > { %v1799_v35 = vpop.permute.xlu0 %1798  ;;  %v2250_v20 = vsel %vm2230_vm13, %v2181_v29, %v1629_v9  ;;  %v2248_v54 = vsel %vm2230_vm13, %v2179_v12, %v1627_v46  ;;  %v7571_v46 = vld [vmem:[#allocation27_spill] sm:$0xff]  ;;  %v937_v52 = vrot.slane %v6236_v49, 1  ;;  %v1152_v61 = vrot.slane %v1150_v18, 2 }
 0x208   : > { %1415 = vrot.lane.b32.xlu1 %v6336_v53, %s4182_s6  ;;  %v2351_v27 = vsel %vm2299_vm14, %v2282_v8, %v1799_v35  ;;  %v7572_v28 = vrot.slane %v7571_v46, 2  ;;  %v1522_v57 = vsel %vm1455_vm6, %v1517_v51, %v6383_v1  ;;  %v1156_v2 = vshrl.u32 %v6387_v13, 16 }
 0x209   : > { %1332 = vrot.lane.b32.xlu0 %v6182_v22, %s4181_s5  ;;  %3877 = vmatmul.mubr.msk.bf16.gmra.mrb[12].mxu1 %vm2381_vm15, %v2351_v27  ;;  %v1159_v38 = vshll.u32 %v6387_v13, 16  ;;  %v938_v9 = vsel %vm786_vm1, %v935_v43, %v937_v52  ;;  %v939_v62 = vrot.slane %v6387_v13, 1  ;;  %v1153_v0 = vor.u32 %v1152_v61, %v1149_v4 }
 0x20a   : > { %v1767_v10 = vpop.permute.xlu1 %1766  ;;  %v6397_v21 = vsel %vm1232_vm3, %v1266_v58, %v7572_v28  ;;  %v1743_v58 = vsel %vm1678_vm5, %v1740_v37, %v1742_v32  ;;  %v1709_v37 = vsel %vm1678_vm5, %v1706_v45, %v1708_v50  ;;  %v1077_v8 = vrot.slane %v7562_v24, 1 }
 0x20b   : > { %v2319_v31 = vsel %vm2299_vm14, %v2250_v20, %v1767_v10  ;;  %v1765_v59 = vpop.permute.xlu0 %1764  ;;  %v1161_v14 = vrot.slane %v1159_v38, 2  ;;  %v940_v49 = vsel %vm786_vm1, %v937_v52, %v939_v62  ;;  %v1078_v35 = vrot.slane %v7563_v30, 2  ;;  %v4063_v30 = vld [vmem:[%s4284_s20 + $0xd0] sm:$0xff]  }
 0x20c   : > { %1808 = vrot.lane.b32.xlu1 %v1741_v44, %s4184_s8  ;;  %v2317_v22 = vsel %vm2299_vm14, %v2248_v54, %v1765_v59  ;;  %v1158_v44 = vrot.slane %v1156_v2, 1  ;;  %v1711_v45 = vsel %vm1678_vm5, %v1708_v50, %v1710_v15  ;;  %v1870_v27 = vsel %vm1816_vm7, %v4063_v30, %v7573_v47  ;;  %v7575_v54 = vld [vmem:[#allocation119_spill] sm:$0xff] }
 0x20d   : > { %1672 = vrot.lane.b32.xlu0 %v1591_v40, %s4183_s7  ;;  %3844 = vmatprep.mubr.msk.bf16.mxu0 %vm2381_vm15, %v2317_v22  ;;  %v1079_v11 = vor.u32 %v1078_v35, %v1077_v8  ;;  %v1154_v5 = vsel %vm1009_vm2, %v6222_v60, %v1153_v0  ;;  %v1939_v55 = vsel %vm1885_vm8, %v1870_v27, %v7574_v19  ;;  %v1383_v12 = vrot.slane %v6447_v33, 2  ;;  %v4065_v8 = vld [vmem:[%s4284_s20 + $0x50] sm:$0xff]   ;;  %v7580_v35 = vld [vmem:[#allocation72_spill] sm:$0xff] }
 0x20e   : > { %v6391_v16 = vpop.permute.xlu1 %1218  ;;  %3845 = vmatmul.mubr.msk.bf16.gmra.mrb[16].mxu0 %vm2381_vm15, %v2319_v31  ;;  %v1162_v18 = vor.u32 %v1161_v14, %v1158_v44  ;;  %v1593_v20 = vshrl.u32 %v6447_v33, 16  ;;  %v1596_v40 = vshll.u32 %v6447_v33, 16  ;;  %v2008_v31 = vsel %vm1954_vm9, %v1939_v55, %v7575_v54 }
 0x20f   : > { %v1217_v41 = vpop.permute.xlu0 %1216  ;;  %v1080_v10 = vsel %vm1009_vm2, %v6282_v63, %v1079_v11  ;;  %v1300_v22 = vrot.slane %v6387_v13, 2  ;;  %v1384_v28 = vsel %vm1232_vm3, %v1381_v36, %v1383_v12  ;;  %v4064_v36 = vld [vmem:[%s4284_s20 + $0xd8] sm:$0xff]   ;;  %vm2867_vm1 = vcmask 1042432  }
 0x210   : > { %1638 = vrot.lane.b32.xlu1 %v1518_v6, %s4183_s7  ;;  %v1163_v42 = vsel %vm1009_vm2, %v1153_v0, %v1162_v18  ;;  %v2077_v59 = vsel %vm2023_vm10, %v2008_v31, %v1217_v41  ;;  %v1595_v52 = vrot.slane %v1593_v20, 2 }
 0x211   : > { %1417 = vrot.lane.b32.xlu0 %v6397_v21, %s4182_s6  ;;  %v1301_v38 = vsel %vm1232_vm3, %v6249_v26, %v1300_v22  ;;  %v7578_v26 = vld [vmem:[#allocation97_spill] sm:$0xff]  ;;  %v4066_v22 = vld [vmem:[%s4284_s20 + $0x58] sm:$0xff]  }
 0x212   : > { %v6408_v25 = vpop.permute.xlu1 %1184  ;;  %v1084_v44 = vsel %vm1009_vm2, %v1079_v11, %v7578_v26  ;;  %vm2868_vm2 = vcmask 1046532  }
 0x213   : > { %v1355_v48 = vpop.permute.xlu0 %1354 }
 0x214   : > { %1640 = vrot.lane.b32.xlu1 %v1522_v57, %s4183_s7  ;;  %v2146_v6 = vsel %vm2092_vm11, %v2077_v59, %v1355_v48  ;;  %v1598_v57 = vrot.slane %v1596_v40, 3  ;;  %v7576_v48 = vld [vmem:[#allocation83_spill] sm:$0xff] }
 0x215   : > { %1810 = vrot.lane.b32.xlu0 %v1743_v58, %s4184_s8  ;;  %v6483_v58 = vld [vmem:[%s4284_s20 + $0x130] ss:$0 sps:$4 sm:$0x77]  }
 0x216   : > { %v1440_v3 = vpop.permute.xlu1 %1439  ;;  %v1599_v62 = vor.u32 %v1598_v57, %v1595_v52  ;;  %v1385_v14 = vrot.slane %v6483_v58, 2 }
 0x217   : > { %v6430_v43 = vpop.permute.xlu0 %1356  ;;  %v2215_v46 = vsel %vm2161_vm12, %v2146_v6, %v1440_v3  ;;  %v1602_v3 = vshrl.u32 %v6483_v58, 16  ;;  %v7585_v6 = vld [vmem:[#allocation71_spill] sm:$0xff] }
 0x218   : > { %1005 = vrot.lane.b32.xlu1 %v938_v9, %s4178_s27  ;;  %v1872_v9 = vsel %vm1816_vm7, %v4064_v36, %v7576_v48  ;;  %v1600_v11 = vsel %vm1455_vm6, %v6353_v34, %v1599_v62 }
 0x219   : > { %1776 = vrot.lane.b32.xlu0 %v1709_v37, %s4184_s8  ;;  %v1605_v37 = vshll.u32 %v6483_v58, 16  ;;  %v1604_v19 = vrot.slane %v1602_v3, 2 }
 0x21a   : > { %v6437_v56 = vpop.permute.xlu1 %1322 }
 0x21b   : > { %v6442_v51 = vpop.permute.xlu0 %1186  ;;  %v1607_v55 = vrot.slane %v1605_v37, 3  ;;  %v1712_v37 = vrot.slane %v5927_v17, 3 }
 0x21c   : > { %1007 = vrot.lane.b32.xlu1 %v940_v49, %s4178_s27  ;;  %v7579_v49 = vld [vmem:[#allocation118_spill] sm:$0xff] }
 0x21d   : > { %1778 = vrot.lane.b32.xlu0 %v1711_v45, %s4184_s8  ;;  %v1838_v45 = vsel %vm1816_vm7, %v4065_v8, %v7580_v35  ;;  %v7591_v8 = vld [vmem:[#allocation32_spill] sm:$0xff] }
 0x21e   : > { %v1663_v24 = vpop.permute.xlu1 %1662  ;;  %v7592_v35 = vrot.slane %v7591_v8, 3 }
 0x21f   : > { %v1442_v29 = vpop.permute.xlu0 %1441  ;;  %v2284_v2 = vsel %vm2230_vm13, %v2215_v46, %v1663_v24  ;;  %v7581_v24 = vld [vmem:[#allocation37_spill] sm:$0xff]  ;;  %v1840_v46 = vsel %vm1816_vm7, %v4066_v22, %v7585_v6 }
 0x220   : > { %1230 = vrot.lane.b32.xlu1 %v1163_v42, %s4180_s4  ;;  %v1907_v30 = vsel %vm1885_vm8, %v1838_v45, %v7581_v24  ;;  %v1715_v17 = vsel %vm1678_vm5, %v1712_v37, %v7592_v35 }
 0x221   : > { %1228 = vrot.lane.b32.xlu0 %v1154_v5, %s4180_s4  ;;  %v1386_v5 = vsel %vm1232_vm3, %v1383_v12, %v1385_v14  ;;  %v7584_v12 = vld [vmem:[#allocation33_spill] sm:$0xff]  ;;  %v7589_v14 = vld [vmem:[#allocation36_spill] sm:$0xff]  ;;  %vm6681_vm3 = vmor %vm2867_vm1, %vm2868_vm2 }
 0x222   : > { %v1408_v60 = vpop.permute.xlu1 %1407  ;;  %v1524_v59 = vrot.slane %v7584_v12, 3  ;;  %v4067_v12 = vld [vmem:[%s4284_s20 + $0xe0] sm:$0xff]  }
 0x223   : > { %v6469_v63 = vpop.permute.xlu0 %1324 }
 0x224   : > { %1196 = vrot.lane.b32.xlu1 %v1080_v10, %s4180_s4 }
 0x225   : > { %1366 = vrot.lane.b32.xlu0 %v6270_v7, %s4181_s5  ;;  %v7577_v7 = vld [vmem:[#allocation5_spill] sm:$0xff] }
 0x226   : > { %v1801_v13 = vpop.permute.xlu1 %1800  ;;  %v1941_v4 = vsel %vm1885_vm8, %v1872_v9, %v7577_v7 }
 0x227   : > { %v2353_v41 = vsel %vm2299_vm14, %v2284_v2, %v1801_v13  ;;  %v1665_v50 = vpop.permute.xlu0 %1664  ;;  %v2010_v0 = vsel %vm1954_vm9, %v1941_v4, %v7579_v49  ;;  %v1608_v2 = vor.u32 %v1607_v55, %v1604_v19  ;;  %v7587_v13 = vld [vmem:[#allocation44_spill] sm:$0xff] }
 0x228   : > { %1451 = vrot.lane.b32.xlu1 %v1384_v28, %s4182_s6  ;;  %3880 = vmatprep.mubr.msk.bf16.mxu1 %vm2381_vm15, %v2353_v41  ;;  %v2079_v42 = vsel %vm2023_vm10, %v2010_v0, %v6391_v16  ;;  %v7582_v16 = vld [vmem:[#allocation9_spill] sm:$0xff]  ;;  %v7590_v49 = vld [vmem:[#allocation40_spill] sm:$0xff] }
 0x229   : > { %1368 = vrot.lane.b32.xlu0 %v1301_v38, %s4181_s5  ;;  %v2148_v47 = vsel %vm2092_vm11, %v2079_v42, %v6430_v43  ;;  %v1976_v10 = vsel %vm1954_vm9, %v1907_v30, %v7582_v16  ;;  %v1744_v43 = vrot.slane %v6447_v33, 3  ;;  %v1713_v30 = vsel %vm1678_vm5, %v1710_v15, %v1712_v37 }
 0x22a   : > { %v1631_v61 = vpop.permute.xlu1 %1630  ;;  %v2217_v27 = vsel %vm2161_vm12, %v2148_v47, %v1442_v29  ;;  %v2045_v40 = vsel %vm2023_vm10, %v1976_v10, %v6408_v25  ;;  %v7583_v29 = vld [vmem:[#allocation35_spill] sm:$0xff]  ;;  %v7586_v25 = vld [vmem:[#allocation42_spill] sm:$0xff] }
 0x22b   : > { %v1410_v18 = vpop.permute.xlu0 %1409  ;;  %v2286_v34 = vsel %vm2230_vm13, %v2217_v27, %v1665_v50  ;;  %v1523_v31 = vrot.slane %v7583_v29, 2  ;;  %v2114_v28 = vsel %vm2092_vm11, %v2045_v40, %v6437_v56  ;;  %v1909_v52 = vsel %vm1885_vm8, %v1840_v46, %v7586_v25  ;;  %v7588_v56 = vld [vmem:[#allocation102_spill] sm:$0xff]  ;;  %v7594_v46 = vld [vmem:[#allocation105_spill] sm:$0xff] }
 0x22c   : > { %1334 = vrot.lane.b32.xlu1 %v6336_v53, %s4181_s5  ;;  %v2183_v57 = vsel %vm2161_vm12, %v2114_v28, %v1408_v60  ;;  %v1978_v41 = vsel %vm1954_vm9, %v1909_v52, %v7587_v13  ;;  %v1745_v9 = vsel %vm1678_vm5, %v1742_v32, %v1744_v43 }
 0x22d   : > { %1198 = vrot.lane.b32.xlu0 %v1084_v44, %s4180_s4  ;;  %v2252_v38 = vsel %vm2230_vm13, %v2183_v57, %v1631_v61  ;;  %v2047_v36 = vsel %vm2023_vm10, %v1978_v41, %v6442_v51  ;;  %v1525_v60 = vor.u32 %v1524_v59, %v1523_v31  ;;  %v1609_v51 = vsel %vm1455_vm6, %v1599_v62, %v1608_v2  ;;  %v7593_v59 = vld [vmem:[#allocation86_spill] sm:$0xff] }
 0x22e   : > { %v1633_v53 = vpop.permute.xlu1 %1632  ;;  %v2116_v7 = vsel %vm2092_vm11, %v2047_v36, %v6469_v63  ;;  %v1746_v44 = vrot.slane %v6483_v58, 3  ;;  %v6582_v58 = vld [vmem:[%s7197_s2] ss:$0 sm:$0xff]  ;;  %v1874_v22 = vsel %vm1816_vm7, %v4067_v12, %v7593_v59 }
 0x22f   : > { %v1803_v20 = vpop.permute.xlu0 %1802  ;;  %v2185_v61 = vsel %vm2161_vm12, %v2116_v7, %v1410_v18  ;;  %v1526_v63 = vsel %vm1455_vm6, %v6383_v1, %v1525_v60  ;;  %v1530_v3 = vsel %vm1455_vm6, %v1525_v60, %v7589_v14  ;;  %v1943_v28 = vsel %vm1885_vm8, %v1874_v22, %v7594_v46  ;;  %v7596_v7 = vld [vmem:[#allocation7_spill] sm:$0xff] }
 0x230   : > { %1674 = vrot.lane.b32.xlu1 %v1600_v11, %s4183_s7  ;;  %v2355_v54 = vsel %vm2299_vm14, %v2286_v34, %v1803_v20  ;;  %v2254_v26 = vsel %vm2230_vm13, %v2185_v61, %v1633_v53  ;;  %v1747_v0 = vsel %vm1678_vm5, %v1744_v43, %v1746_v44  ;;  %vm2909_vm5 = vcmask 1045508  }
 0x231   : > { %1453 = vrot.lane.b32.xlu0 %v1386_v5, %s4182_s6  ;;  %3881 = vmatmul.mubr.msk.bf16.gmra.mrb[16].mxu1 %vm2381_vm15, %v2355_v54  ;;  %vm6784_vm6 = vmor %vm2908_vm4, %vm2909_vm5 }
 0x232   : > { %v6533_v33 = vpop.permute.xlu1 %997 }
 0x233   : > { %v1769_v50 = vpop.permute.xlu0 %1768  ;;  %v2012_v25 = vsel %vm1954_vm9, %v1943_v28, %v6533_v33 }
 0x234   : > { %1419 = vrot.lane.b32.xlu1 %v7588_v56, %s4182_s6  ;;  %v2321_v48 = vsel %vm2299_vm14, %v2252_v38, %v1769_v50 }
 0x235   : > { %1336 = vrot.lane.b32.xlu0 %v6397_v21, %s4181_s5  ;;  %3848 = vmatprep.mubr.msk.bf16.mxu0 %vm2381_vm15, %v2321_v48  ;;  %v4068_v48 = vld [vmem:[%s4284_s20 + $0xe8] sm:$0xff]   ;;  %s3396_s5 = sshll.u32 %s6599_s24, 4  ;;  %s7134_s5 = int_to_ptr.vmem [resolvable:$true] %s3396_s5 }
 0x236   : > { %v6554_v4 = vpop.permute.xlu1 %999  ;;  %s4080_s11 = scalar_lea.vmem %s7134_s5, 4096 }
 0x237   : > { %v1771_v23 = vpop.permute.xlu0 %1770  ;;  %p4081_p13 = scmp.ne.s32.totalorder %s7134_s5, %s4080_s11 }
 0x238   : > { %1812 = vrot.lane.b32.xlu1 %v1745_v9, %s4184_s8  ;;  %v2323_v32 = vsel %vm2299_vm14, %v2254_v26, %v1771_v23  ;;  %v7595_v9 = vld [vmem:[#allocation85_spill] sm:$0xff] }
 0x239   : > { %1676 = vrot.lane.b32.xlu0 %v1609_v51, %s4183_s7  ;;  %3849 = vmatmul.mubr.msk.bf16.gmra.mrb[20].mxu0 %vm2381_vm15, %v2323_v32  ;;  %v1876_v33 = vsel %vm1816_vm7, %v4068_v48, %v7595_v9  ;;  %v4069_v32 = vld [vmem:[%s4284_s20 + $0x60] sm:$0xff]   ;;  %p4082_p0 = pnand %p4081_p13, %p4258_p3 }
 0x23a   : > { %v6565_v21 = vpop.permute.xlu1 %1222  ;;  %v1945_v61 = vsel %vm1885_vm8, %v1876_v33, %v7596_v7 }
 0x23b   : > { %v1221_v62 = vpop.permute.xlu0 %1220  ;;  %v2014_v51 = vsel %vm1954_vm9, %v1945_v61, %v6554_v4  ;;  %p4083_p1 = pneg %p4082_p0 }
 0x23c   : > { %1642 = vrot.lane.b32.xlu1 %v1526_v63, %s4183_s7  ;;  %v2081_v57 = vsel %vm2023_vm10, %v2012_v25, %v1221_v62  ;;  %v2083_v23 = vsel %vm2023_vm10, %v2014_v51, %v6565_v21  ;;  %v7597_v63 = vld [vmem:[#allocation74_spill] sm:$0xff] }
 0x23d   : > { %1421 = vrot.lane.b32.xlu0 %v7590_v49, %s4182_s6  ;;  %v1842_v44 = vsel %vm1816_vm7, %v4069_v32, %v7597_v63 }
 0x23e   : > { %v6574_v1 = vpop.permute.xlu1 %1188 }
 0x23f   : > { %v1359_v18 = vpop.permute.xlu0 %1358 }
 0x240   : > { %1644 = vrot.lane.b32.xlu1 %v1530_v3, %s4183_s7  ;;  %v2150_v2 = vsel %vm2092_vm11, %v2081_v57, %v1359_v18  ;;  %v7598_v3 = vld [vmem:[#allocation98_spill] sm:$0xff] }
 0x241   : > { %v3830_v45 = vpop.f32.mrb[0].mxu0  ;;  %1814 = vrot.lane.b32.xlu0 %v1747_v0, %s4184_s8  ;;  %v1911_v37 = vsel %vm1885_vm8, %v1842_v44, %v7598_v3  ;;  %v7599_v0 = vld [vmem:[#allocation16_spill] sm:$0xff] }
 0x242   : > { %v1444_v42 = vpop.permute.xlu1 %1443  ;;  %v2500_v11 = vadd.f32 %v3830_v45, %v6582_v58  ;;  %v2491_v24 = vpop.f32.mrb[1].mxu0  ;;  %v1980_v18 = vsel %vm1954_vm9, %v1911_v37, %v7599_v0  ;;  %v7600_v45 = vld [vmem:[#allocation73_spill] sm:$0xff] }
 0x243   : > { %v2492_v47 = vadd.f32 %v6582_v58, %v2491_v24  ;;  %v3831_v53 = vpop.f32.mrb[2].mxu0  ;;  %v1361_v27 = vpop.permute.xlu0 %1360  ;;  %v2219_v41 = vsel %vm2161_vm12, %v2150_v2, %v1444_v42  ;;  %v2049_v21 = vsel %vm2023_vm10, %v1980_v18, %v6574_v1 }
 0x244   : > { %1782 = vrot.lane.b32.xlu1 %v1715_v17, %s4184_s8  ;;  %v2764_v5 = vmax.f32 %v2500_v11, 0.0  ;;  %v2503_v19 = vadd.f32 %v3831_v53, %v6582_v58  ;;  %v2494_v55 = vpop.f32.mrb[3].mxu0  ;;  %v2152_v62 = vsel %vm2092_vm11, %v2083_v23, %v1361_v27  ;;  %v4070_v17 = vld [vmem:[%s4284_s20 + $0x68] sm:$0xff]   ;;  %v7602_v27 = vld [vmem:[#allocation8_spill] sm:$0xff] }
 0x245   : > { %v2762_v16 = vmax.f32 %v2492_v47, 0.0  ;;  %v2495_v10 = vadd.f32 %v6582_v58, %v2494_v55  ;;  %1780 = vrot.lane.b32.xlu0 %v1713_v30, %s4184_s8  ;;  %v1844_v42 = vsel %vm1816_vm7, %v4070_v17, %v7600_v45  ;;  %v7601_v30 = vld [vmem:[#allocation96_spill] sm:$0xff]  ;;  %s7130_s8 = scalar_lea.hbm %s7198_s3, %s3711_s16 }
 0x246   : > { %v1327_v39 = vpop.permute.xlu1 %1326  ;;  %v3716_v34 = vpack.c.bf16 %v2764_v5, %v2764_v5  ;;  %v2765_v15 = vmax.f32 %v2503_v19, 0.0  ;;  %v1913_v47 = vsel %vm1885_vm8, %v1844_v42, %v7601_v30 }
 0x247   : > { %v3714_v20 = vpack.c.bf16 %v2762_v16, %v2762_v16  ;;  %v2763_v43 = vmax.f32 %v2495_v10, 0.0  ;;  %v1191_v40 = vpop.permute.xlu0 %1190  ;;  %v2118_v11 = vsel %vm2092_vm11, %v2049_v21, %v1327_v39  ;;  %v1982_v1 = vsel %vm1954_vm9, %v1913_v47, %v7602_v27 }
 0x248   : > { %2849 = vst.msk [vmem:[%s6599_s24 + $0x8] sm:$0xf] %vm2846_vm0, %v3716_v34  ;;  %v3717_v54 = vpack.c.bf16 %v2765_v15, %v2765_v15  ;;  %v2051_v55 = vsel %vm2023_vm10, %v1982_v1, %v1191_v40 }
 0x249   : > { %2847 = vst.msk [vmem:[%s6599_s24] sm:$0xf] %vm2846_vm0, %v3714_v20  ;;  %v3715_v29 = vpack.c.bf16 %v2763_v43, %v2763_v43 }
 0x24a   : > { %v1667_v31 = vpop.permute.xlu1 %1666  ;;  %2850 = vst.msk [vmem:[%s6599_s24 + $0xc] sm:$0xf] %vm2846_vm0, %v3717_v54 }
 0x24b   : > { %2848 = vst.msk [vmem:[%s6599_s24 + $0x4] sm:$0xf] %vm2846_vm0, %v3715_v29  ;;  %v1446_v6 = vpop.permute.xlu0 %1445  ;;  %v2288_v38 = vsel %vm2230_vm13, %v2219_v41, %v1667_v31 }
 0x24c   : > { %v2221_v49 = vsel %vm2161_vm12, %v2152_v62, %v1446_v6 }
 0x24e   : > { %v1412_v52 = vpop.permute.xlu1 %1411 }
 0x24f   : > { %v1329_v13 = vpop.permute.xlu0 %1328  ;;  %v2187_v53 = vsel %vm2161_vm12, %v2118_v11, %v1412_v52 }
 0x250   : > { %v2120_v10 = vsel %vm2092_vm11, %v2051_v55, %v1329_v13  ;;  %v7605_v55 = vld [vmem:[#allocation88_spill] sm:$0xff] }
 0x252   : > { %v1805_v50 = vpop.permute.xlu1 %1804 }
 0x253   : > { %v2357_v56 = vsel %vm2299_vm14, %v2288_v38, %v1805_v50  ;;  %v1669_v36 = vpop.permute.xlu0 %1668 }
 0x254   : > { %3884 = vmatprep.mubr.msk.bf16.mxu1 %vm2381_vm15, %v2357_v56  ;;  %v2290_v4 = vsel %vm2230_vm13, %v2221_v49, %v1669_v36 }
 0x256   : > { %v1635_v60 = vpop.permute.xlu1 %1634 }
 0x257   : > { %v1414_v26 = vpop.permute.xlu0 %1413  ;;  %v2256_v5 = vsel %vm2230_vm13, %v2187_v53, %v1635_v60 }
 0x258   : > { %v2189_v34 = vsel %vm2161_vm12, %v2120_v10, %v1414_v26 }
 0x25a   : > { %v1637_v14 = vpop.permute.xlu1 %1636 }
 0x25b   : > { %v1807_v8 = vpop.permute.xlu0 %1806  ;;  %v2258_v15 = vsel %vm2230_vm13, %v2189_v34, %v1637_v14 }
 0x25c   : > { %v2359_v35 = vsel %vm2299_vm14, %v2290_v4, %v1807_v8 }
 0x25d   : > { %3885 = vmatmul.mubr.msk.bf16.gmra.mrb[20].mxu1 %vm2381_vm15, %v2359_v35 }
 0x25e   : > { %v6649_v24 = vpop.permute.xlu1 %1001 }
 0x25f   : > { %v1773_v19 = vpop.permute.xlu0 %1772 }
 0x260   : > { %v2325_v16 = vsel %vm2299_vm14, %v2256_v5, %v1773_v19  ;;  %v4071_v19 = vld [vmem:[%s4284_s20 + $0xf0] sm:$0xff]  }
 0x261   : > { %3852 = vmatprep.mubr.msk.bf16.mxu0 %vm2381_vm15, %v2325_v16  ;;  %v1878_v16 = vsel %vm1816_vm7, %v4071_v19, %v7605_v55 }
 0x262   : > { %v6661_v39 = vpop.permute.xlu1 %1003 }
 0x263   : > { %v1775_v20 = vpop.permute.xlu0 %1774 }
 0x264   : > { %v2327_v43 = vsel %vm2299_vm14, %v2258_v15, %v1775_v20  ;;  %v3866_v54 = vpop.f32.mrb[0].mxu1  ;;  %v7606_v15 = vld [vmem:[#allocation107_spill] sm:$0xff] }
 0x265   : > { %v2644_v29 = vadd.f32 %v3866_v54, %v6582_v58  ;;  %3853 = vmatmul.mubr.msk.bf16.gmra.mrb[24].mxu0 %vm2381_vm15, %v2327_v43  ;;  %v2635_v40 = vpop.f32.mrb[1].mxu1  ;;  %v1947_v20 = vsel %vm1885_vm8, %v1878_v16, %v7606_v15 }
 0x266   : > { %v6668_v31 = vpop.permute.xlu1 %1226  ;;  %v2636_v12 = vadd.f32 %v6582_v58, %v2635_v40  ;;  %v3867_v59 = vpop.f32.mrb[2].mxu1  ;;  %v2016_v43 = vsel %vm1954_vm9, %v1947_v20, %v6649_v24 }
 0x267   : > { %v2800_v22 = vmax.f32 %v2644_v29, 0.0  ;;  %v2647_v6 = vadd.f32 %v3867_v59, %v6582_v58  ;;  %v2638_v46 = vpop.f32.mrb[3].mxu1  ;;  %v1225_v28 = vpop.permute.xlu0 %1224 }
 0x268   : > { %v2798_v25 = vmax.f32 %v2636_v12, 0.0  ;;  %v2639_v52 = vadd.f32 %v6582_v58, %v2638_v46  ;;  %v2085_v29 = vsel %vm2023_vm10, %v2016_v43, %v1225_v28  ;;  %v7608_v28 = vld [vmem:[#allocation106_spill] sm:$0xff] }
 0x269   : > { %v3756_v57 = vpack.c.bf16 %v2800_v22, %v2800_v22  ;;  %v2801_v2 = vmax.f32 %v2647_v6, 0.0  ;;  %v3834_v13 = vpop.f32.mrb[4].mxu0 }
 0x26a   : > { %v6673_v41 = vpop.permute.xlu1 %1192  ;;  %v3754_v38 = vpack.c.bf16 %v2798_v25, %v2798_v25  ;;  %v2799_v50 = vmax.f32 %v2639_v52, 0.0  ;;  %v2516_v56 = vadd.f32 %v3834_v13, %v6582_v58  ;;  %v2507_v36 = vpop.f32.mrb[5].mxu0  ;;  %v4072_v52 = vld [vmem:[%s4284_s20 + $0xf8] sm:$0xff]  }
 0x26b   : > { %v6676_v48 = vpack.c.bf16 %v2801_v2, %v2801_v2  ;;  %v2508_v9 = vadd.f32 %v6582_v58, %v2507_v36  ;;  %v3835_v33 = vpop.f32.mrb[6].mxu0  ;;  %v1363_v60 = vpop.permute.xlu0 %1362  ;;  %v3644_v32 = vrot.slane %v3756_v57, 9  ;;  %v7607_v57 = vld [vmem:[#allocation87_spill] sm:$0xff]  ;;  %v4073_v36 = vld [vmem:[%s4284_s20 + $0x70] sm:$0xff]  }
 0x26c   : > { %3637 = vst.msk [vmem:[%s6599_s24 + $0x88] sm:$0xf] %vm2846_vm0, %v3754_v38  ;;  %v3755_v61 = vpack.c.bf16 %v2799_v50, %v2799_v50  ;;  %v2768_v51 = vmax.f32 %v2516_v56, 0.0  ;;  %v2519_v26 = vadd.f32 %v3835_v33, %v6582_v58  ;;  %v2510_v23 = vpop.f32.mrb[7].mxu0  ;;  %v2154_v40 = vsel %vm2092_vm11, %v2085_v29, %v1363_v60 }
 0x26d   : > { %v3148_v63 = vrot.slane %v6676_v48, 5  ;;  %v2766_v44 = vmax.f32 %v2508_v9, 0.0  ;;  %v2511_v62 = vadd.f32 %v6582_v58, %v2510_v23  ;;  %v1880_v24 = vsel %vm1816_vm7, %v4072_v52, %v7607_v57  ;;  %v7609_v9 = vld [vmem:[#allocation76_spill] sm:$0xff] }
 0x26e   : > { %v1448_v14 = vpop.permute.xlu1 %1447  ;;  %3638 = vst.msk [vmem:[%s6599_s24 + $0x8c] sm:$0xf] %vm2846_vm0, %v3755_v61  ;;  %v3720_v3 = vpack.c.bf16 %v2768_v51, %v2768_v51  ;;  %v2769_v37 = vmax.f32 %v2519_v26, 0.0  ;;  %v1949_v13 = vsel %vm1885_vm8, %v1880_v24, %v7608_v28  ;;  %v1846_v33 = vsel %vm1816_vm7, %v4073_v36, %v7609_v9  ;;  %v7610_v51 = vld [vmem:[#allocation100_spill] sm:$0xff] }
 0x26f   : > { %v3149_v49 = vsel %vm6681_vm3, %v3644_v32, %v3148_v63  ;;  %v3718_v0 = vpack.c.bf16 %v2766_v44, %v2766_v44  ;;  %v2767_v18 = vmax.f32 %v2511_v62, 0.0  ;;  %v1365_v4 = vpop.permute.xlu0 %1364  ;;  %v2223_v59 = vsel %vm2161_vm12, %v2154_v40, %v1448_v14  ;;  %v7611_v32 = vld [vmem:[#allocation113_spill] sm:$0xff] }
 0x270   : > { %3645 = vst.msk [vmem:[%s6599_s24 + $0x90] sm:$0xf] %vm2846_vm0, %v3149_v49  ;;  %v2875_v8 = vrot.slane %v3720_v3, 5  ;;  %v6696_v21 = vpack.c.bf16 %v2769_v37, %v2769_v37  ;;  %v2018_v38 = vsel %vm1954_vm9, %v1949_v13, %v6661_v39  ;;  %v1915_v26 = vsel %vm1885_vm8, %v1846_v33, %v7610_v51  ;;  %v4074_v3 = vld [vmem:[%s4284_s20 + $0x78] sm:$0xff]  }
 0x271   : > { %v3719_v35 = vpack.c.bf16 %v2767_v18, %v2767_v18  ;;  %v3568_v11 = vrot.slane %v3718_v0, 9  ;;  %v2087_v56 = vsel %vm2023_vm10, %v2018_v38, %v6668_v31  ;;  %v1984_v44 = vsel %vm1954_vm9, %v1915_v26, %v7611_v32  ;;  %v7612_v37 = vld [vmem:[#allocation75_spill] sm:$0xff] }
 0x272   : > { %v1331_v17 = vpop.permute.xlu1 %1330  ;;  %v2877_v45 = vrot.slane %v2875_v8, 4  ;;  %v2878_v42 = vrot.slane %v6696_v21, 5  ;;  %v2156_v60 = vsel %vm2092_vm11, %v2087_v56, %v1365_v4  ;;  %v2053_v31 = vsel %vm2023_vm10, %v1984_v44, %v6673_v41  ;;  %v7613_v4 = vld [vmem:[#allocation99_spill] sm:$0xff] }
 0x273   : > { %v2872_v30 = vrot.slane %v3719_v35, 5  ;;  %v1195_v47 = vpop.permute.xlu0 %1194  ;;  %v1848_v49 = vsel %vm1816_vm7, %v4074_v3, %v7612_v37  ;;  %v2122_v0 = vsel %vm2092_vm11, %v2053_v31, %v1331_v17 }
 0x274   : > { %v2879_v53 = vsel %vm6681_vm3, %v2877_v45, %v2878_v42  ;;  %v7614_v45 = vld [vmem:[#allocation10_spill] sm:$0xff] }
 0x275   : > { %3571 = vst.msk [vmem:[%s6599_s24 + $0x18] sm:$0xf] %vm2846_vm0, %v2879_v53  ;;  %v2873_v27 = vsel %vm6681_vm3, %v3568_v11, %v2872_v30  ;;  %v2874_v1 = vrot.slane %v2872_v30, 4 }
 0x276   : > { %v1671_v5 = vpop.permute.xlu1 %1670  ;;  %3569 = vst.msk [vmem:[%s6599_s24 + $0x10] sm:$0xf] %vm2846_vm0, %v2873_v27 }
 0x277   : > { %v2876_v10 = vsel %vm6681_vm3, %v2874_v1, %v2875_v8  ;;  %v1450_v34 = vpop.permute.xlu0 %1449  ;;  %v2292_v22 = vsel %vm2230_vm13, %v2223_v59, %v1671_v5  ;;  %v1917_v8 = vsel %vm1885_vm8, %v1848_v49, %v7613_v4 }
 0x278   : > { %3570 = vst.msk [vmem:[%s6599_s24 + $0x14] sm:$0xf] %vm2846_vm0, %v2876_v10  ;;  %v2225_v23 = vsel %vm2161_vm12, %v2156_v60, %v1450_v34  ;;  %v1986_v41 = vsel %vm1954_vm9, %v1917_v8, %v7614_v45  ;;  %v2880_v45 = vrot.slane %v2878_v42, 4 }
 0x279   : > { %v2055_v53 = vsel %vm2023_vm10, %v1986_v41, %v1195_v47 }
 0x27a   : > { %v1416_v54 = vpop.permute.xlu1 %1415 }
 0x27b   : > { %v1333_v12 = vpop.permute.xlu0 %1332  ;;  %v2191_v35 = vsel %vm2161_vm12, %v2122_v0, %v1416_v54 }
 0x27c   : > { %v2124_v1 = vsel %vm2092_vm11, %v2055_v53, %v1333_v12 }
 0x27e   : > { %v1809_v6 = vpop.permute.xlu1 %1808 }
 0x27f   : > { %v2361_v46 = vsel %vm2299_vm14, %v2292_v22, %v1809_v6  ;;  %v1673_v25 = vpop.permute.xlu0 %1672 }
 0x280   : > { %3888 = vmatprep.mubr.msk.bf16.mxu1 %vm2381_vm15, %v2361_v46  ;;  %v2294_v39 = vsel %vm2230_vm13, %v2225_v23, %v1673_v25 }
 0x282   : > { %v1639_v2 = vpop.permute.xlu1 %1638 }
 0x283   : > { %v1418_v50 = vpop.permute.xlu0 %1417  ;;  %v2260_v11 = vsel %vm2230_vm13, %v2191_v35, %v1639_v2  ;;  %v3150_v2 = vrot.slane %v3148_v63, 4 }
 0x284   : > { %v2193_v16 = vsel %vm2161_vm12, %v2124_v1, %v1418_v50 }
 0x286   : > { %v1641_v61 = vpop.permute.xlu1 %1640 }
 0x287   : > { %v1811_v62 = vpop.permute.xlu0 %1810  ;;  %v2262_v15 = vsel %vm2230_vm13, %v2193_v16, %v1641_v61 }
 0x288   : > { %v2363_v14 = vsel %vm2299_vm14, %v2294_v39, %v1811_v62 }
 0x289   : > { %3889 = vmatmul.mubr.msk.bf16.gmra.mrb[24].mxu1 %vm2381_vm15, %v2363_v14 }
 0x28a   : > { %v6753_v18 = vpop.permute.xlu1 %1005 }
 0x28b   : > { %v1777_v30 = vpop.permute.xlu0 %1776 }
 0x28c   : > { %v2329_v27 = vsel %vm2299_vm14, %v2260_v11, %v1777_v30  ;;  %v3870_v17 = vpop.f32.mrb[4].mxu1 }
 0x28d   : > { %v2660_v5 = vadd.f32 %v3870_v17, %v6582_v58  ;;  %3856 = vmatprep.mubr.msk.bf16.mxu0 %vm2381_vm15, %v2329_v27  ;;  %v2651_v19 = vpop.f32.mrb[5].mxu1 }
 0x28e   : > { %v6766_v55 = vpop.permute.xlu1 %1007  ;;  %v2652_v10 = vadd.f32 %v6582_v58, %v2651_v19  ;;  %v3871_v34 = vpop.f32.mrb[6].mxu1 }
 0x28f   : > { %v2804_v47 = vmax.f32 %v2660_v5, 0.0  ;;  %v2663_v20 = vadd.f32 %v3871_v34, %v6582_v58  ;;  %v2654_v43 = vpop.f32.mrb[7].mxu1  ;;  %v1779_v54 = vpop.permute.xlu0 %1778 }
 0x290   : > { %v2802_v29 = vmax.f32 %v2652_v10, 0.0  ;;  %v2655_v40 = vadd.f32 %v6582_v58, %v2654_v43  ;;  %v2331_v12 = vsel %vm2299_vm14, %v2262_v15, %v1779_v54  ;;  %v4075_v54 = vld [vmem:[%s4284_s20 + $0x100] sm:$0xff]  }
 0x291   : > { %v3760_v59 = vpack.c.bf16 %v2804_v47, %v2804_v47  ;;  %v2805_v22 = vmax.f32 %v2663_v20, 0.0  ;;  %v3838_v6 = vpop.f32.mrb[8].mxu0  ;;  %3857 = vmatmul.mubr.msk.bf16.gmra.mrb[28].mxu0 %vm2381_vm15, %v2331_v12 }
 0x292   : > { %v6775_v46 = vpop.permute.xlu1 %1230  ;;  %v3758_v25 = vpack.c.bf16 %v2802_v29, %v2802_v29  ;;  %v2803_v52 = vmax.f32 %v2655_v40, 0.0  ;;  %v2532_v57 = vadd.f32 %v3838_v6, %v6582_v58  ;;  %v2523_v24 = vpop.f32.mrb[9].mxu0  ;;  %v7617_v29 = vld [vmem:[#allocation90_spill] sm:$0xff] }
 0x293   : > { %v6780_v28 = vpack.c.bf16 %v2805_v22, %v2805_v22  ;;  %v2524_v13 = vadd.f32 %v6582_v58, %v2523_v24  ;;  %v3839_v38 = vpop.f32.mrb[10].mxu0  ;;  %v1229_v50 = vpop.permute.xlu0 %1228  ;;  %v3654_v48 = vrot.slane %v3760_v59, 10  ;;  %v3157_v31 = vrot.slane %v3760_v59, 5  ;;  %v7618_v59 = vld [vmem:[#allocation109_spill] sm:$0xff] }
 0x294   : > { %v3151_v56 = vrot.slane %v3758_v25, 5  ;;  %v3759_v9 = vpack.c.bf16 %v2803_v52, %v2803_v52  ;;  %v2772_v33 = vmax.f32 %v2532_v57, 0.0  ;;  %v2535_v60 = vadd.f32 %v3839_v38, %v6582_v58  ;;  %v2526_v61 = vpop.f32.mrb[11].mxu0 }
 0x295   : > { %v3186_v63 = vrot.slane %v6780_v28, 6  ;;  %v2770_v51 = vmax.f32 %v2524_v13, 0.0  ;;  %v2527_v26 = vadd.f32 %v6582_v58, %v2526_v61  ;;  %v1882_v40 = vsel %vm1816_vm7, %v4075_v54, %v7617_v29 }
 0x296   : > { %v6791_v23 = vpop.permute.xlu1 %1196  ;;  %v3152_v32 = vsel %vm6681_vm3, %v3150_v2, %v3151_v56  ;;  %v3153_v44 = vrot.slane %v3151_v56, 4  ;;  %v3154_v39 = vrot.slane %v3759_v9, 5  ;;  %v3725_v62 = vpack.c.bf16 %v2772_v33, %v2772_v33  ;;  %v4076_v33 = vld [vmem:[%s4284_s20 + $0x108] sm:$0xff]  }
 0x297   : > { %3646 = vst.msk [vmem:[%s6599_s24 + $0x94] sm:$0xf] %vm2846_vm0, %v3152_v32  ;;  %v3187_v14 = vsel %vm6784_vm6, %v3654_v48, %v3186_v63  ;;  %v3722_v3 = vpack.c.bf16 %v2770_v51, %v2770_v51  ;;  %v2773_v37 = vmax.f32 %v2535_v60, 0.0  ;;  %v1367_v49 = vpop.permute.xlu0 %1366  ;;  %v2771_v35 = vmax.f32 %v2527_v26, 0.0  ;;  %v4077_v32 = vld [vmem:[%s4284_s20 + $0x88] sm:$0xff]  }
 0x298   : > { %3655 = vst.msk [vmem:[%s6599_s24 + $0xa0] sm:$0xf] %vm2846_vm0, %v3187_v14  ;;  %v3155_v0 = vsel %vm6681_vm3, %v3153_v44, %v3154_v39  ;;  %v3156_v4 = vrot.slane %v3154_v39, 4  ;;  %v2916_v8 = vrot.slane %v3725_v62, 6  ;;  %v1951_v22 = vsel %vm1885_vm8, %v1882_v40, %v7618_v59  ;;  %v7621_v44 = vld [vmem:[#allocation77_spill] sm:$0xff]  ;;  %v7622_v14 = vld [vmem:[#allocation78_spill] sm:$0xff] }
 0x299   : > { %3647 = vst.msk [vmem:[%s6599_s24 + $0x98] sm:$0xf] %vm2846_vm0, %v3155_v0  ;;  %v2881_v41 = vrot.slane %v3722_v3, 5  ;;  %v6809_v11 = vpack.c.bf16 %v2773_v37, %v2773_v37  ;;  %v3724_v17 = vpack.c.bf16 %v2771_v35, %v2771_v35  ;;  %v3578_v5 = vrot.slane %v3722_v3, 10  ;;  %v7623_v37 = vld [vmem:[#allocation101_spill] sm:$0xff]  ;;  %v7625_v35 = vld [vmem:[#allocation114_spill] sm:$0xff] }
 0x29a   : > { %v1452_v30 = vpop.permute.xlu1 %1451  ;;  %v3158_v53 = vsel %vm6681_vm3, %v3156_v4, %v3157_v31  ;;  %v2918_v27 = vrot.slane %v2916_v8, 4  ;;  %v2020_v6 = vsel %vm1954_vm9, %v1951_v22, %v6753_v18  ;;  %v7619_v18 = vld [vmem:[#allocation89_spill] sm:$0xff]  ;;  %v1852_v39 = vsel %vm1816_vm7, %v4077_v32, %v7621_v44  ;;  %v4078_v31 = vld [vmem:[%s4284_s20 + $0x80] sm:$0xff]   ;;  %s4084_s20 = sshll.u32 %s4185_s21, 4  ;;  %s4085_s20 = int_to_ptr.vmem [resolvable:$false] %s4084_s20 }
 0x29b   : > { %3648 = vst.msk [vmem:[%s6599_s24 + $0x9c] sm:$0xf] %vm2846_vm0, %v3158_v53  ;;  %v2882_v21 = vsel %vm6681_vm3, %v2880_v45, %v2881_v41  ;;  %v2919_v42 = vrot.slane %v6809_v11, 6  ;;  %v1369_v1 = vpop.permute.xlu0 %1368  ;;  %v2913_v19 = vrot.slane %v3724_v17, 6  ;;  %v2089_v52 = vsel %vm2023_vm10, %v2020_v6, %v1229_v50  ;;  %v7620_v50 = vld [vmem:[#allocation108_spill] sm:$0xff]  ;;  %s4086_s27 = scalar_lea.vmem %s4085_s20, 8192  ;;  %p4087_p2 = scmp.lt.s32.totalorder %s7134_s5, %s4085_s20 }
 0x29c   : > { %3572 = vst.msk [vmem:[%s6599_s24 + $0x1c] sm:$0xf] %vm2846_vm0, %v2882_v21  ;;  %v2158_v57 = vsel %vm2092_vm11, %v2089_v52, %v1367_v49  ;;  %v1884_v60 = vsel %vm1816_vm7, %v4076_v33, %v7619_v18  ;;  %v1850_v3 = vsel %vm1816_vm7, %v4078_v31, %v7622_v14  ;;  %v1921_v49 = vsel %vm1885_vm8, %v1852_v39, %v7623_v37  ;;  %p4088_p4 = scmp.lt.s32.totalorder %s4086_s27, %s4080_s11 }
 0x29d   : > { %v2920_v16 = vsel %vm6784_vm6, %v2918_v27, %v2919_v42  ;;  %v2914_v34 = vsel %vm6784_vm6, %v3578_v5, %v2913_v19  ;;  %v2915_v15 = vrot.slane %v2913_v19, 4  ;;  %v2227_v2 = vsel %vm2161_vm12, %v2158_v57, %v1452_v30  ;;  %v7626_v30 = vld [vmem:[#allocation115_spill] sm:$0xff] }
 0x29e   : > { %v1335_v10 = vpop.permute.xlu1 %1334  ;;  %3581 = vst.msk [vmem:[%s6599_s24 + $0x28] sm:$0xf] %vm2846_vm0, %v2920_v16  ;;  %3579 = vst.msk [vmem:[%s6599_s24 + $0x20] sm:$0xf] %vm2846_vm0, %v2914_v34  ;;  %v1953_v48 = vsel %vm1885_vm8, %v1884_v60, %v7620_v50  ;;  %v1990_v45 = vsel %vm1954_vm9, %v1921_v49, %v7625_v35  ;;  %vm2949_vm7 = vcmask 1040384   ;;  %v3188_v18 = vrot.slane %v3186_v63, 4  ;;  %p4089_p5 = por %p4088_p4, %p4087_p2 }
 0x29f   : > { %v1199_v47 = vpop.permute.xlu0 %1198  ;;  %v2917_v20 = vsel %vm6784_vm6, %v2915_v15, %v2916_v8  ;;  %v2022_v51 = vsel %vm1954_vm9, %v1953_v48, %v6766_v55  ;;  %v7624_v8 = vld [vmem:[#allocation103_spill] sm:$0xff] }
 0x2a0   : > { %3580 = vst.msk [vmem:[%s6599_s24 + $0x24] sm:$0xf] %vm2846_vm0, %v2917_v20  ;;  %v2091_v62 = vsel %vm2023_vm10, %v2022_v51, %v6775_v46  ;;  %v1919_v55 = vsel %vm1885_vm8, %v1850_v3, %v7624_v8  ;;  %v2059_v53 = vsel %vm2023_vm10, %v1990_v45, %v1199_v47  ;;  %vm2950_vm8 = vcmask 1044484   ;;  %p4090_p6 = pnand %p4089_p5, %p4083_p1 }
 0x2a1   : > { %v2160_v0 = vsel %vm2092_vm11, %v2091_v62, %v1369_v1  ;;  %v1988_v46 = vsel %vm1954_vm9, %v1919_v55, %v7626_v30  ;;  %vm6898_vm9 = vmor %vm2949_vm7, %vm2950_vm8 }
 0x2a2   : > { %v1675_v43 = vpop.permute.xlu1 %1674  ;;  %v2057_v21 = vsel %vm2023_vm10, %v1988_v46, %v6791_v23  ;;  %v2921_v46 = vrot.slane %v2919_v42, 4 }
 0x2a3   : > { %v1454_v12 = vpop.permute.xlu0 %1453  ;;  %v2296_v13 = vsel %vm2230_vm13, %v2227_v2, %v1675_v43  ;;  %v2126_v16 = vsel %vm2092_vm11, %v2057_v21, %v1335_v10 }
 0x2a4   : > { %v2229_v41 = vsel %vm2161_vm12, %v2160_v0, %v1454_v12 }
 0x2a6   : > { %v1420_v25 = vpop.permute.xlu1 %1419 }
 0x2a7   : > { %v1337_v24 = vpop.permute.xlu0 %1336  ;;  %v2195_v43 = vsel %vm2161_vm12, %v2126_v16, %v1420_v25 }
 0x2a8   : > { %v2128_v1 = vsel %vm2092_vm11, %v2059_v53, %v1337_v24 }
 0x2aa   : > { %v1813_v38 = vpop.permute.xlu1 %1812 }
 0x2ab   : > { %v2365_v56 = vsel %vm2299_vm14, %v2296_v13, %v1813_v38  ;;  %v1677_v9 = vpop.permute.xlu0 %1676 }
 0x2ac   : > { %3892 = vmatprep.mubr.msk.bf16.mxu1 %vm2381_vm15, %v2365_v56  ;;  %v2298_v27 = vsel %vm2230_vm13, %v2229_v41, %v1677_v9 }
 0x2ae   : > { %v1643_v61 = vpop.permute.xlu1 %1642 }
 0x2af   : > { %v1422_v26 = vpop.permute.xlu0 %1421  ;;  %v2264_v40 = vsel %vm2230_vm13, %v2195_v43, %v1643_v61 }
 0x2b0   : > { %v2197_v34 = vsel %vm2161_vm12, %v2128_v1, %v1422_v26 }
 0x2b2   : > { %v1645_v4 = vpop.permute.xlu1 %1644 }
 0x2b3   : > { %v1815_v17 = vpop.permute.xlu0 %1814  ;;  %v2266_v54 = vsel %vm2230_vm13, %v2197_v34, %v1645_v4 }
 0x2b4   : > { %v2367_v5 = vsel %vm2299_vm14, %v2298_v27, %v1815_v17  ;;  %v3874_v19 = vpop.f32.mrb[8].mxu1 }
 0x2b5   : > { %v2676_v15 = vadd.f32 %v3874_v19, %v6582_v58  ;;  %v2667_v20 = vpop.f32.mrb[9].mxu1  ;;  %3893 = vmatmul.mubr.msk.bf16.gmra.mrb[28].mxu1 %vm2381_vm15, %v2367_v5 }
 0x2b6   : > { %v1783_v47 = vpop.permute.xlu1 %1782  ;;  %v2668_v23 = vadd.f32 %v6582_v58, %v2667_v20  ;;  %v3875_v29 = vpop.f32.mrb[10].mxu1 }
 0x2b7   : > { %v2808_v12 = vmax.f32 %v2676_v15, 0.0  ;;  %v2679_v10 = vadd.f32 %v3875_v29, %v6582_v58  ;;  %v2335_v59 = vsel %vm2299_vm14, %v2266_v54, %v1783_v47  ;;  %v2670_v22 = vpop.f32.mrb[11].mxu1  ;;  %v1781_v6 = vpop.permute.xlu0 %1780 }
 0x2b8   : > { %v2806_v52 = vmax.f32 %v2668_v23, 0.0  ;;  %v2671_v57 = vadd.f32 %v6582_v58, %v2670_v22  ;;  %v2333_v24 = vsel %vm2299_vm14, %v2264_v40, %v1781_v6 }
 0x2b9   : > { %v3765_v25 = vpack.c.bf16 %v2808_v12, %v2808_v12  ;;  %v2809_v2 = vmax.f32 %v2679_v10, 0.0  ;;  %v3842_v13 = vpop.f32.mrb[12].mxu0  ;;  %3860 = vmatprep.mubr.msk.bf16.mxu0 %vm2381_vm15, %v2333_v24 }
 0x2ba   : > { %v3763_v38 = vpack.c.bf16 %v2806_v52, %v2806_v52  ;;  %v2807_v56 = vmax.f32 %v2671_v57, 0.0  ;;  %v2548_v9 = vadd.f32 %v3842_v13, %v6582_v58  ;;  %v2539_v33 = vpop.f32.mrb[13].mxu0  ;;  %3861 = vmatmul.mubr.msk.bf16.gmra.mrb[32].mxu0 %vm2381_vm15, %v2335_v59 }
 0x2bb   : > { %v6895_v60 = vpack.c.bf16 %v2809_v2, %v2809_v2  ;;  %v2540_v61 = vadd.f32 %v6582_v58, %v2539_v33  ;;  %v3843_v50 = vpop.f32.mrb[14].mxu0  ;;  %v3664_v62 = vrot.slane %v3765_v25, 11  ;;  %v3195_v0 = vrot.slane %v3765_v25, 6 }
 0x2bc   : > { %v3189_v48 = vrot.slane %v3763_v38, 6  ;;  %v3764_v26 = vpack.c.bf16 %v2807_v56, %v2807_v56  ;;  %v2776_v32 = vmax.f32 %v2548_v9, 0.0  ;;  %v2551_v44 = vadd.f32 %v3843_v50, %v6582_v58  ;;  %v2542_v39 = vpop.f32.mrb[15].mxu0 }
 0x2bd   : > { %v3224_v28 = vrot.slane %v6895_v60, 7  ;;  %v2774_v63 = vmax.f32 %v2540_v61, 0.0  ;;  %v2543_v31 = vadd.f32 %v6582_v58, %v2542_v39 }
 0x2be   : > { %v3190_v14 = vsel %vm6784_vm6, %v3188_v18, %v3189_v48  ;;  %v3191_v3 = vrot.slane %v3189_v48, 4  ;;  %v3192_v37 = vrot.slane %v3764_v26, 6  ;;  %v3730_v49 = vpack.c.bf16 %v2776_v32, %v2776_v32 }
 0x2bf   : > { %3656 = vst.msk [vmem:[%s6599_s24 + $0xa4] sm:$0xf] %vm2846_vm0, %v3190_v14  ;;  %v3225_v4 = vsel %vm6898_vm9, %v3664_v62, %v3224_v28  ;;  %v3727_v8 = vpack.c.bf16 %v2774_v63, %v2774_v63  ;;  %v2777_v55 = vmax.f32 %v2551_v44, 0.0  ;;  %v2775_v30 = vmax.f32 %v2543_v31, 0.0 }
 0x2c0   : > { %3665 = vst.msk [vmem:[%s6599_s24 + $0xb0] sm:$0xf] %vm2846_vm0, %v3225_v4  ;;  %v3193_v35 = vsel %vm6784_vm6, %v3191_v3, %v3192_v37  ;;  %v3194_v45 = vrot.slane %v3192_v37, 4  ;;  %v2957_v41 = vrot.slane %v3730_v49, 7  ;;  %v3226_v13 = vrot.slane %v3224_v28, 4 }
 0x2c1   : > { %3657 = vst.msk [vmem:[%s6599_s24 + $0xa8] sm:$0xf] %vm2846_vm0, %v3193_v35  ;;  %v2922_v53 = vrot.slane %v3727_v8, 6  ;;  %v3731_v27 = vpack.c.bf16 %v2777_v55, %v2777_v55  ;;  %v3729_v1 = vpack.c.bf16 %v2775_v30, %v2775_v30  ;;  %v3588_v11 = vrot.slane %v3727_v8, 11 }
 0x2c2   : > { %v3196_v17 = vsel %vm6784_vm6, %v3194_v45, %v3195_v0  ;;  %v2959_v21 = vrot.slane %v2957_v41, 4 }
 0x2c3   : > { %3658 = vst.msk [vmem:[%s6599_s24 + $0xac] sm:$0xf] %vm2846_vm0, %v3196_v17  ;;  %v2923_v5 = vsel %vm6784_vm6, %v2921_v46, %v2922_v53  ;;  %v2960_v19 = vrot.slane %v3731_v27, 7  ;;  %v2954_v42 = vrot.slane %v3729_v1, 7 }
 0x2c4   : > { %3582 = vst.msk [vmem:[%s6599_s24 + $0x2c] sm:$0xf] %vm2846_vm0, %v2923_v5 }
 0x2c5   : > { %v2961_v16 = vsel %vm6898_vm9, %v2959_v21, %v2960_v19  ;;  %v2955_v34 = vsel %vm6898_vm9, %v3588_v11, %v2954_v42  ;;  %v2956_v15 = vrot.slane %v2954_v42, 4  ;;  %v2962_v0 = vrot.slane %v2960_v19, 4 }
 0x2c6   : > { %3591 = vst.msk [vmem:[%s6599_s24 + $0x38] sm:$0xf] %vm2846_vm0, %v2961_v16  ;;  %3589 = vst.msk [vmem:[%s6599_s24 + $0x30] sm:$0xf] %vm2846_vm0, %v2955_v34 }
 0x2c7   : > { %v2958_v20 = vsel %vm6898_vm9, %v2956_v15, %v2957_v41 }
 0x2c8   : > { %3590 = vst.msk [vmem:[%s6599_s24 + $0x34] sm:$0xf] %vm2846_vm0, %v2958_v20 }
 0x2dc   : > { %v3878_v47 = vpop.f32.mrb[12].mxu1 }
 0x2dd   : > { %v2692_v43 = vadd.f32 %v3878_v47, %v6582_v58  ;;  %v2683_v54 = vpop.f32.mrb[13].mxu1 }
 0x2de   : > { %v2684_v23 = vadd.f32 %v6582_v58, %v2683_v54  ;;  %v3879_v29 = vpop.f32.mrb[14].mxu1 }
 0x2df   : > { %v2812_v40 = vmax.f32 %v2692_v43, 0.0  ;;  %v2695_v12 = vadd.f32 %v3879_v29, %v6582_v58  ;;  %v2686_v10 = vpop.f32.mrb[15].mxu1 }
 0x2e0   : > { %v2810_v59 = vmax.f32 %v2684_v23, 0.0  ;;  %v2687_v22 = vadd.f32 %v6582_v58, %v2686_v10 }
 0x2e1   : > { %v2813_v6 = vmax.f32 %v2695_v12, 0.0  ;;  %v3846_v52 = vpop.f32.mrb[16].mxu0  ;;  %v3770_v38 = vpack.c.bf16 %v2812_v40, %v2812_v40 }
 0x2e2   : > { %v3768_v57 = vpack.c.bf16 %v2810_v59, %v2810_v59  ;;  %v2811_v24 = vmax.f32 %v2687_v22, 0.0  ;;  %v2564_v25 = vadd.f32 %v3846_v52, %v6582_v58  ;;  %v2555_v2 = vpop.f32.mrb[17].mxu0 }
 0x2e3   : > { %v3771_v56 = vpack.c.bf16 %v2813_v6, %v2813_v6  ;;  %v2556_v9 = vadd.f32 %v6582_v58, %v2555_v2  ;;  %v3847_v33 = vpop.f32.mrb[18].mxu0  ;;  %v3233_v3 = vrot.slane %v3770_v38, 7 }
 0x2e4   : > { %v3227_v18 = vrot.slane %v3768_v57, 7  ;;  %v3769_v60 = vpack.c.bf16 %v2811_v24, %v2811_v24  ;;  %v2780_v61 = vmax.f32 %v2564_v25, 0.0  ;;  %v2567_v50 = vadd.f32 %v3847_v33, %v6582_v58  ;;  %v2558_v48 = vpop.f32.mrb[19].mxu0 }
 0x2e5   : > { %3673 = vst.msk [vmem:[%s6599_s24 + $0xc0] sm:$0xf] %vm2846_vm0, %v3771_v56  ;;  %v2778_v26 = vmax.f32 %v2556_v9, 0.0  ;;  %v2559_v32 = vadd.f32 %v6582_v58, %v2558_v48 }
 0x2e6   : > { %v3228_v44 = vsel %vm6898_vm9, %v3226_v13, %v3227_v18  ;;  %v3229_v39 = vrot.slane %v3227_v18, 4  ;;  %v3230_v62 = vrot.slane %v3769_v60, 7  ;;  %v3734_v28 = vpack.c.bf16 %v2780_v61, %v2780_v61 }
 0x2e7   : > { %3666 = vst.msk [vmem:[%s6599_s24 + $0xb4] sm:$0xf] %vm2846_vm0, %v3228_v44  ;;  %v3732_v63 = vpack.c.bf16 %v2778_v26, %v2778_v26  ;;  %v2781_v31 = vmax.f32 %v2567_v50, 0.0  ;;  %v2779_v14 = vmax.f32 %v2559_v32, 0.0 }
 0x2e8   : > { %v3231_v37 = vsel %vm6898_vm9, %v3229_v39, %v3230_v62  ;;  %v3232_v49 = vrot.slane %v3230_v62, 4  ;;  %3598 = vst.msk [vmem:[%s6599_s24 + $0x44] sm:$0xf] %vm2846_vm0, %v3734_v28 }
 0x2e9   : > { %3667 = vst.msk [vmem:[%s6599_s24 + $0xb8] sm:$0xf] %vm2846_vm0, %v3231_v37  ;;  %v2963_v4 = vrot.slane %v3732_v63, 7  ;;  %v3735_v8 = vpack.c.bf16 %v2781_v31, %v2781_v31  ;;  %v3733_v55 = vpack.c.bf16 %v2779_v14, %v2779_v14 }
 0x2ea   : > { %v3234_v35 = vsel %vm6898_vm9, %v3232_v49, %v3233_v3 }
 0x2eb   : > { %3668 = vst.msk [vmem:[%s6599_s24 + $0xbc] sm:$0xf] %vm2846_vm0, %v3234_v35  ;;  %v2964_v45 = vsel %vm6898_vm9, %v2962_v0, %v2963_v4  ;;  %3599 = vst.msk [vmem:[%s6599_s24 + $0x48] sm:$0xf] %vm2846_vm0, %v3735_v8 }
 0x2ec   : > { %3597 = vst.msk [vmem:[%s6599_s24 + $0x40] sm:$0xf] %vm2846_vm0, %v3733_v55  ;;  %3592 = vst.msk [vmem:[%s6599_s24 + $0x3c] sm:$0xf] %vm2846_vm0, %v2964_v45 }
 0x304   : > { %v3882_v41 = vpop.f32.mrb[16].mxu1 }
 0x305   : > { %v2708_v30 = vadd.f32 %v3882_v41, %v6582_v58  ;;  %v2699_v46 = vpop.f32.mrb[17].mxu1 }
 0x306   : > { %v2700_v53 = vadd.f32 %v6582_v58, %v2699_v46  ;;  %v3883_v27 = vpop.f32.mrb[18].mxu1 }
 0x307   : > { %v2816_v17 = vmax.f32 %v2708_v30, 0.0  ;;  %v2702_v21 = vpop.f32.mrb[19].mxu1  ;;  %v2711_v9 = vadd.f32 %v3883_v27, %v6582_v58 }
 0x308   : > { %v2814_v1 = vmax.f32 %v2700_v53, 0.0  ;;  %v2703_v5 = vadd.f32 %v6582_v58, %v2702_v21 }
 0x309   : > { %v3774_v19 = vpack.c.bf16 %v2816_v17, %v2816_v17  ;;  %v2817_v33 = vmax.f32 %v2711_v9, 0.0 }
 0x30a   : > { %v3772_v11 = vpack.c.bf16 %v2814_v1, %v2814_v1  ;;  %v2815_v42 = vmax.f32 %v2703_v5, 0.0 }
 0x30b   : > { %3676 = vst.msk [vmem:[%s6599_s24 + $0xcc] sm:$0xf] %vm2846_vm0, %v3774_v19  ;;  %v3775_v39 = vpack.c.bf16 %v2817_v33, %v2817_v33  ;;  %v7013_v19 = vld [vmem:[%s7197_s2] ss:$0 sm:$0xff] }
 0x30c   : > { %3674 = vst.msk [vmem:[%s6599_s24 + $0xc4] sm:$0xf] %vm2846_vm0, %v3772_v11  ;;  %v3773_v16 = vpack.c.bf16 %v2815_v42, %v2815_v42  ;;  %v3850_v34 = vpop.f32.mrb[20].mxu0 }
 0x30d   : > { %v2580_v15 = vadd.f32 %v3850_v34, %v6582_v58  ;;  %v2571_v20 = vpop.f32.mrb[21].mxu0  ;;  %v3682_v0 = vrot.slane %v3775_v39, 9 }
 0x30e   : > { %3675 = vst.msk [vmem:[%s6599_s24 + $0xc8] sm:$0xf] %vm2846_vm0, %v3773_v16  ;;  %v2572_v47 = vadd.f32 %v6582_v58, %v2571_v20  ;;  %v3851_v43 = vpop.f32.mrb[22].mxu0 }
 0x30f   : > { %v2784_v54 = vmax.f32 %v2580_v15, 0.0  ;;  %v2583_v23 = vadd.f32 %v3851_v43, %v6582_v58  ;;  %v2574_v29 = vpop.f32.mrb[23].mxu0 }
 0x310   : > { %v2782_v40 = vmax.f32 %v2572_v47, 0.0  ;;  %v2575_v12 = vadd.f32 %v6582_v58, %v2574_v29 }
 0x311   : > { %v3738_v10 = vpack.c.bf16 %v2784_v54, %v2784_v54  ;;  %v2785_v59 = vmax.f32 %v2583_v23, 0.0 }
 0x312   : > { %v3736_v22 = vpack.c.bf16 %v2782_v40, %v2782_v40  ;;  %v2783_v6 = vmax.f32 %v2575_v12, 0.0 }
 0x313   : > { %v3013_v52 = vrot.slane %v3738_v10, 5  ;;  %v3739_v57 = vpack.c.bf16 %v2785_v59, %v2785_v59 }
 0x314   : > { %3600 = vst.msk [vmem:[%s6599_s24 + $0x4c] sm:$0xf] %vm2846_vm0, %v3736_v22  ;;  %v3737_v24 = vpack.c.bf16 %v2783_v6, %v2783_v6 }
 0x315   : > { %v3015_v25 = vrot.slane %v3013_v52, 4  ;;  %v3016_v2 = vrot.slane %v3739_v57, 5 }
 0x316   : > { %v3606_v13 = vrot.slane %v3737_v24, 9 }
 0x317   : > { %v3017_v38 = vsel %vm6681_vm3, %v3015_v25, %v3016_v2  ;;  %v3018_v12 = vrot.slane %v3016_v2, 4 }
 0x318   : > { %3608 = vst.msk [vmem:[%s6599_s24 + $0x54] sm:$0xf] %vm2846_vm0, %v3017_v38  ;;  %v3014_v56 = vsel %vm6681_vm3, %v3606_v13, %v3013_v52 }
 0x319   : > { %3607 = vst.msk [vmem:[%s6599_s24 + $0x50] sm:$0xf] %vm2846_vm0, %v3014_v56 }
 0x330   : > { %v3886_v18 = vpop.f32.mrb[20].mxu1 }
 0x331   : > { %v2724_v60 = vadd.f32 %v3886_v18, %v6582_v58  ;;  %v2715_v61 = vpop.f32.mrb[21].mxu1 }
 0x332   : > { %v2716_v50 = vadd.f32 %v6582_v58, %v2715_v61  ;;  %v3887_v48 = vpop.f32.mrb[22].mxu1 }
 0x333   : > { %v2820_v26 = vmax.f32 %v2724_v60, 0.0  ;;  %v2727_v32 = vadd.f32 %v3887_v48, %v6582_v58  ;;  %v2718_v44 = vpop.f32.mrb[23].mxu1 }
 0x334   : > { %v2818_v62 = vmax.f32 %v2716_v50, 0.0  ;;  %v2719_v28 = vadd.f32 %v6582_v58, %v2718_v44 }
 0x335   : > { %v3778_v63 = vpack.c.bf16 %v2820_v26, %v2820_v26  ;;  %v2821_v31 = vmax.f32 %v2727_v32, 0.0 }
 0x336   : > { %v3776_v14 = vpack.c.bf16 %v2818_v62, %v2818_v62  ;;  %v2819_v3 = vmax.f32 %v2719_v28, 0.0 }
 0x337   : > { %v3289_v37 = vrot.slane %v3778_v63, 5  ;;  %v6999_v49 = vpack.c.bf16 %v2821_v31, %v2821_v31 }
 0x338   : > { %v3283_v4 = vrot.slane %v3776_v14, 5  ;;  %v3777_v8 = vpack.c.bf16 %v2819_v3, %v2819_v3  ;;  %v3854_v55 = vpop.f32.mrb[24].mxu0 }
 0x339   : > { %v3291_v35 = vrot.slane %v3289_v37, 4  ;;  %v3292_v45 = vrot.slane %v6999_v49, 5  ;;  %v2596_v41 = vadd.f32 %v3854_v55, %v6582_v58  ;;  %v2587_v30 = vpop.f32.mrb[25].mxu0  ;;  %v3692_v31 = vrot.slane %v6999_v49, 10 }
 0x33a   : > { %v3284_v46 = vsel %vm6681_vm3, %v3682_v0, %v3283_v4  ;;  %v3285_v53 = vrot.slane %v3283_v4, 4  ;;  %v3286_v27 = vrot.slane %v3777_v8, 5  ;;  %v2588_v17 = vadd.f32 %v6582_v58, %v2587_v30  ;;  %v3855_v21 = vpop.f32.mrb[26].mxu0 }
 0x33b   : > { %3683 = vst.msk [vmem:[%s6599_s24 + $0xd0] sm:$0xf] %vm2846_vm0, %v3284_v46  ;;  %v3293_v1 = vsel %vm6681_vm3, %v3291_v35, %v3292_v45  ;;  %v2788_v5 = vmax.f32 %v2596_v41, 0.0  ;;  %v2599_v11 = vadd.f32 %v7013_v19, %v3855_v21  ;;  %v2590_v42 = vpop.f32.mrb[27].mxu0 }
 0x33c   : > { %3686 = vst.msk [vmem:[%s6599_s24 + $0xdc] sm:$0xf] %vm2846_vm0, %v3293_v1  ;;  %v3287_v58 = vsel %vm6681_vm3, %v3285_v53, %v3286_v27  ;;  %v3288_v16 = vrot.slane %v3286_v27, 4  ;;  %v2786_v34 = vmax.f32 %v2588_v17, 0.0  ;;  %v2591_v15 = vadd.f32 %v7013_v19, %v2590_v42 }
 0x33d   : > { %3684 = vst.msk [vmem:[%s6599_s24 + $0xd4] sm:$0xf] %vm2846_vm0, %v3287_v58  ;;  %v3743_v20 = vpack.c.bf16 %v2788_v5, %v2788_v5  ;;  %v2789_v47 = vmax.f32 %v2599_v11, 0.0 }
 0x33e   : > { %v3290_v43 = vsel %vm6681_vm3, %v3288_v16, %v3289_v37  ;;  %v3740_v54 = vpack.c.bf16 %v2786_v34, %v2786_v34  ;;  %v2787_v23 = vmax.f32 %v2591_v15, 0.0 }
 0x33f   : > { %3685 = vst.msk [vmem:[%s6599_s24 + $0xd8] sm:$0xf] %vm2846_vm0, %v3290_v43  ;;  %v3051_v29 = vrot.slane %v3743_v20, 6  ;;  %v7027_v40 = vpack.c.bf16 %v2789_v47, %v2789_v47 }
 0x340   : > { %v3019_v10 = vrot.slane %v3740_v54, 5  ;;  %v3741_v59 = vpack.c.bf16 %v2787_v23, %v2787_v23 }
 0x341   : > { %v3053_v22 = vrot.slane %v3051_v29, 4  ;;  %v3054_v6 = vrot.slane %v7027_v40, 6 }
 0x342   : > { %v3020_v52 = vsel %vm6681_vm3, %v3018_v12, %v3019_v10  ;;  %v3021_v57 = vrot.slane %v3019_v10, 4  ;;  %v3022_v24 = vrot.slane %v3741_v59, 5  ;;  %v3616_v25 = vrot.slane %v3741_v59, 10 }
 0x343   : > { %3609 = vst.msk [vmem:[%s6599_s24 + $0x58] sm:$0xf] %vm2846_vm0, %v3020_v52  ;;  %v3055_v13 = vsel %vm6784_vm6, %v3053_v22, %v3054_v6  ;;  %v3056_v43 = vrot.slane %v3054_v6, 4 }
 0x344   : > { %3618 = vst.msk [vmem:[%s6599_s24 + $0x64] sm:$0xf] %vm2846_vm0, %v3055_v13  ;;  %v3023_v2 = vsel %vm6681_vm3, %v3021_v57, %v3022_v24  ;;  %v3052_v38 = vsel %vm6784_vm6, %v3616_v25, %v3051_v29 }
 0x345   : > { %3610 = vst.msk [vmem:[%s6599_s24 + $0x5c] sm:$0xf] %vm2846_vm0, %v3023_v2  ;;  %3617 = vst.msk [vmem:[%s6599_s24 + $0x60] sm:$0xf] %vm2846_vm0, %v3052_v38 }
 0x35c   : > { %v3890_v56 = vpop.f32.mrb[24].mxu1 }
 0x35d   : > { %v2740_v9 = vadd.f32 %v7013_v19, %v3890_v56  ;;  %v2731_v33 = vpop.f32.mrb[25].mxu1 }
 0x35e   : > { %v2732_v18 = vadd.f32 %v7013_v19, %v2731_v33  ;;  %v3891_v60 = vpop.f32.mrb[26].mxu1 }
 0x35f   : > { %v2824_v61 = vmax.f32 %v2740_v9, 0.0  ;;  %v2743_v50 = vadd.f32 %v7013_v19, %v3891_v60  ;;  %v2734_v48 = vpop.f32.mrb[27].mxu1 }
 0x360   : > { %v2822_v7 = vmax.f32 %v2732_v18, 0.0  ;;  %v2735_v26 = vadd.f32 %v7013_v19, %v2734_v48 }
 0x361   : > { %v3783_v32 = vpack.c.bf16 %v2824_v61, %v2824_v61  ;;  %v2825_v44 = vmax.f32 %v2743_v50, 0.0 }
 0x362   : > { %v3781_v39 = vpack.c.bf16 %v2822_v7, %v2822_v7  ;;  %v2823_v62 = vmax.f32 %v2735_v26, 0.0 }
 0x363   : > { %v3327_v28 = vrot.slane %v3783_v32, 6  ;;  %v7050_v63 = vpack.c.bf16 %v2825_v44, %v2825_v44 }
 0x364   : > { %v3321_v14 = vrot.slane %v3781_v39, 6  ;;  %v3782_v3 = vpack.c.bf16 %v2823_v62, %v2823_v62  ;;  %v3858_v37 = vpop.f32.mrb[28].mxu0 }
 0x365   : > { %v3329_v0 = vrot.slane %v3327_v28, 4  ;;  %v3330_v4 = vrot.slane %v7050_v63, 6  ;;  %v2612_v8 = vadd.f32 %v7013_v19, %v3858_v37  ;;  %v2603_v55 = vpop.f32.mrb[29].mxu0  ;;  %v3702_v44 = vrot.slane %v7050_v63, 11 }
 0x366   : > { %v3322_v35 = vsel %vm6784_vm6, %v3692_v31, %v3321_v14  ;;  %v3323_v45 = vrot.slane %v3321_v14, 4  ;;  %v3324_v41 = vrot.slane %v3782_v3, 6  ;;  %v2604_v30 = vadd.f32 %v7013_v19, %v2603_v55  ;;  %v3859_v46 = vpop.f32.mrb[30].mxu0 }
 0x367   : > { %3693 = vst.msk [vmem:[%s6599_s24 + $0xe0] sm:$0xf] %vm2846_vm0, %v3322_v35  ;;  %v3331_v49 = vsel %vm6784_vm6, %v3329_v0, %v3330_v4  ;;  %v2792_v53 = vmax.f32 %v2612_v8, 0.0  ;;  %v2615_v27 = vadd.f32 %v7013_v19, %v3859_v46  ;;  %v2606_v17 = vpop.f32.mrb[31].mxu0 }
 0x368   : > { %3696 = vst.msk [vmem:[%s6599_s24 + $0xec] sm:$0xf] %vm2846_vm0, %v3331_v49  ;;  %v3325_v21 = vsel %vm6784_vm6, %v3323_v45, %v3324_v41  ;;  %v3326_v1 = vrot.slane %v3324_v41, 4  ;;  %v2790_v5 = vmax.f32 %v2604_v30, 0.0  ;;  %v2607_v11 = vadd.f32 %v7013_v19, %v2606_v17 }
 0x369   : > { %3694 = vst.msk [vmem:[%s6599_s24 + $0xe4] sm:$0xf] %vm2846_vm0, %v3325_v21  ;;  %v3748_v42 = vpack.c.bf16 %v2792_v53, %v2792_v53  ;;  %v2793_v58 = vmax.f32 %v2615_v27, 0.0 }
 0x36a   : > { %v3328_v16 = vsel %vm6784_vm6, %v3326_v1, %v3327_v28  ;;  %v3745_v34 = vpack.c.bf16 %v2790_v5, %v2790_v5  ;;  %v2791_v15 = vmax.f32 %v2607_v11, 0.0 }
 0x36b   : > { %3695 = vst.msk [vmem:[%s6599_s24 + $0xe8] sm:$0xf] %vm2846_vm0, %v3328_v16  ;;  %v3089_v20 = vrot.slane %v3748_v42, 7  ;;  %v7074_v47 = vpack.c.bf16 %v2793_v58, %v2793_v58 }
 0x36c   : > { %v3057_v54 = vrot.slane %v3745_v34, 6  ;;  %v3746_v23 = vpack.c.bf16 %v2791_v15, %v2791_v15 }
 0x36d   : > { %v3091_v29 = vrot.slane %v3089_v20, 4  ;;  %v3092_v40 = vrot.slane %v7074_v47, 7 }
 0x36e   : > { %v3058_v12 = vsel %vm6784_vm6, %v3056_v43, %v3057_v54  ;;  %v3059_v10 = vrot.slane %v3057_v54, 4  ;;  %v3060_v59 = vrot.slane %v3746_v23, 6  ;;  %v3626_v22 = vrot.slane %v3746_v23, 11 }
 0x36f   : > { %3619 = vst.msk [vmem:[%s6599_s24 + $0x68] sm:$0xf] %vm2846_vm0, %v3058_v12  ;;  %v3093_v52 = vsel %vm6898_vm9, %v3091_v29, %v3092_v40  ;;  %v3094_v1 = vrot.slane %v3092_v40, 4 }
 0x370   : > { %3628 = vst.msk [vmem:[%s6599_s24 + $0x74] sm:$0xf] %vm2846_vm0, %v3093_v52  ;;  %v3061_v6 = vsel %vm6784_vm6, %v3059_v10, %v3060_v59  ;;  %v3090_v57 = vsel %vm6898_vm9, %v3626_v22, %v3089_v20 }
 0x371   : > { %3620 = vst.msk [vmem:[%s6599_s24 + $0x6c] sm:$0xf] %vm2846_vm0, %v3061_v6  ;;  %3627 = vst.msk [vmem:[%s6599_s24 + $0x70] sm:$0xf] %vm2846_vm0, %v3090_v57 }
 0x388   : > { %v3894_v24 = vpop.f32.mrb[28].mxu1 }
 0x389   : > { %v2756_v25 = vadd.f32 %v7013_v19, %v3894_v24  ;;  %v2747_v13 = vpop.f32.mrb[29].mxu1 }
 0x38a   : > { %v2748_v2 = vadd.f32 %v7013_v19, %v2747_v13  ;;  %v3895_v38 = vpop.f32.mrb[30].mxu1 }
 0x38b   : > { %v2828_v56 = vmax.f32 %v2756_v25, 0.0  ;;  %v2759_v36 = vadd.f32 %v7013_v19, %v3895_v38  ;;  %v2750_v9 = vpop.f32.mrb[31].mxu1 }
 0x38c   : > { %v2826_v33 = vmax.f32 %v2748_v2, 0.0  ;;  %v2751_v18 = vadd.f32 %v7013_v19, %v2750_v9 }
 0x38d   : > { %v3788_v60 = vpack.c.bf16 %v2828_v56, %v2828_v56  ;;  %v2829_v61 = vmax.f32 %v2759_v36, 0.0  ;;  %v3862_v50 = vpop.f32.mrb[32].mxu0 }
 0x38e   : > { %v3786_v48 = vpack.c.bf16 %v2826_v33, %v2826_v33  ;;  %v2827_v7 = vmax.f32 %v2751_v18, 0.0  ;;  %v2628_v26 = vadd.f32 %v7013_v19, %v3862_v50  ;;  %v2619_v32 = vpop.f32.mrb[33].mxu0 }
 0x38f   : > { %v3365_v39 = vrot.slane %v3788_v60, 7  ;;  %v3789_v62 = vpack.c.bf16 %v2829_v61, %v2829_v61  ;;  %v2620_v28 = vadd.f32 %v7013_v19, %v2619_v32  ;;  %v3863_v31 = vpop.f32.mrb[34].mxu0 }
 0x390   : > { %v3359_v14 = vrot.slane %v3786_v48, 7  ;;  %v3787_v3 = vpack.c.bf16 %v2827_v7, %v2827_v7  ;;  %v2796_v37 = vmax.f32 %v2628_v26, 0.0  ;;  %v2631_v0 = vadd.f32 %v7013_v19, %v3863_v31  ;;  %v2622_v4 = vpop.f32.mrb[35].mxu0 }
 0x391   : > { %v3367_v8 = vrot.slane %v3365_v39, 4  ;;  %v3368_v55 = vrot.slane %v3789_v62, 7  ;;  %v2794_v35 = vmax.f32 %v2620_v28, 0.0  ;;  %v2623_v45 = vadd.f32 %v7013_v19, %v2622_v4 }
 0x392   : > { %v3360_v63 = vsel %vm6898_vm9, %v3702_v44, %v3359_v14  ;;  %v3361_v41 = vrot.slane %v3359_v14, 4  ;;  %v3362_v30 = vrot.slane %v3787_v3, 7  ;;  %v3752_v46 = vpack.c.bf16 %v2796_v37, %v2796_v37 }
 0x393   : > { %3703 = vst.msk [vmem:[%s6599_s24 + $0xf0] sm:$0xf] %vm2846_vm0, %v3360_v63  ;;  %v3369_v49 = vsel %vm6898_vm9, %v3367_v8, %v3368_v55  ;;  %v3750_v53 = vpack.c.bf16 %v2794_v35, %v2794_v35  ;;  %v2797_v27 = vmax.f32 %v2631_v0, 0.0  ;;  %v2795_v17 = vmax.f32 %v2623_v45, 0.0 }
 0x394   : > { %3706 = vst.msk [vmem:[%s6599_s24 + $0xfc] sm:$0xf] %vm2846_vm0, %v3369_v49  ;;  %v3363_v19 = vsel %vm6898_vm9, %v3361_v41, %v3362_v30  ;;  %v3364_v21 = vrot.slane %v3362_v30, 4  ;;  %3635 = vst.msk [vmem:[%s6599_s24 + $0x80] sm:$0xf] %vm2846_vm0, %v3752_v46 }
 0x395   : > { %3704 = vst.msk [vmem:[%s6599_s24 + $0xf4] sm:$0xf] %vm2846_vm0, %v3363_v19  ;;  %v3095_v5 = vrot.slane %v3750_v53, 7  ;;  %v3753_v11 = vpack.c.bf16 %v2797_v27, %v2797_v27  ;;  %v3751_v42 = vpack.c.bf16 %v2795_v17, %v2795_v17 }
 0x396   : > { %v3366_v58 = vsel %vm6898_vm9, %v3364_v21, %v3365_v39 }
 0x397   : > { %3705 = vst.msk [vmem:[%s6599_s24 + $0xf8] sm:$0xf] %vm2846_vm0, %v3366_v58  ;;  %v3096_v16 = vsel %vm6898_vm9, %v3094_v1, %v3095_v5  ;;  %v3097_v34 = vrot.slane %v3095_v5, 4  ;;  %3636 = vst.msk [vmem:[%s6599_s24 + $0x84] sm:$0xf] %vm2846_vm0, %v3753_v11  ;;  %v3098_v15 = vrot.slane %v3751_v42, 7 }
 0x398   : > { %3629 = vst.msk [vmem:[%s6599_s24 + $0x78] sm:$0xf] %vm2846_vm0, %v3096_v16 }
 0x399   : > { %v3099_v20 = vsel %vm6898_vm9, %v3097_v34, %v3098_v15 }
 0x39a   : > { %3630 = vst.msk [vmem:[%s6599_s24 + $0x7c] sm:$0xf] %vm2846_vm0, %v3099_v20 }
 0x39b   : > { %4093 = shalt.err (!%p4090_p6)
}
 0x39c   : > { %s4094_s9 = scalar_lea.hbm %s7130_s8, 4096  ;;  %s4098_s29 = scalar_lea.hbm %s7198_s3, 16384 }
 0x39d   : > { %p4095_p7 = scmp.ne.s32.totalorder %s7130_s8, %s4094_s9  ;;  %p4099_p11 = scmp.lt.u32.totalorder %s7130_s8, %s7198_s3 }
 0x39e   : > { %p4100_p12 = scmp.lt.u32.totalorder %s4098_s29, %s4094_s9  ;;  %p4102_p0 = scmp.lt.u32.totalorder %s4094_s9, %s7130_s8 }
 0x39f   : > { %p4096_p9 = pnand %p4095_p7, %p4258_p3 }
 0x3a0   : > { %p4101_p13 = por %p4100_p12, %p4099_p11 }
 0x3a1   : > { %p4097_p10 = pneg %p4096_p9 }
 0x3a2   : > { %p4103_p1 = por %p4102_p0, %p4101_p13 }
 0x3a4   : > { %p4104_p2 = pnand %p4103_p1, %p4097_p10 }
 0x3a6   : > { %4107 = shalt.err (!%p4104_p2)
}
 0x3a7   : > { %s4186_s6 = smov 64  }
 0x3a8   : > { %3899 = dma.vmem_to_hbm [thread:$0]  (%p4258_p3), %s7134_s5, 4096, %s7130_s8, %s7142_s10, %s4186_s6, %s4186_s6, %s4180_s4  }
 0x3a9 PF: > { %p3905_p4 = scmp.ge.s32.totalorder %s4174_s19, 2  ;;  %s3411_s7 = sand.u32 1, %s4146_s12  }
 0x3aa   : > { %s3412_s11 = scalar_lea.sflag [#allocation3], %s3411_s7 }
 0x3ab   : > { %p3902_p5 = pnand %p3905_p4, %p4267_p8 }
 0x3ad   : > { %4141 = dma.done.wait (!%p3902_p5), %s3412_s11, 4096  }
 0x3ae   : > { %4143 = vsyncadd (!%p3902_p5), %s3412_s11, 4294963200  ;;  %s16_s19 = sadd.s32 1, %s4174_s19   ;;  %s7629_s12 = smov %s4150_s13 }
 0x3af   : > { %p13_p6 = scmp.ge.s32.totalorder %s16_s19, 6   ;;  %s7630_s13 = smov %s4154_s14 }
 0x3b0   : > { %s7631_s14 = smov %s4276_s30  ;;  %s7632_s15 = smov %s4166_s17 }
 0x3b1   : > { %s7633_s16 = smov %s4170_s18  ;;  %s7634_s17 = smov %s7637_s22 }
 0x3b2   : > { %s7635_s18 = smov %s7641_s23  ;;  %15 = sbr.rel (!%p13_p6) target bundleno = 5 (0x5), region = 83 }
 0x3b9   :  { %3417 = vsyncpa [#allocation3], 1 }
 0x3ba   :  { %3419 = vsyncpa [#allocation3 + $0x1], 1 }

</bundles_post_ra>
